<compile_context>
chip_gen: v5e
topology: v5e:2x2
jax: 0.10.0
libtpu: 0.0.40
codegen_flags: <defaults>
</compile_context>

<pallas_src>
import functools

import numpy as np
import jax
import jax.numpy as jnp
from jax import lax
from jax.experimental import pallas as pl
from jax.experimental.pallas import tpu as pltpu


def birnn_kernel(seq_ref,                       # (1,) int32 scalar-prefetch (SMEM)
                 x_ref,                         # (L*B, H)  time-major embeddings
                 w_ih_ref, b_ih_ref,            # (H, 6H), (1, 6H)  [fwd | rev] input gates
                 w_hh_f_ref, b_hh_f_ref,        # (H, 3H), (1, 3H)
                 w_hh_r_ref, b_hh_r_ref,        # (H, 3H), (1, 3H)
                 w_proj_ref, b_proj_ref,        # (2H, H), (1, H)
                 out_ref,                       # (L*B, 2H)  [fwd | rev]
                 hidden_ref,                    # (B, 2H)
                 proj_ref,                      # (B, H)
                 gi_ref,                        # scratch (L*B, 6H)
                 *, chunk_b, hidden_size, max_length):
    H = hidden_size
    B = chunk_b
    L = seq_ref[0]                              # dynamic sequence length (shared in chunk)

    # One batched MXU matmul for the input-side gates of BOTH directions,
    # hoisted out of the serial recurrence.
    gi_ref[...] = (
        jnp.dot(x_ref[...], w_ih_ref[...], preferred_element_type=jnp.float32)
        + b_ih_ref[...])

    w_hh_f = w_hh_f_ref[...]
    b_hh_f = b_hh_f_ref[...]
    w_hh_r = w_hh_r_ref[...]
    b_hh_r = b_hh_r_ref[...]

    def gru_step(gi, h, w_hh_t, b_hh):
        # torch.nn.GRU gate order (r, z, n); only the hidden-side matmul stays
        # on the per-step critical path.
        gh = jnp.dot(h, w_hh_t, preferred_element_type=jnp.float32) + b_hh
        rz = jax.nn.sigmoid(gi[:, :2 * H] + gh[:, :2 * H])   # fused r,z sigmoid
        r = rz[:, :H]
        z = rz[:, H:]
        n = jnp.tanh(gi[:, 2 * H:] + r * gh[:, 2 * H:])
        return (1.0 - z) * n + z * h

    zeros_bh = jnp.zeros((B, H), jnp.float32)

    # Fused, fully unrolled loop: step i runs forward t = i and reverse
    # t = L-1-i.  Rows with t >= L receive zeros (matches the pre-zeroed
    # fwd_outputs / rev_outputs of the PyTorch module), so no separate
    # zero-init pass over the output is needed.
    def body(i, carry):
        h_f, h_r = carry
        valid = i < L

        row_f = pl.multiple_of(i * B, B)
        gi_f_rows = gi_ref[pl.ds(row_f, B), :]               # (B, 6H)
        h_f_new = gru_step(gi_f_rows[:, :3 * H], h_f, w_hh_f, b_hh_f)

        t_rev = jnp.maximum(L - 1 - i, 0)
        row_r = pl.multiple_of(t_rev * B, B)
        gi_r_rows = gi_ref[pl.ds(row_r, B), :]               # (B, 6H)
        h_r_new = gru_step(gi_r_rows[:, 3 * H:], h_r, w_hh_r, b_hh_r)

        out_ref[pl.ds(row_f, B), 0:H] = jnp.where(valid, h_f_new, zeros_bh)
        row_r_store = pl.multiple_of(jnp.where(valid, t_rev, i) * B, B)
        out_ref[pl.ds(row_r_store, B), H:2 * H] = jnp.where(valid, h_r_new, zeros_bh)

        return (jnp.where(valid, h_f_new, h_f),
                jnp.where(valid, h_r_new, h_r))

    h_f, h_r = lax.fori_loop(0, max_length, body, (zeros_bh, zeros_bh),
                             unroll=True)

    # hidden = cat(fwd_hidden, rev_hidden); projected = Linear(2H, H)(hidden)
    hidden = jnp.concatenate([h_f, h_r], axis=-1)            # (B, 2H)
    hidden_ref[...] = hidden
    proj_ref[...] = (
        jnp.dot(hidden, w_proj_ref[...], preferred_element_type=jnp.float32)
        + b_proj_ref[...])


def encoder_birnn_forward(embeddings, seq_len, params, *, max_length,
                          batch_chunks=2):
    """Batched BaseEncoderBiRNN forward.

    embeddings: (B, max_length, H) f32, zero-padded beyond seq_len.
    seq_len:    scalar int (shared by all sequences in the batch).
    Returns: outputs (B, max_length, 2H), hidden (1, B, 2H), projected (1, B, H).
    Each batch slice matches the PyTorch module's single-sequence output
    ((max_length, 2H), (1, 1, 2H), (1, 1, H)).
    """
    B, L, H = embeddings.shape
    assert L == max_length
    assert B % batch_chunks == 0
    cb = B // batch_chunks

    # Time-major layout within each batch chunk: row = t * cb + b.
    x = embeddings.reshape(batch_chunks, cb, L, H)
    x = jnp.transpose(x, (0, 2, 1, 3)).reshape(batch_chunks, L * cb, H)

    # Concatenate fwd/rev input-gate weights so one matmul covers both
    # directions.
    w_ih_cat = jnp.concatenate([params["w_ih_f_t"], params["w_ih_r_t"]], axis=1)  # (H, 6H)
    b_ih_cat = jnp.concatenate([params["b_ih_f"], params["b_ih_r"]], axis=1)      # (1, 6H)

    seq_len_arr = jnp.asarray(seq_len, dtype=jnp.int32).reshape((1,))

    def w_spec(arr):
        return pl.BlockSpec(arr.shape, lambda c, s: (0, 0))

    kernel = functools.partial(birnn_kernel, chunk_b=cb, hidden_size=H,
                               max_length=max_length)

    out_flat, hidden_c, proj_c = pl.pallas_call(
        kernel,
        out_shape=(
            jax.ShapeDtypeStruct((batch_chunks, L * cb, 2 * H), jnp.float32),
            jax.ShapeDtypeStruct((batch_chunks, cb, 2 * H), jnp.float32),
            jax.ShapeDtypeStruct((batch_chunks, cb, H), jnp.float32),
        ),
        grid_spec=pltpu.PrefetchScalarGridSpec(
            num_scalar_prefetch=1,
            grid=(batch_chunks,),
            in_specs=[
                pl.BlockSpec((None, L * cb, H), lambda c, s: (c, 0, 0)),
                w_spec(w_ih_cat), w_spec(b_ih_cat),
                w_spec(params["w_hh_f_t"]), w_spec(params["b_hh_f"]),
                w_spec(params["w_hh_r_t"]), w_spec(params["b_hh_r"]),
                w_spec(params["w_proj_t"]), w_spec(params["b_proj"]),
            ],
            out_specs=[
                pl.BlockSpec((None, L * cb, 2 * H), lambda c, s: (c, 0, 0)),
                pl.BlockSpec((None, cb, 2 * H), lambda c, s: (c, 0, 0)),
                pl.BlockSpec((None, cb, H), lambda c, s: (c, 0, 0)),
            ],
            scratch_shapes=[pltpu.VMEM((L * cb, 6 * H), jnp.float32)],
        ),
        compiler_params=pltpu.CompilerParams(
            dimension_semantics=("parallel",)),   # v7x: batch chunks over 2 TCs
    )(
        seq_len_arr, x, w_ih_cat, b_ih_cat,
        params["w_hh_f_t"], params["b_hh_f"],
        params["w_hh_r_t"], params["b_hh_r"],
        params["w_proj_t"], params["b_proj"],
    )

    outputs = out_flat.reshape(batch_chunks, L, cb, 2 * H)
    outputs = jnp.transpose(outputs, (0, 2, 1, 3)).reshape(B, L, 2 * H)
    hidden = hidden_c.reshape(1, B, 2 * H)
    projected = proj_c.reshape(1, B, H)
    return outputs, hidden, projected


def init_params(key, hidden_size):
    """Deterministic synthetic weights with torch.nn.GRU / Linear shapes."""
    H = hidden_size
    ks = jax.random.split(key, 10)
    scale = 1.0 / jnp.sqrt(jnp.float32(H))

    def u(k, shape):
        return jax.random.uniform(k, shape, jnp.float32, -scale, scale)

    # torch stores weight_ih/hh as (3H, H); pass transposed (H, 3H) for x @ W^T.
    return {
        "w_ih_f_t": u(ks[0], (3 * H, H)).T,
        "w_hh_f_t": u(ks[1], (3 * H, H)).T,
        "b_ih_f": u(ks[2], (1, 3 * H)),
        "b_hh_f": u(ks[3], (1, 3 * H)),
        "w_ih_r_t": u(ks[4], (3 * H, H)).T,
        "w_hh_r_t": u(ks[5], (3 * H, H)).T,
        "b_ih_r": u(ks[6], (1, 3 * H)),
        "b_hh_r": u(ks[7], (1, 3 * H)),
        # nn.Linear(2H, H): weight (H, 2H) -> transposed (2H, H)
        "w_proj_t": u(ks[8], (H, 2 * H)).T,
        "b_proj": u(ks[9], (1, H)),
    }


def reference_forward_np(emb, seq_len, params, max_length):
    """Pure NumPy float64 reference of the PyTorch forward (per sequence)."""
    p = {k: np.asarray(v, np.float64) for k, v in params.items()}
    emb = np.asarray(emb, np.float64)
    B, L, H = emb.shape

    def cell(x, h, w_ih_t, w_hh_t, b_ih, b_hh):
        gi = x @ w_ih_t + b_ih
        gh = h @ w_hh_t + b_hh
        r = 1.0 / (1.0 + np.exp(-(gi[:, :H] + gh[:, :H])))
        z = 1.0 / (1.0 + np.exp(-(gi[:, H:2 * H] + gh[:, H:2 * H])))
        n = np.tanh(gi[:, 2 * H:] + r * gh[:, 2 * H:])
        return (1.0 - z) * n + z * h

    outputs = np.zeros((B, max_length, 2 * H))
    hidden = np.zeros((1, B, 2 * H))
    proj = np.zeros((1, B, H))
    for b in range(B):
        h_f = np.zeros((1, H))
        h_r = np.zeros((1, H))
        for t in range(seq_len):
            h_f = cell(emb[b, t:t + 1], h_f, p["w_ih_f_t"], p["w_hh_f_t"],
                       p["b_ih_f"], p["b_hh_f"])
            outputs[b, t, :H] = h_f[0]
        for t in range(seq_len - 1, -1, -1):
            h_r = cell(emb[b, t:t + 1], h_r, p["w_ih_r_t"], p["w_hh_r_t"],
                       p["b_ih_r"], p["b_hh_r"])
            outputs[b, t, H:] = h_r[0]
        hid = np.concatenate([h_f, h_r], axis=1)
        hidden[0, b] = hid[0]
        proj[0, b] = (hid @ p["w_proj_t"] + p["b_proj"])[0]
    return outputs, hidden, proj


if __name__ == "__main__":
    HIDDEN = 32        # word_vectors.vector_size
    MAX_LENGTH = 12
    SEQ_LEN = 8        # number of input words (incl. SOS / EOS)
    BATCH = 16         # independent sequences (each uses the module's semantics)
    CHUNKS = 2         # grid axis; v7x runs one chunk per TensorCore
    VOCAB = 16

    key = jax.random.PRNGKey(0)
    k_emb, k_ids, k_par = jax.random.split(key, 3)

    # Emulate the word -> vector lookup (SOS/EOS/OOV rows + pretrained rows).
    # TODO(synk): char_embed=True / string-dict lookup fallback of the derived
    # encoder is host-side Python and is not implemented here.
    table = jax.random.normal(k_emb, (VOCAB, HIDDEN), jnp.float32)
    table = table.at[0].set(jnp.ones((HIDDEN,), jnp.float32))    # sos_vector
    table = table.at[1].set(-jnp.ones((HIDDEN,), jnp.float32))   # eos_vector
    table = table.at[2].set(jnp.zeros((HIDDEN,), jnp.float32))   # empty_vector

    word_ids = jax.random.randint(k_ids, (BATCH, SEQ_LEN), 0, VOCAB, jnp.int32)
    word_ids = word_ids.at[:, 0].set(0)   # SOS
    word_ids = word_ids.at[:, -1].set(1)  # EOS
    emb = jnp.take(table, word_ids, axis=0)                      # (B, SEQ_LEN, H)

    # Pad to max_length once; seq_len stays a runtime scalar (no recompiles
    # for different lengths <= MAX_LENGTH).
    embeddings = jnp.zeros((BATCH, MAX_LENGTH, HIDDEN), jnp.float32)
    embeddings = embeddings.at[:, :SEQ_LEN, :].set(emb)

    params = init_params(k_par, HIDDEN)

    outputs, hidden, projected = encoder_birnn_forward(
        embeddings, SEQ_LEN, params, max_length=MAX_LENGTH, batch_chunks=CHUNKS)
    jax.block_until_ready((outputs, hidden, projected))

    assert outputs.shape == (BATCH, MAX_LENGTH, 2 * HIDDEN)
    assert hidden.shape == (1, BATCH, 2 * HIDDEN)
    assert projected.shape == (1, BATCH, HIDDEN)

    ref_out, ref_hid, ref_proj = reference_forward_np(
        np.asarray(embeddings), SEQ_LEN, params, MAX_LENGTH)
    np.testing.assert_allclose(np.asarray(outputs), ref_out, rtol=2e-2, atol=2e-2)
    np.testing.assert_allclose(np.asarray(hidden), ref_hid, rtol=2e-2, atol=2e-2)
    np.testing.assert_allclose(np.asarray(projected), ref_proj, rtol=2e-2, atol=2e-2)

    print("KERNEL_OK")
</pallas_src>

<mosaic_0001>
module attributes {stable_mosaic.version = 11 : i64} {
  func.func @birnn_kernel(%arg0: i32, %arg1: memref<1xi32, #tpu.memory_space<smem>>, %arg2: memref<1x96x32xf32, #tpu.memory_space<vmem>>, %arg3: memref<32x192xf32, #tpu.memory_space<vmem>>, %arg4: memref<1x192xf32, #tpu.memory_space<vmem>>, %arg5: memref<32x96xf32, #tpu.memory_space<vmem>>, %arg6: memref<1x96xf32, #tpu.memory_space<vmem>>, %arg7: memref<32x96xf32, #tpu.memory_space<vmem>>, %arg8: memref<1x96xf32, #tpu.memory_space<vmem>>, %arg9: memref<64x32xf32, #tpu.memory_space<vmem>>, %arg10: memref<1x32xf32, #tpu.memory_space<vmem>>, %arg11: memref<1x96x64xf32, #tpu.memory_space<vmem>>, %arg12: memref<1x8x64xf32, #tpu.memory_space<vmem>>, %arg13: memref<1x8x32xf32, #tpu.memory_space<vmem>>, %arg14: memref<96x192xf32, #tpu.memory_space<vmem>>) attributes {dimension_semantics = [#tpu.dimension_semantics<parallel>], iteration_bounds = array<i64: 2>, scalar_prefetch = 1 : i64, scratch_operands = 1 : i64, tpu.core_type = #tpu.core_type<tc>, window_params = [{transform_indices = @transform_0, window_bounds = array<i64: 1, 96, 32>}, {pipeline_mode = #tpu.pipeline_mode<synchronous>, transform_indices = @transform_1, window_bounds = array<i64: 32, 192>}, {pipeline_mode = #tpu.pipeline_mode<synchronous>, transform_indices = @transform_2, window_bounds = array<i64: 1, 192>}, {pipeline_mode = #tpu.pipeline_mode<synchronous>, transform_indices = @transform_3, window_bounds = array<i64: 32, 96>}, {pipeline_mode = #tpu.pipeline_mode<synchronous>, transform_indices = @transform_4, window_bounds = array<i64: 1, 96>}, {pipeline_mode = #tpu.pipeline_mode<synchronous>, transform_indices = @transform_5, window_bounds = array<i64: 32, 96>}, {pipeline_mode = #tpu.pipeline_mode<synchronous>, transform_indices = @transform_6, window_bounds = array<i64: 1, 96>}, {pipeline_mode = #tpu.pipeline_mode<synchronous>, transform_indices = @transform_7, window_bounds = array<i64: 64, 32>}, {pipeline_mode = #tpu.pipeline_mode<synchronous>, transform_indices = @transform_8, window_bounds = array<i64: 1, 32>}, {transform_indices = @transform_9, window_bounds = array<i64: 1, 96, 64>}, {transform_indices = @transform_10, window_bounds = array<i64: 1, 8, 64>}, {transform_indices = @transform_11, window_bounds = array<i64: 1, 8, 32>}]} {
    %c0 = arith.constant 0 : index
    %0 = memref.load %arg1[%c0] : memref<1xi32, #tpu.memory_space<smem>>
    %c0_0 = arith.constant 0 : index
    %c0_1 = arith.constant 0 : index
    %c0_2 = arith.constant 0 : index
    %1 = vector.load %arg2[%c0_0, %c0_1, %c0_2] : memref<1x96x32xf32, #tpu.memory_space<vmem>>, vector<1x96x32xf32>
    %2 = vector.shape_cast %1 : vector<1x96x32xf32> to vector<96x32xf32>
    %c0_3 = arith.constant 0 : index
    %c0_4 = arith.constant 0 : index
    %3 = vector.load %arg3[%c0_3, %c0_4] : memref<32x192xf32, #tpu.memory_space<vmem>>, vector<32x192xf32>
    %cst = arith.constant dense<0.000000e+00> : vector<96x192xf32>
    %4 = tpu.matmul %2, %3, %cst {dimension_numbers = #tpu.dot_dimension_numbers<[1], [0], [0], [1], [0, 0, 1, 1], [], []>} : vector<96x32xf32>, vector<32x192xf32>, vector<96x192xf32> -> vector<96x192xf32>
    %c0_5 = arith.constant 0 : index
    %c0_6 = arith.constant 0 : index
    %5 = vector.load %arg4[%c0_5, %c0_6] : memref<1x192xf32, #tpu.memory_space<vmem>>, vector<1x192xf32>
    %6 = vector.broadcast %5 : vector<1x192xf32> to vector<96x192xf32>
    %7 = arith.addf %4, %6 : vector<96x192xf32>
    %c0_7 = arith.constant 0 : index
    %c0_8 = arith.constant 0 : index
    %8 = vector.load %arg14[%c0_7, %c0_8] : memref<96x192xf32, #tpu.memory_space<vmem>>, vector<96x192xf32>
    tpu.vector_store %arg14[%c0_7, %c0_8], %7 {strides = array<i32>} : memref<96x192xf32, #tpu.memory_space<vmem>>, vector<96x192xf32>,
    %c0_9 = arith.constant 0 : index
    %c0_10 = arith.constant 0 : index
    %9 = vector.load %arg5[%c0_9, %c0_10] : memref<32x96xf32, #tpu.memory_space<vmem>>, vector<32x96xf32>
    %c0_11 = arith.constant 0 : index
    %c0_12 = arith.constant 0 : index
    %10 = vector.load %arg6[%c0_11, %c0_12] : memref<1x96xf32, #tpu.memory_space<vmem>>, vector<1x96xf32>
    %c0_13 = arith.constant 0 : index
    %c0_14 = arith.constant 0 : index
    %11 = vector.load %arg7[%c0_13, %c0_14] : memref<32x96xf32, #tpu.memory_space<vmem>>, vector<32x96xf32>
    %c0_15 = arith.constant 0 : index
    %c0_16 = arith.constant 0 : index
    %12 = vector.load %arg8[%c0_15, %c0_16] : memref<1x96xf32, #tpu.memory_space<vmem>>, vector<1x96xf32>
    %cst_17 = arith.constant 0.000000e+00 : f32
    %13 = vector.broadcast %cst_17 : f32 to vector<8x32xf32>
    %c0_i32 = arith.constant 0 : i32
    %14 = arith.cmpi slt, %c0_i32, %0 : i32
    %c8_i32 = arith.constant 8 : i32
    %15 = arith.muli %c0_i32, %c8_i32 : i32
    %16 = tpu.assume_multiple %15, 8 : i32
    %17 = arith.index_cast %16 : i32 to index
    %c0_18 = arith.constant 0 : index
    %18 = vector.load %arg14[%17, %c0_18] : memref<96x192xf32, #tpu.memory_space<vmem>>, vector<8x192xf32>
    %19 = vector.extract_strided_slice %18 {offsets = [0, 0], sizes = [8, 96], strides = [1, 1]} : vector<8x192xf32> to vector<8x96xf32>
    %cst_19 = arith.constant dense<0.000000e+00> : vector<8x96xf32>
    %20 = tpu.matmul %13, %9, %cst_19 {dimension_numbers = #tpu.dot_dimension_numbers<[1], [0], [0], [1], [0, 0, 1, 1], [], []>} : vector<8x32xf32>, vector<32x96xf32>, vector<8x96xf32> -> vector<8x96xf32>
    %21 = vector.broadcast %10 : vector<1x96xf32> to vector<8x96xf32>
    %22 = arith.addf %20, %21 : vector<8x96xf32>
    %23 = vector.extract_strided_slice %19 {offsets = [0, 0], sizes = [8, 64], strides = [1, 1]} : vector<8x96xf32> to vector<8x64xf32>
    %24 = vector.extract_strided_slice %22 {offsets = [0, 0], sizes = [8, 64], strides = [1, 1]} : vector<8x96xf32> to vector<8x64xf32>
    %25 = arith.addf %23, %24 : vector<8x64xf32>
    %26 = arith.negf %25 : vector<8x64xf32>
    %27 = math.exp %26 : vector<8x64xf32>
    %cst_20 = arith.constant 1.000000e+00 : f32
    %28 = vector.broadcast %cst_20 : f32 to vector<8x64xf32>
    %29 = arith.addf %28, %27 : vector<8x64xf32>
    %30 = arith.divf %28, %29 : vector<8x64xf32>
    %31 = vector.extract_strided_slice %30 {offsets = [0, 0], sizes = [8, 32], strides = [1, 1]} : vector<8x64xf32> to vector<8x32xf32>
    %32 = vector.extract_strided_slice %30 {offsets = [0, 32], sizes = [8, 32], strides = [1, 1]} : vector<8x64xf32> to vector<8x32xf32>
    %33 = vector.extract_strided_slice %19 {offsets = [0, 64], sizes = [8, 32], strides = [1, 1]} : vector<8x96xf32> to vector<8x32xf32>
    %34 = vector.extract_strided_slice %22 {offsets = [0, 64], sizes = [8, 32], strides = [1, 1]} : vector<8x96xf32> to vector<8x32xf32>
    %35 = arith.mulf %31, %34 : vector<8x32xf32>
    %36 = arith.addf %33, %35 : vector<8x32xf32>
    %37 = math.tanh %36 : vector<8x32xf32>
    %cst_21 = arith.constant 1.000000e+00 : f32
    %38 = vector.broadcast %cst_21 : f32 to vector<8x32xf32>
    %39 = arith.subf %38, %32 : vector<8x32xf32>
    %40 = arith.mulf %39, %37 : vector<8x32xf32>
    %41 = arith.mulf %32, %13 : vector<8x32xf32>
    %42 = arith.addf %40, %41 : vector<8x32xf32>
    %c1_i32 = arith.constant 1 : i32
    %43 = arith.subi %0, %c1_i32 : i32
    %44 = arith.subi %43, %c0_i32 : i32
    %c0_i32_22 = arith.constant 0 : i32
    %45 = arith.maxsi %44, %c0_i32_22 : i32
    %c8_i32_23 = arith.constant 8 : i32
    %46 = arith.muli %45, %c8_i32_23 : i32
    %47 = tpu.assume_multiple %46, 8 : i32
    %48 = arith.index_cast %47 : i32 to index
    %c0_24 = arith.constant 0 : index
    %49 = vector.load %arg14[%48, %c0_24] : memref<96x192xf32, #tpu.memory_space<vmem>>, vector<8x192xf32>
    %50 = vector.extract_strided_slice %49 {offsets = [0, 96], sizes = [8, 96], strides = [1, 1]} : vector<8x192xf32> to vector<8x96xf32>
    %cst_25 = arith.constant dense<0.000000e+00> : vector<8x96xf32>
    %51 = tpu.matmul %13, %11, %cst_25 {dimension_numbers = #tpu.dot_dimension_numbers<[1], [0], [0], [1], [0, 0, 1, 1], [], []>} : vector<8x32xf32>, vector<32x96xf32>, vector<8x96xf32> -> vector<8x96xf32>
    %52 = vector.broadcast %12 : vector<1x96xf32> to vector<8x96xf32>
    %53 = arith.addf %51, %52 : vector<8x96xf32>
    %54 = vector.extract_strided_slice %50 {offsets = [0, 0], sizes = [8, 64], strides = [1, 1]} : vector<8x96xf32> to vector<8x64xf32>
    %55 = vector.extract_strided_slice %53 {offsets = [0, 0], sizes = [8, 64], strides = [1, 1]} : vector<8x96xf32> to vector<8x64xf32>
    %56 = arith.addf %54, %55 : vector<8x64xf32>
    %57 = arith.negf %56 : vector<8x64xf32>
    %58 = math.exp %57 : vector<8x64xf32>
    %cst_26 = arith.constant 1.000000e+00 : f32
    %59 = vector.broadcast %cst_26 : f32 to vector<8x64xf32>
    %60 = arith.addf %59, %58 : vector<8x64xf32>
    %61 = arith.divf %59, %60 : vector<8x64xf32>
    %62 = vector.extract_strided_slice %61 {offsets = [0, 0], sizes = [8, 32], strides = [1, 1]} : vector<8x64xf32> to vector<8x32xf32>
    %63 = vector.extract_strided_slice %61 {offsets = [0, 32], sizes = [8, 32], strides = [1, 1]} : vector<8x64xf32> to vector<8x32xf32>
    %64 = vector.extract_strided_slice %50 {offsets = [0, 64], sizes = [8, 32], strides = [1, 1]} : vector<8x96xf32> to vector<8x32xf32>
    %65 = vector.extract_strided_slice %53 {offsets = [0, 64], sizes = [8, 32], strides = [1, 1]} : vector<8x96xf32> to vector<8x32xf32>
    %66 = arith.mulf %62, %65 : vector<8x32xf32>
    %67 = arith.addf %64, %66 : vector<8x32xf32>
    %68 = math.tanh %67 : vector<8x32xf32>
    %cst_27 = arith.constant 1.000000e+00 : f32
    %69 = vector.broadcast %cst_27 : f32 to vector<8x32xf32>
    %70 = arith.subf %69, %63 : vector<8x32xf32>
    %71 = arith.mulf %70, %68 : vector<8x32xf32>
    %72 = arith.mulf %63, %13 : vector<8x32xf32>
    %73 = arith.addf %71, %72 : vector<8x32xf32>
    %74 = arith.select %14, %42, %13 : vector<8x32xf32>
    %c0_28 = arith.constant 0 : index
    %75 = arith.index_cast %16 : i32 to index
    %c0_29 = arith.constant 0 : index
    %76 = vector.load %arg11[%c0_28, %75, %c0_29] : memref<1x96x64xf32, #tpu.memory_space<vmem>>, vector<1x8x32xf32>
    %77 = vector.shape_cast %76 : vector<1x8x32xf32> to vector<8x32xf32>
    %78 = vector.shape_cast %74 : vector<8x32xf32> to vector<1x8x32xf32>
    tpu.vector_store %arg11[%c0_28, %75, %c0_29], %78 {strides = array<i32>} : memref<1x96x64xf32, #tpu.memory_space<vmem>>, vector<1x8x32xf32>,
    %79 = arith.select %14, %45, %c0_i32 : i32
    %c8_i32_30 = arith.constant 8 : i32
    %80 = arith.muli %79, %c8_i32_30 : i32
    %81 = tpu.assume_multiple %80, 8 : i32
    %82 = arith.select %14, %73, %13 : vector<8x32xf32>
    %c0_31 = arith.constant 0 : index
    %83 = arith.index_cast %81 : i32 to index
    %c32 = arith.constant 32 : index
    %84 = vector.load %arg11[%c0_31, %83, %c32] : memref<1x96x64xf32, #tpu.memory_space<vmem>>, vector<1x8x32xf32>
    %85 = vector.shape_cast %84 : vector<1x8x32xf32> to vector<8x32xf32>
    %86 = vector.shape_cast %82 : vector<8x32xf32> to vector<1x8x32xf32>
    tpu.vector_store %arg11[%c0_31, %83, %c32], %86 {strides = array<i32>} : memref<1x96x64xf32, #tpu.memory_space<vmem>>, vector<1x8x32xf32>,
    %87 = arith.select %14, %42, %13 : vector<8x32xf32>
    %88 = arith.select %14, %73, %13 : vector<8x32xf32>
    %c1_i32_32 = arith.constant 1 : i32
    %89 = arith.cmpi slt, %c1_i32_32, %0 : i32
    %c8_i32_33 = arith.constant 8 : i32
    %90 = arith.muli %c1_i32_32, %c8_i32_33 : i32
    %91 = tpu.assume_multiple %90, 8 : i32
    %92 = arith.index_cast %91 : i32 to index
    %c0_34 = arith.constant 0 : index
    %93 = vector.load %arg14[%92, %c0_34] : memref<96x192xf32, #tpu.memory_space<vmem>>, vector<8x192xf32>
    %94 = vector.extract_strided_slice %93 {offsets = [0, 0], sizes = [8, 96], strides = [1, 1]} : vector<8x192xf32> to vector<8x96xf32>
    %cst_35 = arith.constant dense<0.000000e+00> : vector<8x96xf32>
    %95 = tpu.matmul %87, %9, %cst_35 {dimension_numbers = #tpu.dot_dimension_numbers<[1], [0], [0], [1], [0, 0, 1, 1], [], []>} : vector<8x32xf32>, vector<32x96xf32>, vector<8x96xf32> -> vector<8x96xf32>
    %96 = vector.broadcast %10 : vector<1x96xf32> to vector<8x96xf32>
    %97 = arith.addf %95, %96 : vector<8x96xf32>
    %98 = vector.extract_strided_slice %94 {offsets = [0, 0], sizes = [8, 64], strides = [1, 1]} : vector<8x96xf32> to vector<8x64xf32>
    %99 = vector.extract_strided_slice %97 {offsets = [0, 0], sizes = [8, 64], strides = [1, 1]} : vector<8x96xf32> to vector<8x64xf32>
    %100 = arith.addf %98, %99 : vector<8x64xf32>
    %101 = arith.negf %100 : vector<8x64xf32>
    %102 = math.exp %101 : vector<8x64xf32>
    %cst_36 = arith.constant 1.000000e+00 : f32
    %103 = vector.broadcast %cst_36 : f32 to vector<8x64xf32>
    %104 = arith.addf %103, %102 : vector<8x64xf32>
    %105 = arith.divf %103, %104 : vector<8x64xf32>
    %106 = vector.extract_strided_slice %105 {offsets = [0, 0], sizes = [8, 32], strides = [1, 1]} : vector<8x64xf32> to vector<8x32xf32>
    %107 = vector.extract_strided_slice %105 {offsets = [0, 32], sizes = [8, 32], strides = [1, 1]} : vector<8x64xf32> to vector<8x32xf32>
    %108 = vector.extract_strided_slice %94 {offsets = [0, 64], sizes = [8, 32], strides = [1, 1]} : vector<8x96xf32> to vector<8x32xf32>
    %109 = vector.extract_strided_slice %97 {offsets = [0, 64], sizes = [8, 32], strides = [1, 1]} : vector<8x96xf32> to vector<8x32xf32>
    %110 = arith.mulf %106, %109 : vector<8x32xf32>
    %111 = arith.addf %108, %110 : vector<8x32xf32>
    %112 = math.tanh %111 : vector<8x32xf32>
    %cst_37 = arith.constant 1.000000e+00 : f32
    %113 = vector.broadcast %cst_37 : f32 to vector<8x32xf32>
    %114 = arith.subf %113, %107 : vector<8x32xf32>
    %115 = arith.mulf %114, %112 : vector<8x32xf32>
    %116 = arith.mulf %107, %87 : vector<8x32xf32>
    %117 = arith.addf %115, %116 : vector<8x32xf32>
    %c1_i32_38 = arith.constant 1 : i32
    %118 = arith.subi %0, %c1_i32_38 : i32
    %119 = arith.subi %118, %c1_i32_32 : i32
    %c0_i32_39 = arith.constant 0 : i32
    %120 = arith.maxsi %119, %c0_i32_39 : i32
    %c8_i32_40 = arith.constant 8 : i32
    %121 = arith.muli %120, %c8_i32_40 : i32
    %122 = tpu.assume_multiple %121, 8 : i32
    %123 = arith.index_cast %122 : i32 to index
    %c0_41 = arith.constant 0 : index
    %124 = vector.load %arg14[%123, %c0_41] : memref<96x192xf32, #tpu.memory_space<vmem>>, vector<8x192xf32>
    %125 = vector.extract_strided_slice %124 {offsets = [0, 96], sizes = [8, 96], strides = [1, 1]} : vector<8x192xf32> to vector<8x96xf32>
    %cst_42 = arith.constant dense<0.000000e+00> : vector<8x96xf32>
    %126 = tpu.matmul %88, %11, %cst_42 {dimension_numbers = #tpu.dot_dimension_numbers<[1], [0], [0], [1], [0, 0, 1, 1], [], []>} : vector<8x32xf32>, vector<32x96xf32>, vector<8x96xf32> -> vector<8x96xf32>
    %127 = vector.broadcast %12 : vector<1x96xf32> to vector<8x96xf32>
    %128 = arith.addf %126, %127 : vector<8x96xf32>
    %129 = vector.extract_strided_slice %125 {offsets = [0, 0], sizes = [8, 64], strides = [1, 1]} : vector<8x96xf32> to vector<8x64xf32>
    %130 = vector.extract_strided_slice %128 {offsets = [0, 0], sizes = [8, 64], strides = [1, 1]} : vector<8x96xf32> to vector<8x64xf32>
    %131 = arith.addf %129, %130 : vector<8x64xf32>
    %132 = arith.negf %131 : vector<8x64xf32>
    %133 = math.exp %132 : vector<8x64xf32>
    %cst_43 = arith.constant 1.000000e+00 : f32
    %134 = vector.broadcast %cst_43 : f32 to vector<8x64xf32>
    %135 = arith.addf %134, %133 : vector<8x64xf32>
    %136 = arith.divf %134, %135 : vector<8x64xf32>
    %137 = vector.extract_strided_slice %136 {offsets = [0, 0], sizes = [8, 32], strides = [1, 1]} : vector<8x64xf32> to vector<8x32xf32>
    %138 = vector.extract_strided_slice %136 {offsets = [0, 32], sizes = [8, 32], strides = [1, 1]} : vector<8x64xf32> to vector<8x32xf32>
    %139 = vector.extract_strided_slice %125 {offsets = [0, 64], sizes = [8, 32], strides = [1, 1]} : vector<8x96xf32> to vector<8x32xf32>
    %140 = vector.extract_strided_slice %128 {offsets = [0, 64], sizes = [8, 32], strides = [1, 1]} : vector<8x96xf32> to vector<8x32xf32>
    %141 = arith.mulf %137, %140 : vector<8x32xf32>
    %142 = arith.addf %139, %141 : vector<8x32xf32>
    %143 = math.tanh %142 : vector<8x32xf32>
    %cst_44 = arith.constant 1.000000e+00 : f32
    %144 = vector.broadcast %cst_44 : f32 to vector<8x32xf32>
    %145 = arith.subf %144, %138 : vector<8x32xf32>
    %146 = arith.mulf %145, %143 : vector<8x32xf32>
    %147 = arith.mulf %138, %88 : vector<8x32xf32>
    %148 = arith.addf %146, %147 : vector<8x32xf32>
    %149 = arith.select %89, %117, %13 : vector<8x32xf32>
    %c0_45 = arith.constant 0 : index
    %150 = arith.index_cast %91 : i32 to index
    %c0_46 = arith.constant 0 : index
    %151 = vector.load %arg11[%c0_45, %150, %c0_46] : memref<1x96x64xf32, #tpu.memory_space<vmem>>, vector<1x8x32xf32>
    %152 = vector.shape_cast %151 : vector<1x8x32xf32> to vector<8x32xf32>
    %153 = vector.shape_cast %149 : vector<8x32xf32> to vector<1x8x32xf32>
    tpu.vector_store %arg11[%c0_45, %150, %c0_46], %153 {strides = array<i32>} : memref<1x96x64xf32, #tpu.memory_space<vmem>>, vector<1x8x32xf32>,
    %154 = arith.select %89, %120, %c1_i32_32 : i32
    %c8_i32_47 = arith.constant 8 : i32
    %155 = arith.muli %154, %c8_i32_47 : i32
    %156 = tpu.assume_multiple %155, 8 : i32
    %157 = arith.select %89, %148, %13 : vector<8x32xf32>
    %c0_48 = arith.constant 0 : index
    %158 = arith.index_cast %156 : i32 to index
    %c32_49 = arith.constant 32 : index
    %159 = vector.load %arg11[%c0_48, %158, %c32_49] : memref<1x96x64xf32, #tpu.memory_space<vmem>>, vector<1x8x32xf32>
    %160 = vector.shape_cast %159 : vector<1x8x32xf32> to vector<8x32xf32>
    %161 = vector.shape_cast %157 : vector<8x32xf32> to vector<1x8x32xf32>
    tpu.vector_store %arg11[%c0_48, %158, %c32_49], %161 {strides = array<i32>} : memref<1x96x64xf32, #tpu.memory_space<vmem>>, vector<1x8x32xf32>,
    %162 = arith.select %89, %117, %87 : vector<8x32xf32>
    %163 = arith.select %89, %148, %88 : vector<8x32xf32>
    %c2_i32 = arith.constant 2 : i32
    %164 = arith.cmpi slt, %c2_i32, %0 : i32
    %c8_i32_50 = arith.constant 8 : i32
    %165 = arith.muli %c2_i32, %c8_i32_50 : i32
    %166 = tpu.assume_multiple %165, 8 : i32
    %167 = arith.index_cast %166 : i32 to index
    %c0_51 = arith.constant 0 : index
    %168 = vector.load %arg14[%167, %c0_51] : memref<96x192xf32, #tpu.memory_space<vmem>>, vector<8x192xf32>
    %169 = vector.extract_strided_slice %168 {offsets = [0, 0], sizes = [8, 96], strides = [1, 1]} : vector<8x192xf32> to vector<8x96xf32>
    %cst_52 = arith.constant dense<0.000000e+00> : vector<8x96xf32>
    %170 = tpu.matmul %162, %9, %cst_52 {dimension_numbers = #tpu.dot_dimension_numbers<[1], [0], [0], [1], [0, 0, 1, 1], [], []>} : vector<8x32xf32>, vector<32x96xf32>, vector<8x96xf32> -> vector<8x96xf32>
    %171 = vector.broadcast %10 : vector<1x96xf32> to vector<8x96xf32>
    %172 = arith.addf %170, %171 : vector<8x96xf32>
    %173 = vector.extract_strided_slice %169 {offsets = [0, 0], sizes = [8, 64], strides = [1, 1]} : vector<8x96xf32> to vector<8x64xf32>
    %174 = vector.extract_strided_slice %172 {offsets = [0, 0], sizes = [8, 64], strides = [1, 1]} : vector<8x96xf32> to vector<8x64xf32>
    %175 = arith.addf %173, %174 : vector<8x64xf32>
    %176 = arith.negf %175 : vector<8x64xf32>
    %177 = math.exp %176 : vector<8x64xf32>
    %cst_53 = arith.constant 1.000000e+00 : f32
    %178 = vector.broadcast %cst_53 : f32 to vector<8x64xf32>
    %179 = arith.addf %178, %177 : vector<8x64xf32>
    %180 = arith.divf %178, %179 : vector<8x64xf32>
    %181 = vector.extract_strided_slice %180 {offsets = [0, 0], sizes = [8, 32], strides = [1, 1]} : vector<8x64xf32> to vector<8x32xf32>
    %182 = vector.extract_strided_slice %180 {offsets = [0, 32], sizes = [8, 32], strides = [1, 1]} : vector<8x64xf32> to vector<8x32xf32>
    %183 = vector.extract_strided_slice %169 {offsets = [0, 64], sizes = [8, 32], strides = [1, 1]} : vector<8x96xf32> to vector<8x32xf32>
    %184 = vector.extract_strided_slice %172 {offsets = [0, 64], sizes = [8, 32], strides = [1, 1]} : vector<8x96xf32> to vector<8x32xf32>
    %185 = arith.mulf %181, %184 : vector<8x32xf32>
    %186 = arith.addf %183, %185 : vector<8x32xf32>
    %187 = math.tanh %186 : vector<8x32xf32>
    %cst_54 = arith.constant 1.000000e+00 : f32
    %188 = vector.broadcast %cst_54 : f32 to vector<8x32xf32>
    %189 = arith.subf %188, %182 : vector<8x32xf32>
    %190 = arith.mulf %189, %187 : vector<8x32xf32>
    %191 = arith.mulf %182, %162 : vector<8x32xf32>
    %192 = arith.addf %190, %191 : vector<8x32xf32>
    %c1_i32_55 = arith.constant 1 : i32
    %193 = arith.subi %0, %c1_i32_55 : i32
    %194 = arith.subi %193, %c2_i32 : i32
    %c0_i32_56 = arith.constant 0 : i32
    %195 = arith.maxsi %194, %c0_i32_56 : i32
    %c8_i32_57 = arith.constant 8 : i32
    %196 = arith.muli %195, %c8_i32_57 : i32
    %197 = tpu.assume_multiple %196, 8 : i32
    %198 = arith.index_cast %197 : i32 to index
    %c0_58 = arith.constant 0 : index
    %199 = vector.load %arg14[%198, %c0_58] : memref<96x192xf32, #tpu.memory_space<vmem>>, vector<8x192xf32>
    %200 = vector.extract_strided_slice %199 {offsets = [0, 96], sizes = [8, 96], strides = [1, 1]} : vector<8x192xf32> to vector<8x96xf32>
    %cst_59 = arith.constant dense<0.000000e+00> : vector<8x96xf32>
    %201 = tpu.matmul %163, %11, %cst_59 {dimension_numbers = #tpu.dot_dimension_numbers<[1], [0], [0], [1], [0, 0, 1, 1], [], []>} : vector<8x32xf32>, vector<32x96xf32>, vector<8x96xf32> -> vector<8x96xf32>
    %202 = vector.broadcast %12 : vector<1x96xf32> to vector<8x96xf32>
    %203 = arith.addf %201, %202 : vector<8x96xf32>
    %204 = vector.extract_strided_slice %200 {offsets = [0, 0], sizes = [8, 64], strides = [1, 1]} : vector<8x96xf32> to vector<8x64xf32>
    %205 = vector.extract_strided_slice %203 {offsets = [0, 0], sizes = [8, 64], strides = [1, 1]} : vector<8x96xf32> to vector<8x64xf32>
    %206 = arith.addf %204, %205 : vector<8x64xf32>
    %207 = arith.negf %206 : vector<8x64xf32>
    %208 = math.exp %207 : vector<8x64xf32>
    %cst_60 = arith.constant 1.000000e+00 : f32
    %209 = vector.broadcast %cst_60 : f32 to vector<8x64xf32>
    %210 = arith.addf %209, %208 : vector<8x64xf32>
    %211 = arith.divf %209, %210 : vector<8x64xf32>
    %212 = vector.extract_strided_slice %211 {offsets = [0, 0], sizes = [8, 32], strides = [1, 1]} : vector<8x64xf32> to vector<8x32xf32>
    %213 = vector.extract_strided_slice %211 {offsets = [0, 32], sizes = [8, 32], strides = [1, 1]} : vector<8x64xf32> to vector<8x32xf32>
    %214 = vector.extract_strided_slice %200 {offsets = [0, 64], sizes = [8, 32], strides = [1, 1]} : vector<8x96xf32> to vector<8x32xf32>
    %215 = vector.extract_strided_slice %203 {offsets = [0, 64], sizes = [8, 32], strides = [1, 1]} : vector<8x96xf32> to vector<8x32xf32>
    %216 = arith.mulf %212, %215 : vector<8x32xf32>
    %217 = arith.addf %214, %216 : vector<8x32xf32>
    %218 = math.tanh %217 : vector<8x32xf32>
    %cst_61 = arith.constant 1.000000e+00 : f32
    %219 = vector.broadcast %cst_61 : f32 to vector<8x32xf32>
    %220 = arith.subf %219, %213 : vector<8x32xf32>
    %221 = arith.mulf %220, %218 : vector<8x32xf32>
    %222 = arith.mulf %213, %163 : vector<8x32xf32>
    %223 = arith.addf %221, %222 : vector<8x32xf32>
    %224 = arith.select %164, %192, %13 : vector<8x32xf32>
    %c0_62 = arith.constant 0 : index
    %225 = arith.index_cast %166 : i32 to index
    %c0_63 = arith.constant 0 : index
    %226 = vector.load %arg11[%c0_62, %225, %c0_63] : memref<1x96x64xf32, #tpu.memory_space<vmem>>, vector<1x8x32xf32>
    %227 = vector.shape_cast %226 : vector<1x8x32xf32> to vector<8x32xf32>
    %228 = vector.shape_cast %224 : vector<8x32xf32> to vector<1x8x32xf32>
    tpu.vector_store %arg11[%c0_62, %225, %c0_63], %228 {strides = array<i32>} : memref<1x96x64xf32, #tpu.memory_space<vmem>>, vector<1x8x32xf32>,
    %229 = arith.select %164, %195, %c2_i32 : i32
    %c8_i32_64 = arith.constant 8 : i32
    %230 = arith.muli %229, %c8_i32_64 : i32
    %231 = tpu.assume_multiple %230, 8 : i32
    %232 = arith.select %164, %223, %13 : vector<8x32xf32>
    %c0_65 = arith.constant 0 : index
    %233 = arith.index_cast %231 : i32 to index
    %c32_66 = arith.constant 32 : index
    %234 = vector.load %arg11[%c0_65, %233, %c32_66] : memref<1x96x64xf32, #tpu.memory_space<vmem>>, vector<1x8x32xf32>
    %235 = vector.shape_cast %234 : vector<1x8x32xf32> to vector<8x32xf32>
    %236 = vector.shape_cast %232 : vector<8x32xf32> to vector<1x8x32xf32>
    tpu.vector_store %arg11[%c0_65, %233, %c32_66], %236 {strides = array<i32>} : memref<1x96x64xf32, #tpu.memory_space<vmem>>, vector<1x8x32xf32>,
    %237 = arith.select %164, %192, %162 : vector<8x32xf32>
    %238 = arith.select %164, %223, %163 : vector<8x32xf32>
    %c3_i32 = arith.constant 3 : i32
    %239 = arith.cmpi slt, %c3_i32, %0 : i32
    %c8_i32_67 = arith.constant 8 : i32
    %240 = arith.muli %c3_i32, %c8_i32_67 : i32
    %241 = tpu.assume_multiple %240, 8 : i32
    %242 = arith.index_cast %241 : i32 to index
    %c0_68 = arith.constant 0 : index
    %243 = vector.load %arg14[%242, %c0_68] : memref<96x192xf32, #tpu.memory_space<vmem>>, vector<8x192xf32>
    %244 = vector.extract_strided_slice %243 {offsets = [0, 0], sizes = [8, 96], strides = [1, 1]} : vector<8x192xf32> to vector<8x96xf32>
    %cst_69 = arith.constant dense<0.000000e+00> : vector<8x96xf32>
    %245 = tpu.matmul %237, %9, %cst_69 {dimension_numbers = #tpu.dot_dimension_numbers<[1], [0], [0], [1], [0, 0, 1, 1], [], []>} : vector<8x32xf32>, vector<32x96xf32>, vector<8x96xf32> -> vector<8x96xf32>
    %246 = vector.broadcast %10 : vector<1x96xf32> to vector<8x96xf32>
    %247 = arith.addf %245, %246 : vector<8x96xf32>
    %248 = vector.extract_strided_slice %244 {offsets = [0, 0], sizes = [8, 64], strides = [1, 1]} : vector<8x96xf32> to vector<8x64xf32>
    %249 = vector.extract_strided_slice %247 {offsets = [0, 0], sizes = [8, 64], strides = [1, 1]} : vector<8x96xf32> to vector<8x64xf32>
    %250 = arith.addf %248, %249 : vector<8x64xf32>
    %251 = arith.negf %250 : vector<8x64xf32>
    %252 = math.exp %251 : vector<8x64xf32>
    %cst_70 = arith.constant 1.000000e+00 : f32
    %253 = vector.broadcast %cst_70 : f32 to vector<8x64xf32>
    %254 = arith.addf %253, %252 : vector<8x64xf32>
    %255 = arith.divf %253, %254 : vector<8x64xf32>
    %256 = vector.extract_strided_slice %255 {offsets = [0, 0], sizes = [8, 32], strides = [1, 1]} : vector<8x64xf32> to vector<8x32xf32>
    %257 = vector.extract_strided_slice %255 {offsets = [0, 32], sizes = [8, 32], strides = [1, 1]} : vector<8x64xf32> to vector<8x32xf32>
    %258 = vector.extract_strided_slice %244 {offsets = [0, 64], sizes = [8, 32], strides = [1, 1]} : vector<8x96xf32> to vector<8x32xf32>
    %259 = vector.extract_strided_slice %247 {offsets = [0, 64], sizes = [8, 32], strides = [1, 1]} : vector<8x96xf32> to vector<8x32xf32>
    %260 = arith.mulf %256, %259 : vector<8x32xf32>
    %261 = arith.addf %258, %260 : vector<8x32xf32>
    %262 = math.tanh %261 : vector<8x32xf32>
    %cst_71 = arith.constant 1.000000e+00 : f32
    %263 = vector.broadcast %cst_71 : f32 to vector<8x32xf32>
    %264 = arith.subf %263, %257 : vector<8x32xf32>
    %265 = arith.mulf %264, %262 : vector<8x32xf32>
    %266 = arith.mulf %257, %237 : vector<8x32xf32>
    %267 = arith.addf %265, %266 : vector<8x32xf32>
    %c1_i32_72 = arith.constant 1 : i32
    %268 = arith.subi %0, %c1_i32_72 : i32
    %269 = arith.subi %268, %c3_i32 : i32
    %c0_i32_73 = arith.constant 0 : i32
    %270 = arith.maxsi %269, %c0_i32_73 : i32
    %c8_i32_74 = arith.constant 8 : i32
    %271 = arith.muli %270, %c8_i32_74 : i32
    %272 = tpu.assume_multiple %271, 8 : i32
    %273 = arith.index_cast %272 : i32 to index
    %c0_75 = arith.constant 0 : index
    %274 = vector.load %arg14[%273, %c0_75] : memref<96x192xf32, #tpu.memory_space<vmem>>, vector<8x192xf32>
    %275 = vector.extract_strided_slice %274 {offsets = [0, 96], sizes = [8, 96], strides = [1, 1]} : vector<8x192xf32> to vector<8x96xf32>
    %cst_76 = arith.constant dense<0.000000e+00> : vector<8x96xf32>
    %276 = tpu.matmul %238, %11, %cst_76 {dimension_numbers = #tpu.dot_dimension_numbers<[1], [0], [0], [1], [0, 0, 1, 1], [], []>} : vector<8x32xf32>, vector<32x96xf32>, vector<8x96xf32> -> vector<8x96xf32>
    %277 = vector.broadcast %12 : vector<1x96xf32> to vector<8x96xf32>
    %278 = arith.addf %276, %277 : vector<8x96xf32>
    %279 = vector.extract_strided_slice %275 {offsets = [0, 0], sizes = [8, 64], strides = [1, 1]} : vector<8x96xf32> to vector<8x64xf32>
    %280 = vector.extract_strided_slice %278 {offsets = [0, 0], sizes = [8, 64], strides = [1, 1]} : vector<8x96xf32> to vector<8x64xf32>
    %281 = arith.addf %279, %280 : vector<8x64xf32>
    %282 = arith.negf %281 : vector<8x64xf32>
    %283 = math.exp %282 : vector<8x64xf32>
    %cst_77 = arith.constant 1.000000e+00 : f32
    %284 = vector.broadcast %cst_77 : f32 to vector<8x64xf32>
    %285 = arith.addf %284, %283 : vector<8x64xf32>
    %286 = arith.divf %284, %285 : vector<8x64xf32>
    %287 = vector.extract_strided_slice %286 {offsets = [0, 0], sizes = [8, 32], strides = [1, 1]} : vector<8x64xf32> to vector<8x32xf32>
    %288 = vector.extract_strided_slice %286 {offsets = [0, 32], sizes = [8, 32], strides = [1, 1]} : vector<8x64xf32> to vector<8x32xf32>
    %289 = vector.extract_strided_slice %275 {offsets = [0, 64], sizes = [8, 32], strides = [1, 1]} : vector<8x96xf32> to vector<8x32xf32>
    %290 = vector.extract_strided_slice %278 {offsets = [0, 64], sizes = [8, 32], strides = [1, 1]} : vector<8x96xf32> to vector<8x32xf32>
    %291 = arith.mulf %287, %290 : vector<8x32xf32>
    %292 = arith.addf %289, %291 : vector<8x32xf32>
    %293 = math.tanh %292 : vector<8x32xf32>
    %cst_78 = arith.constant 1.000000e+00 : f32
    %294 = vector.broadcast %cst_78 : f32 to vector<8x32xf32>
    %295 = arith.subf %294, %288 : vector<8x32xf32>
    %296 = arith.mulf %295, %293 : vector<8x32xf32>
    %297 = arith.mulf %288, %238 : vector<8x32xf32>
    %298 = arith.addf %296, %297 : vector<8x32xf32>
    %299 = arith.select %239, %267, %13 : vector<8x32xf32>
    %c0_79 = arith.constant 0 : index
    %300 = arith.index_cast %241 : i32 to index
    %c0_80 = arith.constant 0 : index
    %301 = vector.load %arg11[%c0_79, %300, %c0_80] : memref<1x96x64xf32, #tpu.memory_space<vmem>>, vector<1x8x32xf32>
    %302 = vector.shape_cast %301 : vector<1x8x32xf32> to vector<8x32xf32>
    %303 = vector.shape_cast %299 : vector<8x32xf32> to vector<1x8x32xf32>
    tpu.vector_store %arg11[%c0_79, %300, %c0_80], %303 {strides = array<i32>} : memref<1x96x64xf32, #tpu.memory_space<vmem>>, vector<1x8x32xf32>,
    %304 = arith.select %239, %270, %c3_i32 : i32
    %c8_i32_81 = arith.constant 8 : i32
    %305 = arith.muli %304, %c8_i32_81 : i32
    %306 = tpu.assume_multiple %305, 8 : i32
    %307 = arith.select %239, %298, %13 : vector<8x32xf32>
    %c0_82 = arith.constant 0 : index
    %308 = arith.index_cast %306 : i32 to index
    %c32_83 = arith.constant 32 : index
    %309 = vector.load %arg11[%c0_82, %308, %c32_83] : memref<1x96x64xf32, #tpu.memory_space<vmem>>, vector<1x8x32xf32>
    %310 = vector.shape_cast %309 : vector<1x8x32xf32> to vector<8x32xf32>
    %311 = vector.shape_cast %307 : vector<8x32xf32> to vector<1x8x32xf32>
    tpu.vector_store %arg11[%c0_82, %308, %c32_83], %311 {strides = array<i32>} : memref<1x96x64xf32, #tpu.memory_space<vmem>>, vector<1x8x32xf32>,
    %312 = arith.select %239, %267, %237 : vector<8x32xf32>
    %313 = arith.select %239, %298, %238 : vector<8x32xf32>
    %c4_i32 = arith.constant 4 : i32
    %314 = arith.cmpi slt, %c4_i32, %0 : i32
    %c8_i32_84 = arith.constant 8 : i32
    %315 = arith.muli %c4_i32, %c8_i32_84 : i32
    %316 = tpu.assume_multiple %315, 8 : i32
    %317 = arith.index_cast %316 : i32 to index
    %c0_85 = arith.constant 0 : index
    %318 = vector.load %arg14[%317, %c0_85] : memref<96x192xf32, #tpu.memory_space<vmem>>, vector<8x192xf32>
    %319 = vector.extract_strided_slice %318 {offsets = [0, 0], sizes = [8, 96], strides = [1, 1]} : vector<8x192xf32> to vector<8x96xf32>
    %cst_86 = arith.constant dense<0.000000e+00> : vector<8x96xf32>
    %320 = tpu.matmul %312, %9, %cst_86 {dimension_numbers = #tpu.dot_dimension_numbers<[1], [0], [0], [1], [0, 0, 1, 1], [], []>} : vector<8x32xf32>, vector<32x96xf32>, vector<8x96xf32> -> vector<8x96xf32>
    %321 = vector.broadcast %10 : vector<1x96xf32> to vector<8x96xf32>
    %322 = arith.addf %320, %321 : vector<8x96xf32>
    %323 = vector.extract_strided_slice %319 {offsets = [0, 0], sizes = [8, 64], strides = [1, 1]} : vector<8x96xf32> to vector<8x64xf32>
    %324 = vector.extract_strided_slice %322 {offsets = [0, 0], sizes = [8, 64], strides = [1, 1]} : vector<8x96xf32> to vector<8x64xf32>
    %325 = arith.addf %323, %324 : vector<8x64xf32>
    %326 = arith.negf %325 : vector<8x64xf32>
    %327 = math.exp %326 : vector<8x64xf32>
    %cst_87 = arith.constant 1.000000e+00 : f32
    %328 = vector.broadcast %cst_87 : f32 to vector<8x64xf32>
    %329 = arith.addf %328, %327 : vector<8x64xf32>
    %330 = arith.divf %328, %329 : vector<8x64xf32>
    %331 = vector.extract_strided_slice %330 {offsets = [0, 0], sizes = [8, 32], strides = [1, 1]} : vector<8x64xf32> to vector<8x32xf32>
    %332 = vector.extract_strided_slice %330 {offsets = [0, 32], sizes = [8, 32], strides = [1, 1]} : vector<8x64xf32> to vector<8x32xf32>
    %333 = vector.extract_strided_slice %319 {offsets = [0, 64], sizes = [8, 32], strides = [1, 1]} : vector<8x96xf32> to vector<8x32xf32>
    %334 = vector.extract_strided_slice %322 {offsets = [0, 64], sizes = [8, 32], strides = [1, 1]} : vector<8x96xf32> to vector<8x32xf32>
    %335 = arith.mulf %331, %334 : vector<8x32xf32>
    %336 = arith.addf %333, %335 : vector<8x32xf32>
    %337 = math.tanh %336 : vector<8x32xf32>
    %cst_88 = arith.constant 1.000000e+00 : f32
    %338 = vector.broadcast %cst_88 : f32 to vector<8x32xf32>
    %339 = arith.subf %338, %332 : vector<8x32xf32>
    %340 = arith.mulf %339, %337 : vector<8x32xf32>
    %341 = arith.mulf %332, %312 : vector<8x32xf32>
    %342 = arith.addf %340, %341 : vector<8x32xf32>
    %c1_i32_89 = arith.constant 1 : i32
    %343 = arith.subi %0, %c1_i32_89 : i32
    %344 = arith.subi %343, %c4_i32 : i32
    %c0_i32_90 = arith.constant 0 : i32
    %345 = arith.maxsi %344, %c0_i32_90 : i32
    %c8_i32_91 = arith.constant 8 : i32
    %346 = arith.muli %345, %c8_i32_91 : i32
    %347 = tpu.assume_multiple %346, 8 : i32
    %348 = arith.index_cast %347 : i32 to index
    %c0_92 = arith.constant 0 : index
    %349 = vector.load %arg14[%348, %c0_92] : memref<96x192xf32, #tpu.memory_space<vmem>>, vector<8x192xf32>
    %350 = vector.extract_strided_slice %349 {offsets = [0, 96], sizes = [8, 96], strides = [1, 1]} : vector<8x192xf32> to vector<8x96xf32>
    %cst_93 = arith.constant dense<0.000000e+00> : vector<8x96xf32>
    %351 = tpu.matmul %313, %11, %cst_93 {dimension_numbers = #tpu.dot_dimension_numbers<[1], [0], [0], [1], [0, 0, 1, 1], [], []>} : vector<8x32xf32>, vector<32x96xf32>, vector<8x96xf32> -> vector<8x96xf32>
    %352 = vector.broadcast %12 : vector<1x96xf32> to vector<8x96xf32>
    %353 = arith.addf %351, %352 : vector<8x96xf32>
    %354 = vector.extract_strided_slice %350 {offsets = [0, 0], sizes = [8, 64], strides = [1, 1]} : vector<8x96xf32> to vector<8x64xf32>
    %355 = vector.extract_strided_slice %353 {offsets = [0, 0], sizes = [8, 64], strides = [1, 1]} : vector<8x96xf32> to vector<8x64xf32>
    %356 = arith.addf %354, %355 : vector<8x64xf32>
    %357 = arith.negf %356 : vector<8x64xf32>
    %358 = math.exp %357 : vector<8x64xf32>
    %cst_94 = arith.constant 1.000000e+00 : f32
    %359 = vector.broadcast %cst_94 : f32 to vector<8x64xf32>
    %360 = arith.addf %359, %358 : vector<8x64xf32>
    %361 = arith.divf %359, %360 : vector<8x64xf32>
    %362 = vector.extract_strided_slice %361 {offsets = [0, 0], sizes = [8, 32], strides = [1, 1]} : vector<8x64xf32> to vector<8x32xf32>
    %363 = vector.extract_strided_slice %361 {offsets = [0, 32], sizes = [8, 32], strides = [1, 1]} : vector<8x64xf32> to vector<8x32xf32>
    %364 = vector.extract_strided_slice %350 {offsets = [0, 64], sizes = [8, 32], strides = [1, 1]} : vector<8x96xf32> to vector<8x32xf32>
    %365 = vector.extract_strided_slice %353 {offsets = [0, 64], sizes = [8, 32], strides = [1, 1]} : vector<8x96xf32> to vector<8x32xf32>
    %366 = arith.mulf %362, %365 : vector<8x32xf32>
    %367 = arith.addf %364, %366 : vector<8x32xf32>
    %368 = math.tanh %367 : vector<8x32xf32>
    %cst_95 = arith.constant 1.000000e+00 : f32
    %369 = vector.broadcast %cst_95 : f32 to vector<8x32xf32>
    %370 = arith.subf %369, %363 : vector<8x32xf32>
    %371 = arith.mulf %370, %368 : vector<8x32xf32>
    %372 = arith.mulf %363, %313 : vector<8x32xf32>
    %373 = arith.addf %371, %372 : vector<8x32xf32>
    %374 = arith.select %314, %342, %13 : vector<8x32xf32>
    %c0_96 = arith.constant 0 : index
    %375 = arith.index_cast %316 : i32 to index
    %c0_97 = arith.constant 0 : index
    %376 = vector.load %arg11[%c0_96, %375, %c0_97] : memref<1x96x64xf32, #tpu.memory_space<vmem>>, vector<1x8x32xf32>
    %377 = vector.shape_cast %376 : vector<1x8x32xf32> to vector<8x32xf32>
    %378 = vector.shape_cast %374 : vector<8x32xf32> to vector<1x8x32xf32>
    tpu.vector_store %arg11[%c0_96, %375, %c0_97], %378 {strides = array<i32>} : memref<1x96x64xf32, #tpu.memory_space<vmem>>, vector<1x8x32xf32>,
    %379 = arith.select %314, %345, %c4_i32 : i32
    %c8_i32_98 = arith.constant 8 : i32
    %380 = arith.muli %379, %c8_i32_98 : i32
    %381 = tpu.assume_multiple %380, 8 : i32
    %382 = arith.select %314, %373, %13 : vector<8x32xf32>
    %c0_99 = arith.constant 0 : index
    %383 = arith.index_cast %381 : i32 to index
    %c32_100 = arith.constant 32 : index
    %384 = vector.load %arg11[%c0_99, %383, %c32_100] : memref<1x96x64xf32, #tpu.memory_space<vmem>>, vector<1x8x32xf32>
    %385 = vector.shape_cast %384 : vector<1x8x32xf32> to vector<8x32xf32>
    %386 = vector.shape_cast %382 : vector<8x32xf32> to vector<1x8x32xf32>
    tpu.vector_store %arg11[%c0_99, %383, %c32_100], %386 {strides = array<i32>} : memref<1x96x64xf32, #tpu.memory_space<vmem>>, vector<1x8x32xf32>,
    %387 = arith.select %314, %342, %312 : vector<8x32xf32>
    %388 = arith.select %314, %373, %313 : vector<8x32xf32>
    %c5_i32 = arith.constant 5 : i32
    %389 = arith.cmpi slt, %c5_i32, %0 : i32
    %c8_i32_101 = arith.constant 8 : i32
    %390 = arith.muli %c5_i32, %c8_i32_101 : i32
    %391 = tpu.assume_multiple %390, 8 : i32
    %392 = arith.index_cast %391 : i32 to index
    %c0_102 = arith.constant 0 : index
    %393 = vector.load %arg14[%392, %c0_102] : memref<96x192xf32, #tpu.memory_space<vmem>>, vector<8x192xf32>
    %394 = vector.extract_strided_slice %393 {offsets = [0, 0], sizes = [8, 96], strides = [1, 1]} : vector<8x192xf32> to vector<8x96xf32>
    %cst_103 = arith.constant dense<0.000000e+00> : vector<8x96xf32>
    %395 = tpu.matmul %387, %9, %cst_103 {dimension_numbers = #tpu.dot_dimension_numbers<[1], [0], [0], [1], [0, 0, 1, 1], [], []>} : vector<8x32xf32>, vector<32x96xf32>, vector<8x96xf32> -> vector<8x96xf32>
    %396 = vector.broadcast %10 : vector<1x96xf32> to vector<8x96xf32>
    %397 = arith.addf %395, %396 : vector<8x96xf32>
    %398 = vector.extract_strided_slice %394 {offsets = [0, 0], sizes = [8, 64], strides = [1, 1]} : vector<8x96xf32> to vector<8x64xf32>
    %399 = vector.extract_strided_slice %397 {offsets = [0, 0], sizes = [8, 64], strides = [1, 1]} : vector<8x96xf32> to vector<8x64xf32>
    %400 = arith.addf %398, %399 : vector<8x64xf32>
    %401 = arith.negf %400 : vector<8x64xf32>
    %402 = math.exp %401 : vector<8x64xf32>
    %cst_104 = arith.constant 1.000000e+00 : f32
    %403 = vector.broadcast %cst_104 : f32 to vector<8x64xf32>
    %404 = arith.addf %403, %402 : vector<8x64xf32>
    %405 = arith.divf %403, %404 : vector<8x64xf32>
    %406 = vector.extract_strided_slice %405 {offsets = [0, 0], sizes = [8, 32], strides = [1, 1]} : vector<8x64xf32> to vector<8x32xf32>
    %407 = vector.extract_strided_slice %405 {offsets = [0, 32], sizes = [8, 32], strides = [1, 1]} : vector<8x64xf32> to vector<8x32xf32>
    %408 = vector.extract_strided_slice %394 {offsets = [0, 64], sizes = [8, 32], strides = [1, 1]} : vector<8x96xf32> to vector<8x32xf32>
    %409 = vector.extract_strided_slice %397 {offsets = [0, 64], sizes = [8, 32], strides = [1, 1]} : vector<8x96xf32> to vector<8x32xf32>
    %410 = arith.mulf %406, %409 : vector<8x32xf32>
    %411 = arith.addf %408, %410 : vector<8x32xf32>
    %412 = math.tanh %411 : vector<8x32xf32>
    %cst_105 = arith.constant 1.000000e+00 : f32
    %413 = vector.broadcast %cst_105 : f32 to vector<8x32xf32>
    %414 = arith.subf %413, %407 : vector<8x32xf32>
    %415 = arith.mulf %414, %412 : vector<8x32xf32>
    %416 = arith.mulf %407, %387 : vector<8x32xf32>
    %417 = arith.addf %415, %416 : vector<8x32xf32>
    %c1_i32_106 = arith.constant 1 : i32
    %418 = arith.subi %0, %c1_i32_106 : i32
    %419 = arith.subi %418, %c5_i32 : i32
    %c0_i32_107 = arith.constant 0 : i32
    %420 = arith.maxsi %419, %c0_i32_107 : i32
    %c8_i32_108 = arith.constant 8 : i32
    %421 = arith.muli %420, %c8_i32_108 : i32
    %422 = tpu.assume_multiple %421, 8 : i32
    %423 = arith.index_cast %422 : i32 to index
    %c0_109 = arith.constant 0 : index
    %424 = vector.load %arg14[%423, %c0_109] : memref<96x192xf32, #tpu.memory_space<vmem>>, vector<8x192xf32>
    %425 = vector.extract_strided_slice %424 {offsets = [0, 96], sizes = [8, 96], strides = [1, 1]} : vector<8x192xf32> to vector<8x96xf32>
    %cst_110 = arith.constant dense<0.000000e+00> : vector<8x96xf32>
    %426 = tpu.matmul %388, %11, %cst_110 {dimension_numbers = #tpu.dot_dimension_numbers<[1], [0], [0], [1], [0, 0, 1, 1], [], []>} : vector<8x32xf32>, vector<32x96xf32>, vector<8x96xf32> -> vector<8x96xf32>
    %427 = vector.broadcast %12 : vector<1x96xf32> to vector<8x96xf32>
    %428 = arith.addf %426, %427 : vector<8x96xf32>
    %429 = vector.extract_strided_slice %425 {offsets = [0, 0], sizes = [8, 64], strides = [1, 1]} : vector<8x96xf32> to vector<8x64xf32>
    %430 = vector.extract_strided_slice %428 {offsets = [0, 0], sizes = [8, 64], strides = [1, 1]} : vector<8x96xf32> to vector<8x64xf32>
    %431 = arith.addf %429, %430 : vector<8x64xf32>
    %432 = arith.negf %431 : vector<8x64xf32>
    %433 = math.exp %432 : vector<8x64xf32>
    %cst_111 = arith.constant 1.000000e+00 : f32
    %434 = vector.broadcast %cst_111 : f32 to vector<8x64xf32>
    %435 = arith.addf %434, %433 : vector<8x64xf32>
    %436 = arith.divf %434, %435 : vector<8x64xf32>
    %437 = vector.extract_strided_slice %436 {offsets = [0, 0], sizes = [8, 32], strides = [1, 1]} : vector<8x64xf32> to vector<8x32xf32>
    %438 = vector.extract_strided_slice %436 {offsets = [0, 32], sizes = [8, 32], strides = [1, 1]} : vector<8x64xf32> to vector<8x32xf32>
    %439 = vector.extract_strided_slice %425 {offsets = [0, 64], sizes = [8, 32], strides = [1, 1]} : vector<8x96xf32> to vector<8x32xf32>
    %440 = vector.extract_strided_slice %428 {offsets = [0, 64], sizes = [8, 32], strides = [1, 1]} : vector<8x96xf32> to vector<8x32xf32>
    %441 = arith.mulf %437, %440 : vector<8x32xf32>
    %442 = arith.addf %439, %441 : vector<8x32xf32>
    %443 = math.tanh %442 : vector<8x32xf32>
    %cst_112 = arith.constant 1.000000e+00 : f32
    %444 = vector.broadcast %cst_112 : f32 to vector<8x32xf32>
    %445 = arith.subf %444, %438 : vector<8x32xf32>
    %446 = arith.mulf %445, %443 : vector<8x32xf32>
    %447 = arith.mulf %438, %388 : vector<8x32xf32>
    %448 = arith.addf %446, %447 : vector<8x32xf32>
    %449 = arith.select %389, %417, %13 : vector<8x32xf32>
    %c0_113 = arith.constant 0 : index
    %450 = arith.index_cast %391 : i32 to index
    %c0_114 = arith.constant 0 : index
    %451 = vector.load %arg11[%c0_113, %450, %c0_114] : memref<1x96x64xf32, #tpu.memory_space<vmem>>, vector<1x8x32xf32>
    %452 = vector.shape_cast %451 : vector<1x8x32xf32> to vector<8x32xf32>
    %453 = vector.shape_cast %449 : vector<8x32xf32> to vector<1x8x32xf32>
    tpu.vector_store %arg11[%c0_113, %450, %c0_114], %453 {strides = array<i32>} : memref<1x96x64xf32, #tpu.memory_space<vmem>>, vector<1x8x32xf32>,
    %454 = arith.select %389, %420, %c5_i32 : i32
    %c8_i32_115 = arith.constant 8 : i32
    %455 = arith.muli %454, %c8_i32_115 : i32
    %456 = tpu.assume_multiple %455, 8 : i32
    %457 = arith.select %389, %448, %13 : vector<8x32xf32>
    %c0_116 = arith.constant 0 : index
    %458 = arith.index_cast %456 : i32 to index
    %c32_117 = arith.constant 32 : index
    %459 = vector.load %arg11[%c0_116, %458, %c32_117] : memref<1x96x64xf32, #tpu.memory_space<vmem>>, vector<1x8x32xf32>
    %460 = vector.shape_cast %459 : vector<1x8x32xf32> to vector<8x32xf32>
    %461 = vector.shape_cast %457 : vector<8x32xf32> to vector<1x8x32xf32>
    tpu.vector_store %arg11[%c0_116, %458, %c32_117], %461 {strides = array<i32>} : memref<1x96x64xf32, #tpu.memory_space<vmem>>, vector<1x8x32xf32>,
    %462 = arith.select %389, %417, %387 : vector<8x32xf32>
    %463 = arith.select %389, %448, %388 : vector<8x32xf32>
    %c6_i32 = arith.constant 6 : i32
    %464 = arith.cmpi slt, %c6_i32, %0 : i32
    %c8_i32_118 = arith.constant 8 : i32
    %465 = arith.muli %c6_i32, %c8_i32_118 : i32
    %466 = tpu.assume_multiple %465, 8 : i32
    %467 = arith.index_cast %466 : i32 to index
    %c0_119 = arith.constant 0 : index
    %468 = vector.load %arg14[%467, %c0_119] : memref<96x192xf32, #tpu.memory_space<vmem>>, vector<8x192xf32>
    %469 = vector.extract_strided_slice %468 {offsets = [0, 0], sizes = [8, 96], strides = [1, 1]} : vector<8x192xf32> to vector<8x96xf32>
    %cst_120 = arith.constant dense<0.000000e+00> : vector<8x96xf32>
    %470 = tpu.matmul %462, %9, %cst_120 {dimension_numbers = #tpu.dot_dimension_numbers<[1], [0], [0], [1], [0, 0, 1, 1], [], []>} : vector<8x32xf32>, vector<32x96xf32>, vector<8x96xf32> -> vector<8x96xf32>
    %471 = vector.broadcast %10 : vector<1x96xf32> to vector<8x96xf32>
    %472 = arith.addf %470, %471 : vector<8x96xf32>
    %473 = vector.extract_strided_slice %469 {offsets = [0, 0], sizes = [8, 64], strides = [1, 1]} : vector<8x96xf32> to vector<8x64xf32>
    %474 = vector.extract_strided_slice %472 {offsets = [0, 0], sizes = [8, 64], strides = [1, 1]} : vector<8x96xf32> to vector<8x64xf32>
    %475 = arith.addf %473, %474 : vector<8x64xf32>
    %476 = arith.negf %475 : vector<8x64xf32>
    %477 = math.exp %476 : vector<8x64xf32>
    %cst_121 = arith.constant 1.000000e+00 : f32
    %478 = vector.broadcast %cst_121 : f32 to vector<8x64xf32>
    %479 = arith.addf %478, %477 : vector<8x64xf32>
    %480 = arith.divf %478, %479 : vector<8x64xf32>
    %481 = vector.extract_strided_slice %480 {offsets = [0, 0], sizes = [8, 32], strides = [1, 1]} : vector<8x64xf32> to vector<8x32xf32>
    %482 = vector.extract_strided_slice %480 {offsets = [0, 32], sizes = [8, 32], strides = [1, 1]} : vector<8x64xf32> to vector<8x32xf32>
    %483 = vector.extract_strided_slice %469 {offsets = [0, 64], sizes = [8, 32], strides = [1, 1]} : vector<8x96xf32> to vector<8x32xf32>
    %484 = vector.extract_strided_slice %472 {offsets = [0, 64], sizes = [8, 32], strides = [1, 1]} : vector<8x96xf32> to vector<8x32xf32>
    %485 = arith.mulf %481, %484 : vector<8x32xf32>
    %486 = arith.addf %483, %485 : vector<8x32xf32>
    %487 = math.tanh %486 : vector<8x32xf32>
    %cst_122 = arith.constant 1.000000e+00 : f32
    %488 = vector.broadcast %cst_122 : f32 to vector<8x32xf32>
    %489 = arith.subf %488, %482 : vector<8x32xf32>
    %490 = arith.mulf %489, %487 : vector<8x32xf32>
    %491 = arith.mulf %482, %462 : vector<8x32xf32>
    %492 = arith.addf %490, %491 : vector<8x32xf32>
    %c1_i32_123 = arith.constant 1 : i32
    %493 = arith.subi %0, %c1_i32_123 : i32
    %494 = arith.subi %493, %c6_i32 : i32
    %c0_i32_124 = arith.constant 0 : i32
    %495 = arith.maxsi %494, %c0_i32_124 : i32
    %c8_i32_125 = arith.constant 8 : i32
    %496 = arith.muli %495, %c8_i32_125 : i32
    %497 = tpu.assume_multiple %496, 8 : i32
    %498 = arith.index_cast %497 : i32 to index
    %c0_126 = arith.constant 0 : index
    %499 = vector.load %arg14[%498, %c0_126] : memref<96x192xf32, #tpu.memory_space<vmem>>, vector<8x192xf32>
    %500 = vector.extract_strided_slice %499 {offsets = [0, 96], sizes = [8, 96], strides = [1, 1]} : vector<8x192xf32> to vector<8x96xf32>
    %cst_127 = arith.constant dense<0.000000e+00> : vector<8x96xf32>
    %501 = tpu.matmul %463, %11, %cst_127 {dimension_numbers = #tpu.dot_dimension_numbers<[1], [0], [0], [1], [0, 0, 1, 1], [], []>} : vector<8x32xf32>, vector<32x96xf32>, vector<8x96xf32> -> vector<8x96xf32>
    %502 = vector.broadcast %12 : vector<1x96xf32> to vector<8x96xf32>
    %503 = arith.addf %501, %502 : vector<8x96xf32>
    %504 = vector.extract_strided_slice %500 {offsets = [0, 0], sizes = [8, 64], strides = [1, 1]} : vector<8x96xf32> to vector<8x64xf32>
    %505 = vector.extract_strided_slice %503 {offsets = [0, 0], sizes = [8, 64], strides = [1, 1]} : vector<8x96xf32> to vector<8x64xf32>
    %506 = arith.addf %504, %505 : vector<8x64xf32>
    %507 = arith.negf %506 : vector<8x64xf32>
    %508 = math.exp %507 : vector<8x64xf32>
    %cst_128 = arith.constant 1.000000e+00 : f32
    %509 = vector.broadcast %cst_128 : f32 to vector<8x64xf32>
    %510 = arith.addf %509, %508 : vector<8x64xf32>
    %511 = arith.divf %509, %510 : vector<8x64xf32>
    %512 = vector.extract_strided_slice %511 {offsets = [0, 0], sizes = [8, 32], strides = [1, 1]} : vector<8x64xf32> to vector<8x32xf32>
    %513 = vector.extract_strided_slice %511 {offsets = [0, 32], sizes = [8, 32], strides = [1, 1]} : vector<8x64xf32> to vector<8x32xf32>
    %514 = vector.extract_strided_slice %500 {offsets = [0, 64], sizes = [8, 32], strides = [1, 1]} : vector<8x96xf32> to vector<8x32xf32>
    %515 = vector.extract_strided_slice %503 {offsets = [0, 64], sizes = [8, 32], strides = [1, 1]} : vector<8x96xf32> to vector<8x32xf32>
    %516 = arith.mulf %512, %515 : vector<8x32xf32>
    %517 = arith.addf %514, %516 : vector<8x32xf32>
    %518 = math.tanh %517 : vector<8x32xf32>
    %cst_129 = arith.constant 1.000000e+00 : f32
    %519 = vector.broadcast %cst_129 : f32 to vector<8x32xf32>
    %520 = arith.subf %519, %513 : vector<8x32xf32>
    %521 = arith.mulf %520, %518 : vector<8x32xf32>
    %522 = arith.mulf %513, %463 : vector<8x32xf32>
    %523 = arith.addf %521, %522 : vector<8x32xf32>
    %524 = arith.select %464, %492, %13 : vector<8x32xf32>
    %c0_130 = arith.constant 0 : index
    %525 = arith.index_cast %466 : i32 to index
    %c0_131 = arith.constant 0 : index
    %526 = vector.load %arg11[%c0_130, %525, %c0_131] : memref<1x96x64xf32, #tpu.memory_space<vmem>>, vector<1x8x32xf32>
    %527 = vector.shape_cast %526 : vector<1x8x32xf32> to vector<8x32xf32>
    %528 = vector.shape_cast %524 : vector<8x32xf32> to vector<1x8x32xf32>
    tpu.vector_store %arg11[%c0_130, %525, %c0_131], %528 {strides = array<i32>} : memref<1x96x64xf32, #tpu.memory_space<vmem>>, vector<1x8x32xf32>,
    %529 = arith.select %464, %495, %c6_i32 : i32
    %c8_i32_132 = arith.constant 8 : i32
    %530 = arith.muli %529, %c8_i32_132 : i32
    %531 = tpu.assume_multiple %530, 8 : i32
    %532 = arith.select %464, %523, %13 : vector<8x32xf32>
    %c0_133 = arith.constant 0 : index
    %533 = arith.index_cast %531 : i32 to index
    %c32_134 = arith.constant 32 : index
    %534 = vector.load %arg11[%c0_133, %533, %c32_134] : memref<1x96x64xf32, #tpu.memory_space<vmem>>, vector<1x8x32xf32>
    %535 = vector.shape_cast %534 : vector<1x8x32xf32> to vector<8x32xf32>
    %536 = vector.shape_cast %532 : vector<8x32xf32> to vector<1x8x32xf32>
    tpu.vector_store %arg11[%c0_133, %533, %c32_134], %536 {strides = array<i32>} : memref<1x96x64xf32, #tpu.memory_space<vmem>>, vector<1x8x32xf32>,
    %537 = arith.select %464, %492, %462 : vector<8x32xf32>
    %538 = arith.select %464, %523, %463 : vector<8x32xf32>
    %c7_i32 = arith.constant 7 : i32
    %539 = arith.cmpi slt, %c7_i32, %0 : i32
    %c8_i32_135 = arith.constant 8 : i32
    %540 = arith.muli %c7_i32, %c8_i32_135 : i32
    %541 = tpu.assume_multiple %540, 8 : i32
    %542 = arith.index_cast %541 : i32 to index
    %c0_136 = arith.constant 0 : index
    %543 = vector.load %arg14[%542, %c0_136] : memref<96x192xf32, #tpu.memory_space<vmem>>, vector<8x192xf32>
    %544 = vector.extract_strided_slice %543 {offsets = [0, 0], sizes = [8, 96], strides = [1, 1]} : vector<8x192xf32> to vector<8x96xf32>
    %cst_137 = arith.constant dense<0.000000e+00> : vector<8x96xf32>
    %545 = tpu.matmul %537, %9, %cst_137 {dimension_numbers = #tpu.dot_dimension_numbers<[1], [0], [0], [1], [0, 0, 1, 1], [], []>} : vector<8x32xf32>, vector<32x96xf32>, vector<8x96xf32> -> vector<8x96xf32>
    %546 = vector.broadcast %10 : vector<1x96xf32> to vector<8x96xf32>
    %547 = arith.addf %545, %546 : vector<8x96xf32>
    %548 = vector.extract_strided_slice %544 {offsets = [0, 0], sizes = [8, 64], strides = [1, 1]} : vector<8x96xf32> to vector<8x64xf32>
    %549 = vector.extract_strided_slice %547 {offsets = [0, 0], sizes = [8, 64], strides = [1, 1]} : vector<8x96xf32> to vector<8x64xf32>
    %550 = arith.addf %548, %549 : vector<8x64xf32>
    %551 = arith.negf %550 : vector<8x64xf32>
    %552 = math.exp %551 : vector<8x64xf32>
    %cst_138 = arith.constant 1.000000e+00 : f32
    %553 = vector.broadcast %cst_138 : f32 to vector<8x64xf32>
    %554 = arith.addf %553, %552 : vector<8x64xf32>
    %555 = arith.divf %553, %554 : vector<8x64xf32>
    %556 = vector.extract_strided_slice %555 {offsets = [0, 0], sizes = [8, 32], strides = [1, 1]} : vector<8x64xf32> to vector<8x32xf32>
    %557 = vector.extract_strided_slice %555 {offsets = [0, 32], sizes = [8, 32], strides = [1, 1]} : vector<8x64xf32> to vector<8x32xf32>
    %558 = vector.extract_strided_slice %544 {offsets = [0, 64], sizes = [8, 32], strides = [1, 1]} : vector<8x96xf32> to vector<8x32xf32>
    %559 = vector.extract_strided_slice %547 {offsets = [0, 64], sizes = [8, 32], strides = [1, 1]} : vector<8x96xf32> to vector<8x32xf32>
    %560 = arith.mulf %556, %559 : vector<8x32xf32>
    %561 = arith.addf %558, %560 : vector<8x32xf32>
    %562 = math.tanh %561 : vector<8x32xf32>
    %cst_139 = arith.constant 1.000000e+00 : f32
    %563 = vector.broadcast %cst_139 : f32 to vector<8x32xf32>
    %564 = arith.subf %563, %557 : vector<8x32xf32>
    %565 = arith.mulf %564, %562 : vector<8x32xf32>
    %566 = arith.mulf %557, %537 : vector<8x32xf32>
    %567 = arith.addf %565, %566 : vector<8x32xf32>
    %c1_i32_140 = arith.constant 1 : i32
    %568 = arith.subi %0, %c1_i32_140 : i32
    %569 = arith.subi %568, %c7_i32 : i32
    %c0_i32_141 = arith.constant 0 : i32
    %570 = arith.maxsi %569, %c0_i32_141 : i32
    %c8_i32_142 = arith.constant 8 : i32
    %571 = arith.muli %570, %c8_i32_142 : i32
    %572 = tpu.assume_multiple %571, 8 : i32
    %573 = arith.index_cast %572 : i32 to index
    %c0_143 = arith.constant 0 : index
    %574 = vector.load %arg14[%573, %c0_143] : memref<96x192xf32, #tpu.memory_space<vmem>>, vector<8x192xf32>
    %575 = vector.extract_strided_slice %574 {offsets = [0, 96], sizes = [8, 96], strides = [1, 1]} : vector<8x192xf32> to vector<8x96xf32>
    %cst_144 = arith.constant dense<0.000000e+00> : vector<8x96xf32>
    %576 = tpu.matmul %538, %11, %cst_144 {dimension_numbers = #tpu.dot_dimension_numbers<[1], [0], [0], [1], [0, 0, 1, 1], [], []>} : vector<8x32xf32>, vector<32x96xf32>, vector<8x96xf32> -> vector<8x96xf32>
    %577 = vector.broadcast %12 : vector<1x96xf32> to vector<8x96xf32>
    %578 = arith.addf %576, %577 : vector<8x96xf32>
    %579 = vector.extract_strided_slice %575 {offsets = [0, 0], sizes = [8, 64], strides = [1, 1]} : vector<8x96xf32> to vector<8x64xf32>
    %580 = vector.extract_strided_slice %578 {offsets = [0, 0], sizes = [8, 64], strides = [1, 1]} : vector<8x96xf32> to vector<8x64xf32>
    %581 = arith.addf %579, %580 : vector<8x64xf32>
    %582 = arith.negf %581 : vector<8x64xf32>
    %583 = math.exp %582 : vector<8x64xf32>
    %cst_145 = arith.constant 1.000000e+00 : f32
    %584 = vector.broadcast %cst_145 : f32 to vector<8x64xf32>
    %585 = arith.addf %584, %583 : vector<8x64xf32>
    %586 = arith.divf %584, %585 : vector<8x64xf32>
    %587 = vector.extract_strided_slice %586 {offsets = [0, 0], sizes = [8, 32], strides = [1, 1]} : vector<8x64xf32> to vector<8x32xf32>
    %588 = vector.extract_strided_slice %586 {offsets = [0, 32], sizes = [8, 32], strides = [1, 1]} : vector<8x64xf32> to vector<8x32xf32>
    %589 = vector.extract_strided_slice %575 {offsets = [0, 64], sizes = [8, 32], strides = [1, 1]} : vector<8x96xf32> to vector<8x32xf32>
    %590 = vector.extract_strided_slice %578 {offsets = [0, 64], sizes = [8, 32], strides = [1, 1]} : vector<8x96xf32> to vector<8x32xf32>
    %591 = arith.mulf %587, %590 : vector<8x32xf32>
    %592 = arith.addf %589, %591 : vector<8x32xf32>
    %593 = math.tanh %592 : vector<8x32xf32>
    %cst_146 = arith.constant 1.000000e+00 : f32
    %594 = vector.broadcast %cst_146 : f32 to vector<8x32xf32>
    %595 = arith.subf %594, %588 : vector<8x32xf32>
    %596 = arith.mulf %595, %593 : vector<8x32xf32>
    %597 = arith.mulf %588, %538 : vector<8x32xf32>
    %598 = arith.addf %596, %597 : vector<8x32xf32>
    %599 = arith.select %539, %567, %13 : vector<8x32xf32>
    %c0_147 = arith.constant 0 : index
    %600 = arith.index_cast %541 : i32 to index
    %c0_148 = arith.constant 0 : index
    %601 = vector.load %arg11[%c0_147, %600, %c0_148] : memref<1x96x64xf32, #tpu.memory_space<vmem>>, vector<1x8x32xf32>
    %602 = vector.shape_cast %601 : vector<1x8x32xf32> to vector<8x32xf32>
    %603 = vector.shape_cast %599 : vector<8x32xf32> to vector<1x8x32xf32>
    tpu.vector_store %arg11[%c0_147, %600, %c0_148], %603 {strides = array<i32>} : memref<1x96x64xf32, #tpu.memory_space<vmem>>, vector<1x8x32xf32>,
    %604 = arith.select %539, %570, %c7_i32 : i32
    %c8_i32_149 = arith.constant 8 : i32
    %605 = arith.muli %604, %c8_i32_149 : i32
    %606 = tpu.assume_multiple %605, 8 : i32
    %607 = arith.select %539, %598, %13 : vector<8x32xf32>
    %c0_150 = arith.constant 0 : index
    %608 = arith.index_cast %606 : i32 to index
    %c32_151 = arith.constant 32 : index
    %609 = vector.load %arg11[%c0_150, %608, %c32_151] : memref<1x96x64xf32, #tpu.memory_space<vmem>>, vector<1x8x32xf32>
    %610 = vector.shape_cast %609 : vector<1x8x32xf32> to vector<8x32xf32>
    %611 = vector.shape_cast %607 : vector<8x32xf32> to vector<1x8x32xf32>
    tpu.vector_store %arg11[%c0_150, %608, %c32_151], %611 {strides = array<i32>} : memref<1x96x64xf32, #tpu.memory_space<vmem>>, vector<1x8x32xf32>,
    %612 = arith.select %539, %567, %537 : vector<8x32xf32>
    %613 = arith.select %539, %598, %538 : vector<8x32xf32>
    %c8_i32_152 = arith.constant 8 : i32
    %614 = arith.cmpi slt, %c8_i32_152, %0 : i32
    %c8_i32_153 = arith.constant 8 : i32
    %615 = arith.muli %c8_i32_152, %c8_i32_153 : i32
    %616 = tpu.assume_multiple %615, 8 : i32
    %617 = arith.index_cast %616 : i32 to index
    %c0_154 = arith.constant 0 : index
    %618 = vector.load %arg14[%617, %c0_154] : memref<96x192xf32, #tpu.memory_space<vmem>>, vector<8x192xf32>
    %619 = vector.extract_strided_slice %618 {offsets = [0, 0], sizes = [8, 96], strides = [1, 1]} : vector<8x192xf32> to vector<8x96xf32>
    %cst_155 = arith.constant dense<0.000000e+00> : vector<8x96xf32>
    %620 = tpu.matmul %612, %9, %cst_155 {dimension_numbers = #tpu.dot_dimension_numbers<[1], [0], [0], [1], [0, 0, 1, 1], [], []>} : vector<8x32xf32>, vector<32x96xf32>, vector<8x96xf32> -> vector<8x96xf32>
    %621 = vector.broadcast %10 : vector<1x96xf32> to vector<8x96xf32>
    %622 = arith.addf %620, %621 : vector<8x96xf32>
    %623 = vector.extract_strided_slice %619 {offsets = [0, 0], sizes = [8, 64], strides = [1, 1]} : vector<8x96xf32> to vector<8x64xf32>
    %624 = vector.extract_strided_slice %622 {offsets = [0, 0], sizes = [8, 64], strides = [1, 1]} : vector<8x96xf32> to vector<8x64xf32>
    %625 = arith.addf %623, %624 : vector<8x64xf32>
    %626 = arith.negf %625 : vector<8x64xf32>
    %627 = math.exp %626 : vector<8x64xf32>
    %cst_156 = arith.constant 1.000000e+00 : f32
    %628 = vector.broadcast %cst_156 : f32 to vector<8x64xf32>
    %629 = arith.addf %628, %627 : vector<8x64xf32>
    %630 = arith.divf %628, %629 : vector<8x64xf32>
    %631 = vector.extract_strided_slice %630 {offsets = [0, 0], sizes = [8, 32], strides = [1, 1]} : vector<8x64xf32> to vector<8x32xf32>
    %632 = vector.extract_strided_slice %630 {offsets = [0, 32], sizes = [8, 32], strides = [1, 1]} : vector<8x64xf32> to vector<8x32xf32>
    %633 = vector.extract_strided_slice %619 {offsets = [0, 64], sizes = [8, 32], strides = [1, 1]} : vector<8x96xf32> to vector<8x32xf32>
    %634 = vector.extract_strided_slice %622 {offsets = [0, 64], sizes = [8, 32], strides = [1, 1]} : vector<8x96xf32> to vector<8x32xf32>
    %635 = arith.mulf %631, %634 : vector<8x32xf32>
    %636 = arith.addf %633, %635 : vector<8x32xf32>
    %637 = math.tanh %636 : vector<8x32xf32>
    %cst_157 = arith.constant 1.000000e+00 : f32
    %638 = vector.broadcast %cst_157 : f32 to vector<8x32xf32>
    %639 = arith.subf %638, %632 : vector<8x32xf32>
    %640 = arith.mulf %639, %637 : vector<8x32xf32>
    %641 = arith.mulf %632, %612 : vector<8x32xf32>
    %642 = arith.addf %640, %641 : vector<8x32xf32>
    %c1_i32_158 = arith.constant 1 : i32
    %643 = arith.subi %0, %c1_i32_158 : i32
    %644 = arith.subi %643, %c8_i32_152 : i32
    %c0_i32_159 = arith.constant 0 : i32
    %645 = arith.maxsi %644, %c0_i32_159 : i32
    %c8_i32_160 = arith.constant 8 : i32
    %646 = arith.muli %645, %c8_i32_160 : i32
    %647 = tpu.assume_multiple %646, 8 : i32
    %648 = arith.index_cast %647 : i32 to index
    %c0_161 = arith.constant 0 : index
    %649 = vector.load %arg14[%648, %c0_161] : memref<96x192xf32, #tpu.memory_space<vmem>>, vector<8x192xf32>
    %650 = vector.extract_strided_slice %649 {offsets = [0, 96], sizes = [8, 96], strides = [1, 1]} : vector<8x192xf32> to vector<8x96xf32>
    %cst_162 = arith.constant dense<0.000000e+00> : vector<8x96xf32>
    %651 = tpu.matmul %613, %11, %cst_162 {dimension_numbers = #tpu.dot_dimension_numbers<[1], [0], [0], [1], [0, 0, 1, 1], [], []>} : vector<8x32xf32>, vector<32x96xf32>, vector<8x96xf32> -> vector<8x96xf32>
    %652 = vector.broadcast %12 : vector<1x96xf32> to vector<8x96xf32>
    %653 = arith.addf %651, %652 : vector<8x96xf32>
    %654 = vector.extract_strided_slice %650 {offsets = [0, 0], sizes = [8, 64], strides = [1, 1]} : vector<8x96xf32> to vector<8x64xf32>
    %655 = vector.extract_strided_slice %653 {offsets = [0, 0], sizes = [8, 64], strides = [1, 1]} : vector<8x96xf32> to vector<8x64xf32>
    %656 = arith.addf %654, %655 : vector<8x64xf32>
    %657 = arith.negf %656 : vector<8x64xf32>
    %658 = math.exp %657 : vector<8x64xf32>
    %cst_163 = arith.constant 1.000000e+00 : f32
    %659 = vector.broadcast %cst_163 : f32 to vector<8x64xf32>
    %660 = arith.addf %659, %658 : vector<8x64xf32>
    %661 = arith.divf %659, %660 : vector<8x64xf32>
    %662 = vector.extract_strided_slice %661 {offsets = [0, 0], sizes = [8, 32], strides = [1, 1]} : vector<8x64xf32> to vector<8x32xf32>
    %663 = vector.extract_strided_slice %661 {offsets = [0, 32], sizes = [8, 32], strides = [1, 1]} : vector<8x64xf32> to vector<8x32xf32>
    %664 = vector.extract_strided_slice %650 {offsets = [0, 64], sizes = [8, 32], strides = [1, 1]} : vector<8x96xf32> to vector<8x32xf32>
    %665 = vector.extract_strided_slice %653 {offsets = [0, 64], sizes = [8, 32], strides = [1, 1]} : vector<8x96xf32> to vector<8x32xf32>
    %666 = arith.mulf %662, %665 : vector<8x32xf32>
    %667 = arith.addf %664, %666 : vector<8x32xf32>
    %668 = math.tanh %667 : vector<8x32xf32>
    %cst_164 = arith.constant 1.000000e+00 : f32
    %669 = vector.broadcast %cst_164 : f32 to vector<8x32xf32>
    %670 = arith.subf %669, %663 : vector<8x32xf32>
    %671 = arith.mulf %670, %668 : vector<8x32xf32>
    %672 = arith.mulf %663, %613 : vector<8x32xf32>
    %673 = arith.addf %671, %672 : vector<8x32xf32>
    %674 = arith.select %614, %642, %13 : vector<8x32xf32>
    %c0_165 = arith.constant 0 : index
    %675 = arith.index_cast %616 : i32 to index
    %c0_166 = arith.constant 0 : index
    %676 = vector.load %arg11[%c0_165, %675, %c0_166] : memref<1x96x64xf32, #tpu.memory_space<vmem>>, vector<1x8x32xf32>
    %677 = vector.shape_cast %676 : vector<1x8x32xf32> to vector<8x32xf32>
    %678 = vector.shape_cast %674 : vector<8x32xf32> to vector<1x8x32xf32>
    tpu.vector_store %arg11[%c0_165, %675, %c0_166], %678 {strides = array<i32>} : memref<1x96x64xf32, #tpu.memory_space<vmem>>, vector<1x8x32xf32>,
    %679 = arith.select %614, %645, %c8_i32_152 : i32
    %c8_i32_167 = arith.constant 8 : i32
    %680 = arith.muli %679, %c8_i32_167 : i32
    %681 = tpu.assume_multiple %680, 8 : i32
    %682 = arith.select %614, %673, %13 : vector<8x32xf32>
    %c0_168 = arith.constant 0 : index
    %683 = arith.index_cast %681 : i32 to index
    %c32_169 = arith.constant 32 : index
    %684 = vector.load %arg11[%c0_168, %683, %c32_169] : memref<1x96x64xf32, #tpu.memory_space<vmem>>, vector<1x8x32xf32>
    %685 = vector.shape_cast %684 : vector<1x8x32xf32> to vector<8x32xf32>
    %686 = vector.shape_cast %682 : vector<8x32xf32> to vector<1x8x32xf32>
    tpu.vector_store %arg11[%c0_168, %683, %c32_169], %686 {strides = array<i32>} : memref<1x96x64xf32, #tpu.memory_space<vmem>>, vector<1x8x32xf32>,
    %687 = arith.select %614, %642, %612 : vector<8x32xf32>
    %688 = arith.select %614, %673, %613 : vector<8x32xf32>
    %c9_i32 = arith.constant 9 : i32
    %689 = arith.cmpi slt, %c9_i32, %0 : i32
    %c8_i32_170 = arith.constant 8 : i32
    %690 = arith.muli %c9_i32, %c8_i32_170 : i32
    %691 = tpu.assume_multiple %690, 8 : i32
    %692 = arith.index_cast %691 : i32 to index
    %c0_171 = arith.constant 0 : index
    %693 = vector.load %arg14[%692, %c0_171] : memref<96x192xf32, #tpu.memory_space<vmem>>, vector<8x192xf32>
    %694 = vector.extract_strided_slice %693 {offsets = [0, 0], sizes = [8, 96], strides = [1, 1]} : vector<8x192xf32> to vector<8x96xf32>
    %cst_172 = arith.constant dense<0.000000e+00> : vector<8x96xf32>
    %695 = tpu.matmul %687, %9, %cst_172 {dimension_numbers = #tpu.dot_dimension_numbers<[1], [0], [0], [1], [0, 0, 1, 1], [], []>} : vector<8x32xf32>, vector<32x96xf32>, vector<8x96xf32> -> vector<8x96xf32>
    %696 = vector.broadcast %10 : vector<1x96xf32> to vector<8x96xf32>
    %697 = arith.addf %695, %696 : vector<8x96xf32>
    %698 = vector.extract_strided_slice %694 {offsets = [0, 0], sizes = [8, 64], strides = [1, 1]} : vector<8x96xf32> to vector<8x64xf32>
    %699 = vector.extract_strided_slice %697 {offsets = [0, 0], sizes = [8, 64], strides = [1, 1]} : vector<8x96xf32> to vector<8x64xf32>
    %700 = arith.addf %698, %699 : vector<8x64xf32>
    %701 = arith.negf %700 : vector<8x64xf32>
    %702 = math.exp %701 : vector<8x64xf32>
    %cst_173 = arith.constant 1.000000e+00 : f32
    %703 = vector.broadcast %cst_173 : f32 to vector<8x64xf32>
    %704 = arith.addf %703, %702 : vector<8x64xf32>
    %705 = arith.divf %703, %704 : vector<8x64xf32>
    %706 = vector.extract_strided_slice %705 {offsets = [0, 0], sizes = [8, 32], strides = [1, 1]} : vector<8x64xf32> to vector<8x32xf32>
    %707 = vector.extract_strided_slice %705 {offsets = [0, 32], sizes = [8, 32], strides = [1, 1]} : vector<8x64xf32> to vector<8x32xf32>
    %708 = vector.extract_strided_slice %694 {offsets = [0, 64], sizes = [8, 32], strides = [1, 1]} : vector<8x96xf32> to vector<8x32xf32>
    %709 = vector.extract_strided_slice %697 {offsets = [0, 64], sizes = [8, 32], strides = [1, 1]} : vector<8x96xf32> to vector<8x32xf32>
    %710 = arith.mulf %706, %709 : vector<8x32xf32>
    %711 = arith.addf %708, %710 : vector<8x32xf32>
    %712 = math.tanh %711 : vector<8x32xf32>
    %cst_174 = arith.constant 1.000000e+00 : f32
    %713 = vector.broadcast %cst_174 : f32 to vector<8x32xf32>
    %714 = arith.subf %713, %707 : vector<8x32xf32>
    %715 = arith.mulf %714, %712 : vector<8x32xf32>
    %716 = arith.mulf %707, %687 : vector<8x32xf32>
    %717 = arith.addf %715, %716 : vector<8x32xf32>
    %c1_i32_175 = arith.constant 1 : i32
    %718 = arith.subi %0, %c1_i32_175 : i32
    %719 = arith.subi %718, %c9_i32 : i32
    %c0_i32_176 = arith.constant 0 : i32
    %720 = arith.maxsi %719, %c0_i32_176 : i32
    %c8_i32_177 = arith.constant 8 : i32
    %721 = arith.muli %720, %c8_i32_177 : i32
    %722 = tpu.assume_multiple %721, 8 : i32
    %723 = arith.index_cast %722 : i32 to index
    %c0_178 = arith.constant 0 : index
    %724 = vector.load %arg14[%723, %c0_178] : memref<96x192xf32, #tpu.memory_space<vmem>>, vector<8x192xf32>
    %725 = vector.extract_strided_slice %724 {offsets = [0, 96], sizes = [8, 96], strides = [1, 1]} : vector<8x192xf32> to vector<8x96xf32>
    %cst_179 = arith.constant dense<0.000000e+00> : vector<8x96xf32>
    %726 = tpu.matmul %688, %11, %cst_179 {dimension_numbers = #tpu.dot_dimension_numbers<[1], [0], [0], [1], [0, 0, 1, 1], [], []>} : vector<8x32xf32>, vector<32x96xf32>, vector<8x96xf32> -> vector<8x96xf32>
    %727 = vector.broadcast %12 : vector<1x96xf32> to vector<8x96xf32>
    %728 = arith.addf %726, %727 : vector<8x96xf32>
    %729 = vector.extract_strided_slice %725 {offsets = [0, 0], sizes = [8, 64], strides = [1, 1]} : vector<8x96xf32> to vector<8x64xf32>
    %730 = vector.extract_strided_slice %728 {offsets = [0, 0], sizes = [8, 64], strides = [1, 1]} : vector<8x96xf32> to vector<8x64xf32>
    %731 = arith.addf %729, %730 : vector<8x64xf32>
    %732 = arith.negf %731 : vector<8x64xf32>
    %733 = math.exp %732 : vector<8x64xf32>
    %cst_180 = arith.constant 1.000000e+00 : f32
    %734 = vector.broadcast %cst_180 : f32 to vector<8x64xf32>
    %735 = arith.addf %734, %733 : vector<8x64xf32>
    %736 = arith.divf %734, %735 : vector<8x64xf32>
    %737 = vector.extract_strided_slice %736 {offsets = [0, 0], sizes = [8, 32], strides = [1, 1]} : vector<8x64xf32> to vector<8x32xf32>
    %738 = vector.extract_strided_slice %736 {offsets = [0, 32], sizes = [8, 32], strides = [1, 1]} : vector<8x64xf32> to vector<8x32xf32>
    %739 = vector.extract_strided_slice %725 {offsets = [0, 64], sizes = [8, 32], strides = [1, 1]} : vector<8x96xf32> to vector<8x32xf32>
    %740 = vector.extract_strided_slice %728 {offsets = [0, 64], sizes = [8, 32], strides = [1, 1]} : vector<8x96xf32> to vector<8x32xf32>
    %741 = arith.mulf %737, %740 : vector<8x32xf32>
    %742 = arith.addf %739, %741 : vector<8x32xf32>
    %743 = math.tanh %742 : vector<8x32xf32>
    %cst_181 = arith.constant 1.000000e+00 : f32
    %744 = vector.broadcast %cst_181 : f32 to vector<8x32xf32>
    %745 = arith.subf %744, %738 : vector<8x32xf32>
    %746 = arith.mulf %745, %743 : vector<8x32xf32>
    %747 = arith.mulf %738, %688 : vector<8x32xf32>
    %748 = arith.addf %746, %747 : vector<8x32xf32>
    %749 = arith.select %689, %717, %13 : vector<8x32xf32>
    %c0_182 = arith.constant 0 : index
    %750 = arith.index_cast %691 : i32 to index
    %c0_183 = arith.constant 0 : index
    %751 = vector.load %arg11[%c0_182, %750, %c0_183] : memref<1x96x64xf32, #tpu.memory_space<vmem>>, vector<1x8x32xf32>
    %752 = vector.shape_cast %751 : vector<1x8x32xf32> to vector<8x32xf32>
    %753 = vector.shape_cast %749 : vector<8x32xf32> to vector<1x8x32xf32>
    tpu.vector_store %arg11[%c0_182, %750, %c0_183], %753 {strides = array<i32>} : memref<1x96x64xf32, #tpu.memory_space<vmem>>, vector<1x8x32xf32>,
    %754 = arith.select %689, %720, %c9_i32 : i32
    %c8_i32_184 = arith.constant 8 : i32
    %755 = arith.muli %754, %c8_i32_184 : i32
    %756 = tpu.assume_multiple %755, 8 : i32
    %757 = arith.select %689, %748, %13 : vector<8x32xf32>
    %c0_185 = arith.constant 0 : index
    %758 = arith.index_cast %756 : i32 to index
    %c32_186 = arith.constant 32 : index
    %759 = vector.load %arg11[%c0_185, %758, %c32_186] : memref<1x96x64xf32, #tpu.memory_space<vmem>>, vector<1x8x32xf32>
    %760 = vector.shape_cast %759 : vector<1x8x32xf32> to vector<8x32xf32>
    %761 = vector.shape_cast %757 : vector<8x32xf32> to vector<1x8x32xf32>
    tpu.vector_store %arg11[%c0_185, %758, %c32_186], %761 {strides = array<i32>} : memref<1x96x64xf32, #tpu.memory_space<vmem>>, vector<1x8x32xf32>,
    %762 = arith.select %689, %717, %687 : vector<8x32xf32>
    %763 = arith.select %689, %748, %688 : vector<8x32xf32>
    %c10_i32 = arith.constant 10 : i32
    %764 = arith.cmpi slt, %c10_i32, %0 : i32
    %c8_i32_187 = arith.constant 8 : i32
    %765 = arith.muli %c10_i32, %c8_i32_187 : i32
    %766 = tpu.assume_multiple %765, 8 : i32
    %767 = arith.index_cast %766 : i32 to index
    %c0_188 = arith.constant 0 : index
    %768 = vector.load %arg14[%767, %c0_188] : memref<96x192xf32, #tpu.memory_space<vmem>>, vector<8x192xf32>
    %769 = vector.extract_strided_slice %768 {offsets = [0, 0], sizes = [8, 96], strides = [1, 1]} : vector<8x192xf32> to vector<8x96xf32>
    %cst_189 = arith.constant dense<0.000000e+00> : vector<8x96xf32>
    %770 = tpu.matmul %762, %9, %cst_189 {dimension_numbers = #tpu.dot_dimension_numbers<[1], [0], [0], [1], [0, 0, 1, 1], [], []>} : vector<8x32xf32>, vector<32x96xf32>, vector<8x96xf32> -> vector<8x96xf32>
    %771 = vector.broadcast %10 : vector<1x96xf32> to vector<8x96xf32>
    %772 = arith.addf %770, %771 : vector<8x96xf32>
    %773 = vector.extract_strided_slice %769 {offsets = [0, 0], sizes = [8, 64], strides = [1, 1]} : vector<8x96xf32> to vector<8x64xf32>
    %774 = vector.extract_strided_slice %772 {offsets = [0, 0], sizes = [8, 64], strides = [1, 1]} : vector<8x96xf32> to vector<8x64xf32>
    %775 = arith.addf %773, %774 : vector<8x64xf32>
    %776 = arith.negf %775 : vector<8x64xf32>
    %777 = math.exp %776 : vector<8x64xf32>
    %cst_190 = arith.constant 1.000000e+00 : f32
    %778 = vector.broadcast %cst_190 : f32 to vector<8x64xf32>
    %779 = arith.addf %778, %777 : vector<8x64xf32>
    %780 = arith.divf %778, %779 : vector<8x64xf32>
    %781 = vector.extract_strided_slice %780 {offsets = [0, 0], sizes = [8, 32], strides = [1, 1]} : vector<8x64xf32> to vector<8x32xf32>
    %782 = vector.extract_strided_slice %780 {offsets = [0, 32], sizes = [8, 32], strides = [1, 1]} : vector<8x64xf32> to vector<8x32xf32>
    %783 = vector.extract_strided_slice %769 {offsets = [0, 64], sizes = [8, 32], strides = [1, 1]} : vector<8x96xf32> to vector<8x32xf32>
    %784 = vector.extract_strided_slice %772 {offsets = [0, 64], sizes = [8, 32], strides = [1, 1]} : vector<8x96xf32> to vector<8x32xf32>
    %785 = arith.mulf %781, %784 : vector<8x32xf32>
    %786 = arith.addf %783, %785 : vector<8x32xf32>
    %787 = math.tanh %786 : vector<8x32xf32>
    %cst_191 = arith.constant 1.000000e+00 : f32
    %788 = vector.broadcast %cst_191 : f32 to vector<8x32xf32>
    %789 = arith.subf %788, %782 : vector<8x32xf32>
    %790 = arith.mulf %789, %787 : vector<8x32xf32>
    %791 = arith.mulf %782, %762 : vector<8x32xf32>
    %792 = arith.addf %790, %791 : vector<8x32xf32>
    %c1_i32_192 = arith.constant 1 : i32
    %793 = arith.subi %0, %c1_i32_192 : i32
    %794 = arith.subi %793, %c10_i32 : i32
    %c0_i32_193 = arith.constant 0 : i32
    %795 = arith.maxsi %794, %c0_i32_193 : i32
    %c8_i32_194 = arith.constant 8 : i32
    %796 = arith.muli %795, %c8_i32_194 : i32
    %797 = tpu.assume_multiple %796, 8 : i32
    %798 = arith.index_cast %797 : i32 to index
    %c0_195 = arith.constant 0 : index
    %799 = vector.load %arg14[%798, %c0_195] : memref<96x192xf32, #tpu.memory_space<vmem>>, vector<8x192xf32>
    %800 = vector.extract_strided_slice %799 {offsets = [0, 96], sizes = [8, 96], strides = [1, 1]} : vector<8x192xf32> to vector<8x96xf32>
    %cst_196 = arith.constant dense<0.000000e+00> : vector<8x96xf32>
    %801 = tpu.matmul %763, %11, %cst_196 {dimension_numbers = #tpu.dot_dimension_numbers<[1], [0], [0], [1], [0, 0, 1, 1], [], []>} : vector<8x32xf32>, vector<32x96xf32>, vector<8x96xf32> -> vector<8x96xf32>
    %802 = vector.broadcast %12 : vector<1x96xf32> to vector<8x96xf32>
    %803 = arith.addf %801, %802 : vector<8x96xf32>
    %804 = vector.extract_strided_slice %800 {offsets = [0, 0], sizes = [8, 64], strides = [1, 1]} : vector<8x96xf32> to vector<8x64xf32>
    %805 = vector.extract_strided_slice %803 {offsets = [0, 0], sizes = [8, 64], strides = [1, 1]} : vector<8x96xf32> to vector<8x64xf32>
    %806 = arith.addf %804, %805 : vector<8x64xf32>
    %807 = arith.negf %806 : vector<8x64xf32>
    %808 = math.exp %807 : vector<8x64xf32>
    %cst_197 = arith.constant 1.000000e+00 : f32
    %809 = vector.broadcast %cst_197 : f32 to vector<8x64xf32>
    %810 = arith.addf %809, %808 : vector<8x64xf32>
    %811 = arith.divf %809, %810 : vector<8x64xf32>
    %812 = vector.extract_strided_slice %811 {offsets = [0, 0], sizes = [8, 32], strides = [1, 1]} : vector<8x64xf32> to vector<8x32xf32>
    %813 = vector.extract_strided_slice %811 {offsets = [0, 32], sizes = [8, 32], strides = [1, 1]} : vector<8x64xf32> to vector<8x32xf32>
    %814 = vector.extract_strided_slice %800 {offsets = [0, 64], sizes = [8, 32], strides = [1, 1]} : vector<8x96xf32> to vector<8x32xf32>
    %815 = vector.extract_strided_slice %803 {offsets = [0, 64], sizes = [8, 32], strides = [1, 1]} : vector<8x96xf32> to vector<8x32xf32>
    %816 = arith.mulf %812, %815 : vector<8x32xf32>
    %817 = arith.addf %814, %816 : vector<8x32xf32>
    %818 = math.tanh %817 : vector<8x32xf32>
    %cst_198 = arith.constant 1.000000e+00 : f32
    %819 = vector.broadcast %cst_198 : f32 to vector<8x32xf32>
    %820 = arith.subf %819, %813 : vector<8x32xf32>
    %821 = arith.mulf %820, %818 : vector<8x32xf32>
    %822 = arith.mulf %813, %763 : vector<8x32xf32>
    %823 = arith.addf %821, %822 : vector<8x32xf32>
    %824 = arith.select %764, %792, %13 : vector<8x32xf32>
    %c0_199 = arith.constant 0 : index
    %825 = arith.index_cast %766 : i32 to index
    %c0_200 = arith.constant 0 : index
    %826 = vector.load %arg11[%c0_199, %825, %c0_200] : memref<1x96x64xf32, #tpu.memory_space<vmem>>, vector<1x8x32xf32>
    %827 = vector.shape_cast %826 : vector<1x8x32xf32> to vector<8x32xf32>
    %828 = vector.shape_cast %824 : vector<8x32xf32> to vector<1x8x32xf32>
    tpu.vector_store %arg11[%c0_199, %825, %c0_200], %828 {strides = array<i32>} : memref<1x96x64xf32, #tpu.memory_space<vmem>>, vector<1x8x32xf32>,
    %829 = arith.select %764, %795, %c10_i32 : i32
    %c8_i32_201 = arith.constant 8 : i32
    %830 = arith.muli %829, %c8_i32_201 : i32
    %831 = tpu.assume_multiple %830, 8 : i32
    %832 = arith.select %764, %823, %13 : vector<8x32xf32>
    %c0_202 = arith.constant 0 : index
    %833 = arith.index_cast %831 : i32 to index
    %c32_203 = arith.constant 32 : index
    %834 = vector.load %arg11[%c0_202, %833, %c32_203] : memref<1x96x64xf32, #tpu.memory_space<vmem>>, vector<1x8x32xf32>
    %835 = vector.shape_cast %834 : vector<1x8x32xf32> to vector<8x32xf32>
    %836 = vector.shape_cast %832 : vector<8x32xf32> to vector<1x8x32xf32>
    tpu.vector_store %arg11[%c0_202, %833, %c32_203], %836 {strides = array<i32>} : memref<1x96x64xf32, #tpu.memory_space<vmem>>, vector<1x8x32xf32>,
    %837 = arith.select %764, %792, %762 : vector<8x32xf32>
    %838 = arith.select %764, %823, %763 : vector<8x32xf32>
    %c11_i32 = arith.constant 11 : i32
    %839 = arith.cmpi slt, %c11_i32, %0 : i32
    %c8_i32_204 = arith.constant 8 : i32
    %840 = arith.muli %c11_i32, %c8_i32_204 : i32
    %841 = tpu.assume_multiple %840, 8 : i32
    %842 = arith.index_cast %841 : i32 to index
    %c0_205 = arith.constant 0 : index
    %843 = vector.load %arg14[%842, %c0_205] : memref<96x192xf32, #tpu.memory_space<vmem>>, vector<8x192xf32>
    %844 = vector.extract_strided_slice %843 {offsets = [0, 0], sizes = [8, 96], strides = [1, 1]} : vector<8x192xf32> to vector<8x96xf32>
    %cst_206 = arith.constant dense<0.000000e+00> : vector<8x96xf32>
    %845 = tpu.matmul %837, %9, %cst_206 {dimension_numbers = #tpu.dot_dimension_numbers<[1], [0], [0], [1], [0, 0, 1, 1], [], []>} : vector<8x32xf32>, vector<32x96xf32>, vector<8x96xf32> -> vector<8x96xf32>
    %846 = vector.broadcast %10 : vector<1x96xf32> to vector<8x96xf32>
    %847 = arith.addf %845, %846 : vector<8x96xf32>
    %848 = vector.extract_strided_slice %844 {offsets = [0, 0], sizes = [8, 64], strides = [1, 1]} : vector<8x96xf32> to vector<8x64xf32>
    %849 = vector.extract_strided_slice %847 {offsets = [0, 0], sizes = [8, 64], strides = [1, 1]} : vector<8x96xf32> to vector<8x64xf32>
    %850 = arith.addf %848, %849 : vector<8x64xf32>
    %851 = arith.negf %850 : vector<8x64xf32>
    %852 = math.exp %851 : vector<8x64xf32>
    %cst_207 = arith.constant 1.000000e+00 : f32
    %853 = vector.broadcast %cst_207 : f32 to vector<8x64xf32>
    %854 = arith.addf %853, %852 : vector<8x64xf32>
    %855 = arith.divf %853, %854 : vector<8x64xf32>
    %856 = vector.extract_strided_slice %855 {offsets = [0, 0], sizes = [8, 32], strides = [1, 1]} : vector<8x64xf32> to vector<8x32xf32>
    %857 = vector.extract_strided_slice %855 {offsets = [0, 32], sizes = [8, 32], strides = [1, 1]} : vector<8x64xf32> to vector<8x32xf32>
    %858 = vector.extract_strided_slice %844 {offsets = [0, 64], sizes = [8, 32], strides = [1, 1]} : vector<8x96xf32> to vector<8x32xf32>
    %859 = vector.extract_strided_slice %847 {offsets = [0, 64], sizes = [8, 32], strides = [1, 1]} : vector<8x96xf32> to vector<8x32xf32>
    %860 = arith.mulf %856, %859 : vector<8x32xf32>
    %861 = arith.addf %858, %860 : vector<8x32xf32>
    %862 = math.tanh %861 : vector<8x32xf32>
    %cst_208 = arith.constant 1.000000e+00 : f32
    %863 = vector.broadcast %cst_208 : f32 to vector<8x32xf32>
    %864 = arith.subf %863, %857 : vector<8x32xf32>
    %865 = arith.mulf %864, %862 : vector<8x32xf32>
    %866 = arith.mulf %857, %837 : vector<8x32xf32>
    %867 = arith.addf %865, %866 : vector<8x32xf32>
    %c1_i32_209 = arith.constant 1 : i32
    %868 = arith.subi %0, %c1_i32_209 : i32
    %869 = arith.subi %868, %c11_i32 : i32
    %c0_i32_210 = arith.constant 0 : i32
    %870 = arith.maxsi %869, %c0_i32_210 : i32
    %c8_i32_211 = arith.constant 8 : i32
    %871 = arith.muli %870, %c8_i32_211 : i32
    %872 = tpu.assume_multiple %871, 8 : i32
    %873 = arith.index_cast %872 : i32 to index
    %c0_212 = arith.constant 0 : index
    %874 = vector.load %arg14[%873, %c0_212] : memref<96x192xf32, #tpu.memory_space<vmem>>, vector<8x192xf32>
    %875 = vector.extract_strided_slice %874 {offsets = [0, 96], sizes = [8, 96], strides = [1, 1]} : vector<8x192xf32> to vector<8x96xf32>
    %cst_213 = arith.constant dense<0.000000e+00> : vector<8x96xf32>
    %876 = tpu.matmul %838, %11, %cst_213 {dimension_numbers = #tpu.dot_dimension_numbers<[1], [0], [0], [1], [0, 0, 1, 1], [], []>} : vector<8x32xf32>, vector<32x96xf32>, vector<8x96xf32> -> vector<8x96xf32>
    %877 = vector.broadcast %12 : vector<1x96xf32> to vector<8x96xf32>
    %878 = arith.addf %876, %877 : vector<8x96xf32>
    %879 = vector.extract_strided_slice %875 {offsets = [0, 0], sizes = [8, 64], strides = [1, 1]} : vector<8x96xf32> to vector<8x64xf32>
    %880 = vector.extract_strided_slice %878 {offsets = [0, 0], sizes = [8, 64], strides = [1, 1]} : vector<8x96xf32> to vector<8x64xf32>
    %881 = arith.addf %879, %880 : vector<8x64xf32>
    %882 = arith.negf %881 : vector<8x64xf32>
    %883 = math.exp %882 : vector<8x64xf32>
    %cst_214 = arith.constant 1.000000e+00 : f32
    %884 = vector.broadcast %cst_214 : f32 to vector<8x64xf32>
    %885 = arith.addf %884, %883 : vector<8x64xf32>
    %886 = arith.divf %884, %885 : vector<8x64xf32>
    %887 = vector.extract_strided_slice %886 {offsets = [0, 0], sizes = [8, 32], strides = [1, 1]} : vector<8x64xf32> to vector<8x32xf32>
    %888 = vector.extract_strided_slice %886 {offsets = [0, 32], sizes = [8, 32], strides = [1, 1]} : vector<8x64xf32> to vector<8x32xf32>
    %889 = vector.extract_strided_slice %875 {offsets = [0, 64], sizes = [8, 32], strides = [1, 1]} : vector<8x96xf32> to vector<8x32xf32>
    %890 = vector.extract_strided_slice %878 {offsets = [0, 64], sizes = [8, 32], strides = [1, 1]} : vector<8x96xf32> to vector<8x32xf32>
    %891 = arith.mulf %887, %890 : vector<8x32xf32>
    %892 = arith.addf %889, %891 : vector<8x32xf32>
    %893 = math.tanh %892 : vector<8x32xf32>
    %cst_215 = arith.constant 1.000000e+00 : f32
    %894 = vector.broadcast %cst_215 : f32 to vector<8x32xf32>
    %895 = arith.subf %894, %888 : vector<8x32xf32>
    %896 = arith.mulf %895, %893 : vector<8x32xf32>
    %897 = arith.mulf %888, %838 : vector<8x32xf32>
    %898 = arith.addf %896, %897 : vector<8x32xf32>
    %899 = arith.select %839, %867, %13 : vector<8x32xf32>
    %c0_216 = arith.constant 0 : index
    %900 = arith.index_cast %841 : i32 to index
    %c0_217 = arith.constant 0 : index
    %901 = vector.load %arg11[%c0_216, %900, %c0_217] : memref<1x96x64xf32, #tpu.memory_space<vmem>>, vector<1x8x32xf32>
    %902 = vector.shape_cast %901 : vector<1x8x32xf32> to vector<8x32xf32>
    %903 = vector.shape_cast %899 : vector<8x32xf32> to vector<1x8x32xf32>
    tpu.vector_store %arg11[%c0_216, %900, %c0_217], %903 {strides = array<i32>} : memref<1x96x64xf32, #tpu.memory_space<vmem>>, vector<1x8x32xf32>,
    %904 = arith.select %839, %870, %c11_i32 : i32
    %c8_i32_218 = arith.constant 8 : i32
    %905 = arith.muli %904, %c8_i32_218 : i32
    %906 = tpu.assume_multiple %905, 8 : i32
    %907 = arith.select %839, %898, %13 : vector<8x32xf32>
    %c0_219 = arith.constant 0 : index
    %908 = arith.index_cast %906 : i32 to index
    %c32_220 = arith.constant 32 : index
    %909 = vector.load %arg11[%c0_219, %908, %c32_220] : memref<1x96x64xf32, #tpu.memory_space<vmem>>, vector<1x8x32xf32>
    %910 = vector.shape_cast %909 : vector<1x8x32xf32> to vector<8x32xf32>
    %911 = vector.shape_cast %907 : vector<8x32xf32> to vector<1x8x32xf32>
    tpu.vector_store %arg11[%c0_219, %908, %c32_220], %911 {strides = array<i32>} : memref<1x96x64xf32, #tpu.memory_space<vmem>>, vector<1x8x32xf32>,
    %912 = arith.select %839, %867, %837 : vector<8x32xf32>
    %913 = arith.select %839, %898, %838 : vector<8x32xf32>
    %c12_i32 = arith.constant 12 : i32
    %914 = tpu.concatenate %912, %913 in 1 : vector<8x32xf32>, vector<8x32xf32> -> vector<8x64xf32>
    %c0_221 = arith.constant 0 : index
    %c0_222 = arith.constant 0 : index
    %c0_223 = arith.constant 0 : index
    %915 = vector.load %arg12[%c0_221, %c0_222, %c0_223] : memref<1x8x64xf32, #tpu.memory_space<vmem>>, vector<1x8x64xf32>
    %916 = vector.shape_cast %915 : vector<1x8x64xf32> to vector<8x64xf32>
    %917 = vector.shape_cast %914 : vector<8x64xf32> to vector<1x8x64xf32>
    tpu.vector_store %arg12[%c0_221, %c0_222, %c0_223], %917 {strides = array<i32>} : memref<1x8x64xf32, #tpu.memory_space<vmem>>, vector<1x8x64xf32>,
    %c0_224 = arith.constant 0 : index
    %c0_225 = arith.constant 0 : index
    %918 = vector.load %arg9[%c0_224, %c0_225] : memref<64x32xf32, #tpu.memory_space<vmem>>, vector<64x32xf32>
    %cst_226 = arith.constant dense<0.000000e+00> : vector<8x32xf32>
    %919 = tpu.matmul %914, %918, %cst_226 {dimension_numbers = #tpu.dot_dimension_numbers<[1], [0], [0], [1], [0, 0, 1, 1], [], []>} : vector<8x64xf32>, vector<64x32xf32>, vector<8x32xf32> -> vector<8x32xf32>
    %c0_227 = arith.constant 0 : index
    %c0_228 = arith.constant 0 : index
    %920 = vector.load %arg10[%c0_227, %c0_228] : memref<1x32xf32, #tpu.memory_space<vmem>>, vector<1x32xf32>
    %921 = vector.broadcast %920 : vector<1x32xf32> to vector<8x32xf32>
    %922 = arith.addf %919, %921 : vector<8x32xf32>
    %c0_229 = arith.constant 0 : index
    %c0_230 = arith.constant 0 : index
    %c0_231 = arith.constant 0 : index
    %923 = vector.load %arg13[%c0_229, %c0_230, %c0_231] : memref<1x8x32xf32, #tpu.memory_space<vmem>>, vector<1x8x32xf32>
    %924 = vector.shape_cast %923 : vector<1x8x32xf32> to vector<8x32xf32>
    %925 = vector.shape_cast %922 : vector<8x32xf32> to vector<1x8x32xf32>
    tpu.vector_store %arg13[%c0_229, %c0_230, %c0_231], %925 {strides = array<i32>} : memref<1x8x32xf32, #tpu.memory_space<vmem>>, vector<1x8x32xf32>,
    return
  }
  func.func @transform_0(%arg0: i32, %arg1: memref<1xi32, #tpu.memory_space<smem>>) -> (i32, i32, i32) {
    %c0_i32 = arith.constant 0 : i32
    %c0_i32_0 = arith.constant 0 : i32
    %c0_i32_1 = arith.constant 0 : i32
    return %arg0, %c0_i32, %c0_i32_0 : i32, i32, i32
  }
  func.func @transform_1(%arg0: i32, %arg1: memref<1xi32, #tpu.memory_space<smem>>) -> (i32, i32) {
    %c0_i32 = arith.constant 0 : i32
    %c0_i32_0 = arith.constant 0 : i32
    %c0_i32_1 = arith.constant 0 : i32
    return %c0_i32, %c0_i32_0 : i32, i32
  }
  func.func @transform_2(%arg0: i32, %arg1: memref<1xi32, #tpu.memory_space<smem>>) -> (i32, i32) {
    %c0_i32 = arith.constant 0 : i32
    %c0_i32_0 = arith.constant 0 : i32
    %c0_i32_1 = arith.constant 0 : i32
    return %c0_i32, %c0_i32_0 : i32, i32
  }
  func.func @transform_3(%arg0: i32, %arg1: memref<1xi32, #tpu.memory_space<smem>>) -> (i32, i32) {
    %c0_i32 = arith.constant 0 : i32
    %c0_i32_0 = arith.constant 0 : i32
    %c0_i32_1 = arith.constant 0 : i32
    return %c0_i32, %c0_i32_0 : i32, i32
  }
  func.func @transform_4(%arg0: i32, %arg1: memref<1xi32, #tpu.memory_space<smem>>) -> (i32, i32) {
    %c0_i32 = arith.constant 0 : i32
    %c0_i32_0 = arith.constant 0 : i32
    %c0_i32_1 = arith.constant 0 : i32
    return %c0_i32, %c0_i32_0 : i32, i32
  }
  func.func @transform_5(%arg0: i32, %arg1: memref<1xi32, #tpu.memory_space<smem>>) -> (i32, i32) {
    %c0_i32 = arith.constant 0 : i32
    %c0_i32_0 = arith.constant 0 : i32
    %c0_i32_1 = arith.constant 0 : i32
    return %c0_i32, %c0_i32_0 : i32, i32
  }
  func.func @transform_6(%arg0: i32, %arg1: memref<1xi32, #tpu.memory_space<smem>>) -> (i32, i32) {
    %c0_i32 = arith.constant 0 : i32
    %c0_i32_0 = arith.constant 0 : i32
    %c0_i32_1 = arith.constant 0 : i32
    return %c0_i32, %c0_i32_0 : i32, i32
  }
  func.func @transform_7(%arg0: i32, %arg1: memref<1xi32, #tpu.memory_space<smem>>) -> (i32, i32) {
    %c0_i32 = arith.constant 0 : i32
    %c0_i32_0 = arith.constant 0 : i32
    %c0_i32_1 = arith.constant 0 : i32
    return %c0_i32, %c0_i32_0 : i32, i32
  }
  func.func @transform_8(%arg0: i32, %arg1: memref<1xi32, #tpu.memory_space<smem>>) -> (i32, i32) {
    %c0_i32 = arith.constant 0 : i32
    %c0_i32_0 = arith.constant 0 : i32
    %c0_i32_1 = arith.constant 0 : i32
    return %c0_i32, %c0_i32_0 : i32, i32
  }
  func.func @transform_9(%arg0: i32, %arg1: memref<1xi32, #tpu.memory_space<smem>>) -> (i32, i32, i32) {
    %c0_i32 = arith.constant 0 : i32
    %c0_i32_0 = arith.constant 0 : i32
    %c0_i32_1 = arith.constant 0 : i32
    return %arg0, %c0_i32, %c0_i32_0 : i32, i32, i32
  }
  func.func @transform_10(%arg0: i32, %arg1: memref<1xi32, #tpu.memory_space<smem>>) -> (i32, i32, i32) {
    %c0_i32 = arith.constant 0 : i32
    %c0_i32_0 = arith.constant 0 : i32
    %c0_i32_1 = arith.constant 0 : i32
    return %arg0, %c0_i32, %c0_i32_0 : i32, i32, i32
  }
  func.func @transform_11(%arg0: i32, %arg1: memref<1xi32, #tpu.memory_space<smem>>) -> (i32, i32, i32) {
    %c0_i32 = arith.constant 0 : i32
    %c0_i32_0 = arith.constant 0 : i32
    %c0_i32_1 = arith.constant 0 : i32
    return %arg0, %c0_i32, %c0_i32_0 : i32, i32, i32
  }
}

</mosaic_0001>

<bundles_post_ra>
// kernel: tpu_custom_call.1
= control target key start
LH: loop header
LB: loop body
LE: loop exit
PB: predicated region body
PF: predicated region fallthrough
CT: control target
= control target key end

     0   :  { %s5013_s0 = inlined_call_operand.<no memory space> [shape: s32[1], index: 0, kind: input, shape index: {}]   ;;  %s5014_s1 = inlined_call_operand.vmem [shape: f32[2,96,32], index: 1, kind: input, shape index: {}]   ;;  %s5015_s2 = inlined_call_operand.vmem [shape: f32[32,192], index: 2, kind: input, shape index: {}]   ;;  %s5016_s3 = inlined_call_operand.vmem [shape: f32[1,192], index: 3, kind: input, shape index: {}]   ;;  %s5017_s4 = inlined_call_operand.vmem [shape: f32[32,96], index: 4, kind: input, shape index: {}]   ;;  %s5018_s5 = inlined_call_operand.vmem [shape: f32[1,96], index: 5, kind: input, shape index: {}]   ;;  %s5019_s6 = inlined_call_operand.vmem [shape: f32[32,96], index: 6, kind: input, shape index: {}]   ;;  %s5020_s7 = inlined_call_operand.vmem [shape: f32[1,96], index: 7, kind: input, shape index: {}]   ;;  %s5021_s8 = inlined_call_operand.vmem [shape: f32[64,32], index: 8, kind: input, shape index: {}]   ;;  %s5022_s9 = inlined_call_operand.vmem [shape: f32[1,32], index: 9, kind: input, shape index: {}]   ;;  %s5023_s10 = inlined_call_operand.vmem [shape: f32[2,96,64], index: 10, kind: output, shape index: {0}]   ;;  %s5024_s11 = inlined_call_operand.hbm [shape: f32[2,8,64], index: 11, kind: output, shape index: {1}]   ;;  %s5025_s12 = inlined_call_operand.hbm [shape: f32[2,8,32], index: 12, kind: output, shape index: {2}]  }
   0x1   :  { %5047 = sst [smem:[#allocation18_spill]] %s5014_s1 }
   0x2   :  { %5048 = sst [smem:[#allocation19_spill]] %s5015_s2 }
   0x3   :  { %5049 = sst [smem:[#allocation20_spill]] %s5016_s3 }
   0x4   :  { %5050 = sst [smem:[#allocation21_spill]] %s5017_s4 }
   0x5   :  { %5051 = sst [smem:[#allocation22_spill]] %s5018_s5 }
   0x6   :  { %5052 = sst [smem:[#allocation23_spill]] %s5019_s6 }
   0x7   :  { %5053 = sst [smem:[#allocation24_spill]] %s5020_s7 }
   0x8   :  { %5054 = sst [smem:[#allocation25_spill]] %s5021_s8 }
   0x9   :  { %5055 = sst [smem:[#allocation26_spill]] %s5022_s9 }
   0xa   :  { %5056 = sst [smem:[#allocation27_spill]] %s5023_s10 }
   0xb   :  { %18 = sst [smem:[#allocation4]] %s5013_s0 }
   0xc   :  { %19 = vsyncpa [#allocation6], 0 }
   0xd   :  { %21 = vsyncpa [#allocation6 + $0x1], 0 }
   0xe   :  { %22 = vsyncpa [#allocation8], 0 }
   0xf   :  { %24 = vsyncpa [#allocation8 + $0x1], 0  ;;  %s3720_s23 = smov 0   ;;  %s3722_s24 = smov 0  }
  0x10   :  { %s3724_s25 = smov 0   ;;  %s3726_s26 = smov 0  }
  0x11 LB: > { %5057 = sst [smem:[#allocation11_spill]] %s3634_s23  ;;  %s3741_s0 = sadd.s32 4294967295, %s3646_s26   ;;  %s3646_s26 = sphi %s3726_s26, %s5115_s26   ;;  %s3642_s25 = sphi %s3724_s25, %s5118_s25   ;;  %s3638_s24 = sphi %s3722_s24, %s5117_s24   ;;  %s3634_s23 = sphi %s3720_s23, %s5116_s23  }
  0x12   : > { %5058 = sst [smem:[#allocation12_spill]] %s3638_s24  ;;  %s3107_s27 = sadd.s32 4294967294, %s3646_s26  }
  0x13   : > { %5059 = sst [smem:[#allocation13_spill]] %s3642_s25  ;;  %s3745_s28 = sadd.s32 1, %s3646_s26  }
  0x14   : > { %5060 = sst [smem:[#allocation14_spill]] %s3646_s26  ;;  %s257_s29 = sadd.s32 1, %s3642_s25 }
  0x15   : > { %5061 = sst [smem:[#allocation15_spill]] %s3745_s28  ;;  %s254_s30 = ssub.s32 %s3646_s26, %s3745_s28 }
  0x16   : > { %p267_p0 = scmp.ne.s32.totalorder %s3642_s25, %s3638_s24  ;;  %p255_p1 = scmp.eq.s32.totalorder %s254_s30, 0 }
  0x17   : > { %p268_p2 = scmp.eq.s32.totalorder %s3741_s0, 1  ;;  %p273_p3 = scmp.ne.s32.totalorder %s3638_s24, %s3634_s23 }
  0x18   : > { %p274_p4 = scmp.eq.s32.totalorder %s3107_s27, 1  ;;  %p3110_p7 = scmp.ge.s32.totalorder %s3646_s26, 1 }
  0x19   : > { %s3756_s13 = scalar_select %p255_p1, %s3642_s25, %s257_s29  }
  0x1a   : > { %p3758_p5 = por %p268_p2, %p267_p0  ;;  %p3762_p6 = por %p274_p4, %p273_p3 }
  0x1b   : > { %5062 = sst [smem:[#allocation16_spill]] %s3756_s13  ;;  %p350_p8 = scmp.lt.s32.totalorder %s3646_s26, 3 }
  0x1c   : > { %s5064_s15 = scalar_select %p3762_p6, 1, 0 }
  0x1d   : > { %p351_p9 = pnand %p3110_p7, %p350_p8 }
  0x1e   : > { %5065 = sst [smem:[#allocation17_spill]] %s5064_s15  ;;  %p400_p10 = scmp.lt.s32.totalorder (!%p351_p9), %s3741_s0, 1 }
  0x1f   : > { %354 = sbr.rel (%p351_p9) target bundleno = 7043 (0x1b83), region = 56  ;;  %s5066_s2 = sld [smem:[#allocation19_spill]] (!%p351_p9) }
  0x20   : > { %s5067_s4 = sld [smem:[#allocation21_spill]] (!%p351_p9)  ;;  %s5028_s22 = smov (!%p351_p9), 96  }
  0x21   : > { %s5068_s6 = sld [smem:[#allocation23_spill]] (!%p351_p9)  ;;  %s5026_s30 = smov (!%p351_p9), 32  }
  0x22   : > { %s5069_s1 = sld [smem:[#allocation18_spill]] (!%p351_p9) }
  0x23   : > { %s5070_s3 = sld [smem:[#allocation20_spill]] (!%p351_p9) }
  0x24   : > { %s3807_s29 = scalar_select %p400_p10, %s3741_s0, 1  ;;  %vm437_vm0 = vcmask 261120   ;;  %v3648_v17 = vmov 0.0   ;;  %vm5038_vm1 = vcmask 523264  }
  0x25   : > { %v429_v0 = vld [vmem:[%s5066_s2 + $0x30] sm:$0xff]  ;;  %v430_v1 = vld [vmem:[%s5066_s2 + $0x38] sm:$0xff]  ;;  %v427_v4 = vld [vmem:[%s5066_s2 + $0x20] sm:$0xff]  ;;  %s5071_s5 = sld [smem:[#allocation22_spill]] }
  0x26   : > { %v3777_v2 = vld [vmem:[%s5067_s4 + $0x18] sm:$0xff]  ;;  %486 = vmatpush.msra.mxu0 %v429_v0  ;;  %539 = vmatpush.msra.mxu1 %v430_v1  ;;  %v428_v5 = vld [vmem:[%s5066_s2 + $0x28] sm:$0xff]  ;;  %v3796_v6 = vld [vmem:[%s5067_s4 + $0x10] sm:$0xff]  ;;  %s3287_s18 = smul.u32 96, %s3807_s29  ;;  %s5072_s7 = sld [smem:[#allocation24_spill]] }
  0x27   : > { %v3783_v3 = vld [vmem:[%s5068_s6 + $0x18] sm:$0xff]  ;;  %638 = vmatpush.msra.mxu2 %v3777_v2  ;;  %v3801_v7 = vld [vmem:[%s5068_s6 + $0x10] sm:$0xff]  ;;  %v3815_v10 = vld [vmem:[%s5067_s4 + $0x8] sm:$0xff]  ;;  %s3975_s16 = sld [smem:[#allocation4]]  ;;  %s5076_s29 = smov 32  }
  0x28   : > { %711 = vmatpush.msra.mxu3 %v3783_v3  ;;  %v425_v8 = vld [vmem:[%s5066_s2 + $0x10] sm:$0xff]  ;;  %487 = vmatpush.msra.mxu0 %v427_v4  ;;  %v426_v9 = vld [vmem:[%s5066_s2 + $0x18] sm:$0xff]  ;;  %v3820_v11 = vld [vmem:[%s5068_s6 + $0x8] sm:$0xff]  ;;  %s3848_s27 = scalar_lea.vmem %s5069_s1, %s3287_s18  ;;  %s5075_s10 = sld [smem:[#allocation27_spill]] }
  0x29   : > { %540 = vmatpush.msra.mxu1 %v428_v5  ;;  %639 = vmatpush.msra.mxu2 %v3796_v6  ;;  %v423_v12 = vld [vmem:[%s5066_s2] sm:$0xff]  ;;  %v424_v13 = vld [vmem:[%s5066_s2 + $0x8] sm:$0xff]  ;;  %v413_v19 = vld [vmem:[%s3848_s27 + $0x10] sm:$0xff]  ;;  %s5101_s8 = sld [smem:[#allocation25_spill]] }
  0x2a   : > { %712 = vmatpush.msra.mxu3 %v3801_v7  ;;  %v3833_v14 = vld [vmem:[%s5067_s4] sm:$0xff]  ;;  %488 = vmatpush.msra.mxu0 %v425_v8  ;;  %v412_v18 = vld [vmem:[%s3848_s27 + $0x8] sm:$0xff]  ;;  %v414_v20 = vld [vmem:[%s3848_s27 + $0x18] sm:$0xff] }
  0x2b   : > { %541 = vmatpush.msra.mxu1 %v426_v9  ;;  %v3839_v15 = vld [vmem:[%s5068_s6] sm:$0xff]  ;;  %640 = vmatpush.msra.mxu2 %v3815_v10  ;;  %v416_v22 = vld [vmem:[%s3848_s27 + $0x28] sm:$0xff]  ;;  %v417_v23 = vld [vmem:[%s3848_s27 + $0x30] sm:$0xff] }
  0x2c   : > { %713 = vmatpush.msra.mxu3 %v3820_v11  ;;  %489 = vmatpush.msra.mxu0 %v423_v12  ;;  %v411_v16 = vld [vmem:[%s3848_s27] sm:$0xff]  ;;  %v418_v24 = vld [vmem:[%s3848_s27 + $0x38] sm:$0xff]  ;;  %v420_v26 = vld [vmem:[%s3848_s27 + $0x48] sm:$0xff] }
  0x2d   : > { %542 = vmatpush.msra.mxu1 %v424_v13  ;;  %641 = vmatpush.msra.mxu2 %v3833_v14  ;;  %v415_v21 = vld [vmem:[%s3848_s27 + $0x20] sm:$0xff]  ;;  %v421_v27 = vld [vmem:[%s3848_s27 + $0x50] sm:$0xff]  ;;  %v422_v28 = vld [vmem:[%s3848_s27 + $0x58] sm:$0xff]  ;;  %s3140_s17 = sadd.s32 4294967295, %s3975_s16  ;;  %p615_p12 = scmp.gt.s32.totalorder %s3975_s16, 0 }
  0x2e   : > { %714 = vmatpush.msra.mxu3 %v3839_v15  ;;  %3115 = vmatmul.msk.f32.vlgmr.msra.gmra.mxu0 %vm437_vm0, %v411_v16  ;;  %v419_v25 = vld [vmem:[%s3848_s27 + $0x40] sm:$0xff]  ;;  %s5030_s27 = smov 64   ;;  %p686_p11 = scmp.gt.s32.totalorder %s3140_s17, 0 }
  0x2f   : > { %3127 = vmatmul.msk.f32.vlgmr.msra.gmra.mxu1 %vm437_vm0, %v411_v16  ;;  %642 = vmatmul.f32.vlgmr.msra.gmra.mxu2 %v3648_v17  ;;  %v431_v29 = vld [vmem:[%s5070_s3] sm:$0x3]  ;;  %p800_p0 = scmp.gt.s32.totalorder %s3975_s16, 1  ;;  %p982_p2 = scmp.gt.s32.totalorder %s3975_s16, 2 }
  0x30   : > { %715 = vmatmul.f32.vlgmr.msra.gmra.mxu3 %v3648_v17  ;;  %819 = vmatpush.msrb.mxu2 %v3777_v2  ;;  %v3907_v30 = vperm.slane %v431_v29, 0  ;;  %v3909_v31 = vperm.slane %v431_v29, 1  ;;  %v3920_v36 = vld [vmem:[%s5071_s5] ss:$0 sm:$0xff]  ;;  %s5120_s17 = smov (!%p686_p11, %s3140_s17), 0  ;;  %p1168_p4 = scmp.gt.s32.totalorder %s3975_s16, 3 }
  0x31   : > { %891 = vmatpush.msrb.mxu3 %v3783_v3  ;;  %v3925_v37 = vld [vmem:[%s5072_s7] ss:$0 sm:$0xff]  ;;  %s3141_s19 = sshll.u32 %s5120_s17, 3  ;;  %p1354_p8 = scmp.gt.s32.totalorder %s3975_s16, 4 }
  0x32   : > { %820 = vmatpush.msrb.mxu2 %v3796_v6  ;;  %s689_s20 = sshra.s32 %s3141_s19, 3  ;;  %p1540_p10 = scmp.gt.s32.totalorder %s3975_s16, 5 }
  0x33   : > { %892 = vmatpush.msrb.mxu3 %v3801_v7  ;;  %s3275_s21 = sshll.u32 %s689_s20, 4  ;;  %s3226_s23 = sadd.s32 4294967287, %s3975_s16 }
  0x34   : > { %821 = vmatpush.msrb.mxu2 %v3815_v10  ;;  %s781_s19 = scalar_select %p615_p12, 1, 0 }
  0x35   : > { %893 = vmatpush.msrb.mxu3 %v3820_v11  ;;  %s5144_s17 = smov (!%p615_p12, %s5120_s17), 0 }
  0x36   : > { %3116 = vmatmul.msk.f32.gmra.mxu0 %vm437_vm0, %v412_v18  ;;  %822 = vmatpush.msrb.mxu2 %v3833_v14 }
  0x37   : > { %3128 = vmatmul.msk.f32.gmra.mxu1 %vm437_vm0, %v412_v18  ;;  %894 = vmatpush.msrb.mxu3 %v3839_v15 }
  0x38   : > { %1004 = vmatpush.msra.mxu2 %v3777_v2 }
  0x39   : > { %1077 = vmatpush.msra.mxu3 %v3783_v3 }
  0x3a   : > { %1005 = vmatpush.msra.mxu2 %v3796_v6 }
  0x3b   : > { %1078 = vmatpush.msra.mxu3 %v3801_v7 }
  0x3c   : > { %1006 = vmatpush.msra.mxu2 %v3815_v10 }
  0x3d   : > { %1079 = vmatpush.msra.mxu3 %v3820_v11 }
  0x3e   : > { %3117 = vmatmul.msk.f32.gmra.mxu0 %vm437_vm0, %v413_v19  ;;  %1007 = vmatpush.msra.mxu2 %v3833_v14 }
  0x3f   : > { %3129 = vmatmul.msk.f32.gmra.mxu1 %vm437_vm0, %v413_v19  ;;  %1080 = vmatpush.msra.mxu3 %v3839_v15 }
  0x46   : > { %3118 = vmatmul.msk.f32.gmra.mxu0 %vm437_vm0, %v414_v20 }
  0x47   : > { %3130 = vmatmul.msk.f32.gmra.mxu1 %vm437_vm0, %v414_v20 }
  0x4e   : > { %3119 = vmatmul.msk.f32.gmra.mxu0 %vm437_vm0, %v415_v21 }
  0x4f   : > { %3131 = vmatmul.msk.f32.gmra.mxu1 %vm437_vm0, %v415_v21 }
  0x56   : > { %3120 = vmatmul.msk.f32.gmra.mxu0 %vm437_vm0, %v416_v22 }
  0x57   : > { %3132 = vmatmul.msk.f32.gmra.mxu1 %vm437_vm0, %v416_v22 }
  0x5e   : > { %3121 = vmatmul.msk.f32.gmra.mxu0 %vm437_vm0, %v417_v23 }
  0x5f   : > { %3133 = vmatmul.msk.f32.gmra.mxu1 %vm437_vm0, %v417_v23 }
  0x66   : > { %3122 = vmatmul.msk.f32.gmra.mxu0 %vm437_vm0, %v418_v24 }
  0x67   : > { %3134 = vmatmul.msk.f32.gmra.mxu1 %vm437_vm0, %v418_v24 }
  0x6e   : > { %3123 = vmatmul.msk.f32.gmra.mxu0 %vm437_vm0, %v419_v25 }
  0x6f   : > { %3135 = vmatmul.msk.f32.gmra.mxu1 %vm437_vm0, %v419_v25 }
  0x76   : > { %3124 = vmatmul.msk.f32.gmra.mxu0 %vm437_vm0, %v420_v26 }
  0x77   : > { %3136 = vmatmul.msk.f32.gmra.mxu1 %vm437_vm0, %v420_v26 }
  0x7e   : > { %3125 = vmatmul.msk.f32.gmra.mxu0 %vm437_vm0, %v421_v27 }
  0x7f   : > { %3137 = vmatmul.msk.f32.gmra.mxu1 %vm437_vm0, %v421_v27 }
  0x86   : > { %3126 = vmatmul.msk.f32.gmra.mxu0 %vm437_vm0, %v422_v28 }
  0x87   : > { %3138 = vmatmul.msk.f32.gmra.mxu1 %vm437_vm0, %v422_v28 }
  0xab   : > { %v491_v32 = vpop.f32.mrf.mxu0 }
  0xac   : > { %v544_v33 = vpop.f32.mrf.mxu1  ;;  %v3912_v34 = vadd.f32 %v491_v32, %v3907_v30 }
  0xad   : > { %v545_v35 = vadd.f32 %v544_v33, %v3909_v31 }
  0xae   : > { %580 = vst [vmem:[#allocation2] sm:$0xff] %v3912_v34 }
  0xaf   : > { %582 = vst.msk [vmem:[#allocation2 + $0x8] sm:$0xff] %vm5038_vm1, %v545_v35 }
  0xb2   : > { %v643_v38 = vpop.f32.mrf.mxu2 }
  0xb3   : > { %v716_v39 = vpop.f32.mrf.mxu3  ;;  %v644_v40 = vadd.f32 %v3920_v36, %v643_v38  ;;  %v494_v42 = vpop.f32.mrf.mxu0 }
  0xb4   : > { %v717_v41 = vadd.f32 %v3925_v37, %v716_v39  ;;  %v547_v43 = vpop.f32.mrf.mxu1  ;;  %v3930_v44 = vadd.f32 %v494_v42, %v3907_v30 }
  0xb5   : > { %v548_v45 = vadd.f32 %v547_v43, %v3909_v31  ;;  %667 = vrot.lane.b32.xlu0 %v644_v40, %s5030_s27  ;;  %v646_v22 = vadd.f32 %v644_v40, %v3912_v34 }
  0xb6   : > { %720 = vrot.lane.b32.xlu1 %v717_v41, %s5028_s22  ;;  %583 = vst [vmem:[#allocation2 + $0x10] sm:$0xff] %v3930_v44  ;;  %763 = vrot.lane.b32.xlu2 %v717_v41, %s5026_s30  ;;  %s3981_s30 = scalar_lea.vmem [#allocation2], %s3275_s21  ;;  %s4018_s21 = scalar_lea.vmem %s5075_s10, %s3287_s18 }
  0xb7   : > { %584 = vst.msk [vmem:[#allocation2 + $0x18] sm:$0xff] %vm5038_vm1, %v548_v45  ;;  %v3139_v23 = vmul.f32 -1.442695, %v646_v22  ;;  %s3149_s18 = sadd.s32 4294967294, %s3975_s16  ;;  %s3182_s10 = sadd.s32 4294967291, %s3975_s16 }
  0xb8   : > { %p867_p13 = scmp.gt.s32.totalorder %s3149_s18, 0  ;;  %p1424_p7 = scmp.gt.s32.totalorder %s3182_s10, 0 }
  0xb9   : > { %3339 = vpow2.f32 %v3139_v23 }
  0xba   : > { %s5122_s18 = smov (!%p867_p13, %s3149_s18), 0  ;;  %s5128_s10 = smov (!%p1424_p7, %s3182_s10), 0 }
  0xbb   : > { %v497_v46 = vpop.f32.mrf.mxu0  ;;  %p1726_p13 = scmp.gt.s32.totalorder %s3975_s16, 6  ;;  %p2168_p7 = scmp.gt.s32.totalorder %s3226_s23, 0 }
  0xbc   : > { %v550_v47 = vpop.f32.mrf.mxu1  ;;  %v3939_v48 = vadd.f32 %v497_v46, %v3907_v30 }
  0xbd   : > { %v551_v49 = vadd.f32 %v550_v47, %v3909_v31  ;;  %s5136_s23 = smov (!%p2168_p7, %s3226_s23), 0 }
  0xbe   : > { %585 = vst [vmem:[#allocation2 + $0x20] sm:$0xff] %v3939_v48  ;;  %s3227_s15 = sshll.u32 %s5136_s23, 3 }
  0xbf   : > { %586 = vst.msk [vmem:[#allocation2 + $0x28] sm:$0xff] %vm5038_vm1, %v551_v49  ;;  %v3340_v32 = vpop.eup %3339 }
  0xc0   : > { %v650_v38 = vadd.f32 1.0, %v3340_v32 }
  0xc2   : > { %3341 = vrcp.f32 %v650_v38  ;;  %v662_v42 = vand.u32 2147483648, %v650_v38  ;;  %vm656_vm3 = vweird.f32 %v650_v38  ;;  %v660_v43 = vand.u32 2147483647, %v650_v38 }
  0xc3   : > { %v500_v50 = vpop.f32.mrf.mxu0 }
  0xc4   : > { %v553_v51 = vpop.f32.mrf.mxu1  ;;  %v3945_v52 = vadd.f32 %v500_v50, %v3907_v30  ;;  %v663_v46 = vor.u32 1.1754944e-38, %v662_v42  ;;  %vm661_vm5 = vcmp.eq.f32.partialorder %v660_v43, 8.507059e+37 }
  0xc5   : > { %v554_v53 = vadd.f32 %v553_v51, %v3909_v31 }
  0xc6   : > { %587 = vst [vmem:[#allocation2 + $0x30] sm:$0xff] %v3945_v52 }
  0xc7   : > { %588 = vst.msk [vmem:[#allocation2 + $0x38] sm:$0xff] %vm5038_vm1, %v554_v53 }
  0xc8   : > { %v3342_v39 = vpop.eup %3341 }
  0xc9   : > { %v652_v40 = vmul.f32 %v3342_v39, %v650_v38  ;;  %vm657_vm2 = vweird.f32 %v3342_v39 }
  0xca   : > { %vm658_vm4 = vmor %vm656_vm3, %vm657_vm2 }
  0xcb   : > { %v503_v54 = vpop.f32.mrf.mxu0  ;;  %v653_v41 = vsub.f32 1.0, %v652_v40 }
  0xcc   : > { %v556_v55 = vpop.f32.mrf.mxu1  ;;  %v504_v56 = vadd.f32 %v503_v54, %v3907_v30 }
  0xcd   : > { %v557_v57 = vadd.f32 %v556_v55, %v3909_v31 }
  0xce   : > { %589 = vst [vmem:[#allocation2 + $0x40] sm:$0xff] %v504_v56 }
  0xcf   : > { %590 = vst.msk [vmem:[#allocation2 + $0x48] sm:$0xff] %vm5038_vm1, %v557_v57 }
  0xd3   : > { %v506_v58 = vpop.f32.mrf.mxu0 }
  0xd4   : > { %v559_v59 = vpop.f32.mrf.mxu1  ;;  %v507_v60 = vadd.f32 %v506_v58, %v3907_v30 }
  0xd5   : > { %v560_v61 = vadd.f32 %v559_v59, %v3909_v31 }
  0xd6   : > { %591 = vst [vmem:[#allocation2 + $0x50] sm:$0xff] %v507_v60 }
  0xd7   : > { %592 = vst.msk [vmem:[#allocation2 + $0x58] sm:$0xff] %vm5038_vm1, %v560_v61 }
  0xdb   : > { %v509_v62 = vpop.f32.mrf.mxu0 }
  0xdc   : > { %v562_v63 = vpop.f32.mrf.mxu1  ;;  %v510_v0 = vadd.f32 %v509_v62, %v3907_v30 }
  0xdd   : > { %v563_v1 = vadd.f32 %v562_v63, %v3909_v31 }
  0xde   : > { %593 = vst [vmem:[#allocation2 + $0x60] sm:$0xff] %v510_v0 }
  0xdf   : > { %594 = vst.msk [vmem:[#allocation2 + $0x68] sm:$0xff] %vm5038_vm1, %v563_v1 }
  0xe3   : > { %v512_v4 = vpop.f32.mrf.mxu0 }
  0xe4   : > { %v565_v5 = vpop.f32.mrf.mxu1  ;;  %v513_v8 = vadd.f32 %v512_v4, %v3907_v30 }
  0xe5   : > { %v566_v9 = vadd.f32 %v565_v5, %v3909_v31 }
  0xe6   : > { %595 = vst [vmem:[#allocation2 + $0x70] sm:$0xff] %v513_v8 }
  0xe7   : > { %596 = vst.msk [vmem:[#allocation2 + $0x78] sm:$0xff] %vm5038_vm1, %v566_v9 }
  0xeb   : > { %v515_v12 = vpop.f32.mrf.mxu0 }
  0xec   : > { %v568_v13 = vpop.f32.mrf.mxu1  ;;  %v516_v16 = vadd.f32 %v515_v12, %v3907_v30 }
  0xed   : > { %v569_v17 = vadd.f32 %v568_v13, %v3909_v31 }
  0xee   : > { %597 = vst [vmem:[#allocation2 + $0x80] sm:$0xff] %v516_v16 }
  0xef   : > { %598 = vst.msk [vmem:[#allocation2 + $0x88] sm:$0xff] %vm5038_vm1, %v569_v17 }
  0xf3   : > { %v518_v18 = vpop.f32.mrf.mxu0 }
  0xf4   : > { %v571_v19 = vpop.f32.mrf.mxu1  ;;  %v519_v20 = vadd.f32 %v518_v18, %v3907_v30 }
  0xf5   : > { %v572_v21 = vadd.f32 %v571_v19, %v3909_v31 }
  0xf6   : > { %599 = vst [vmem:[#allocation2 + $0x90] sm:$0xff] %v519_v20 }
  0xf7   : > { %600 = vst.msk [vmem:[#allocation2 + $0x98] sm:$0xff] %vm5038_vm1, %v572_v21 }
  0xfb   : > { %v521_v24 = vpop.f32.mrf.mxu0 }
  0xfc   : > { %v574_v25 = vpop.f32.mrf.mxu1  ;;  %v522_v26 = vadd.f32 %v521_v24, %v3907_v30 }
  0xfd   : > { %v575_v27 = vadd.f32 %v574_v25, %v3909_v31  ;;  %v782_v25 = vstv %s781_s19  ;;  %s3150_s19 = sshll.u32 %s5122_s18, 3  ;;  %s5146_s18 = smov (!%p800_p0, %s5122_s18), 1 }
  0xfe   : > { %601 = vst [vmem:[#allocation2 + $0xa0] sm:$0xff] %v522_v26  ;;  %vm3993_vm10 = vcmp.eq.s32.totalorder %v782_v25, 1 }
  0xff   : > { %602 = vst.msk [vmem:[#allocation2 + $0xa8] sm:$0xff] %vm5038_vm1, %v575_v27 }
 0x103   : > { %v524_v28 = vpop.f32.mrf.mxu0 }
 0x104   : > { %v577_v29 = vpop.f32.mrf.mxu1  ;;  %v525_v33 = vadd.f32 %v524_v28, %v3907_v30  ;;  %v654_v30 = vmul.f32 %v3342_v39, %v653_v41 }
 0x105   : > { %v578_v35 = vadd.f32 %v577_v29, %v3909_v31 }
 0x106   : > { %603 = vst [vmem:[#allocation2 + $0xb0] sm:$0xff] %v525_v33  ;;  %v655_v31 = vadd.f32 %v3342_v39, %v654_v30 }
 0x107   : > { %604 = vst.msk [vmem:[#allocation2 + $0xb8] sm:$0xff] %vm5038_vm1, %v578_v35 }
 0x108   : > { %v659_v45 = vsel %vm658_vm4, %v3342_v39, %v655_v31 }
 0x109   : > { %v664_v51 = vsel %vm661_vm5, %v663_v46, %v659_v45 }
 0x10a   : > { %v683_v27 = vmul.f32 0.0, %v664_v51 }
 0x10e   : > { %v694_v49 = vld [vmem:[%s3981_s30] sm:$0xff]  ;;  %v695_v17 = vld [vmem:[%s3981_s30 + $0x8] sm:$0xff]  ;;  %s870_s30 = sshra.s32 %s3150_s19, 3  ;;  %s5077_s19 = smov 96  }
 0x10f   : > { %s3276_s20 = sshll.u32 %s870_s30, 4 }
 0x110   : > { %v764_v1 = vpop.permute.xlu2 %763  ;;  %s961_s30 = scalar_select %p800_p0, 1, 0 }
 0x127   : > { %v668_v50 = vpop.permute.xlu0 %667 }
 0x128   : > { %v721_v47 = vpop.permute.xlu1 %720  ;;  %v670_v54 = vmul.f32 %v668_v50, %v664_v51 }
 0x129   : > { %v723_v53 = vadd.f32 %v721_v47, %v694_v49  ;;  %v724_v21 = vadd.f32 %v721_v47, %v695_v17 }
 0x12a   : > { %672 = vrot.lane.b32.xlu0 %v670_v54, %s5030_s27 }
 0x12b   : > { %v3144_v55 = vmul.f32 -1.442695, %v723_v53  ;;  %v3145_v22 = vmul.f32 -1.442695, %v724_v21 }
 0x12d   : > { %3343 = vpow2.f32 %v3144_v55 }
 0x133   : > { %v3344_v56 = vpop.eup %3343 }
 0x134   : > { %v731_v57 = vadd.f32 1.0, %v3344_v56 }
 0x136   : > { %3345 = vrcp.f32 %v731_v57  ;;  %v744_v61 = vand.u32 2147483648, %v731_v57  ;;  %v742_v63 = vand.u32 2147483647, %v731_v57  ;;  %vm738_vm7 = vweird.f32 %v731_v57 }
 0x138   : > { %v745_v4 = vor.u32 1.1754944e-38, %v744_v61  ;;  %vm743_vm9 = vcmp.eq.f32.partialorder %v742_v63, 8.507059e+37 }
 0x13c   : > { %v3346_v58 = vpop.eup %3345 }
 0x13d   : > { %v734_v59 = vmul.f32 %v3346_v58, %v731_v57  ;;  %vm739_vm6 = vweird.f32 %v3346_v58 }
 0x13e   : > { %vm740_vm8 = vmor %vm738_vm7, %vm739_vm6 }
 0x13f   : > { %v735_v60 = vsub.f32 1.0, %v734_v59 }
 0x141   : > { %v736_v62 = vmul.f32 %v3346_v58, %v735_v60 }
 0x143   : > { %v737_v0 = vadd.f32 %v3346_v58, %v736_v62 }
 0x145   : > { %v741_v5 = vsel %vm740_vm8, %v3346_v58, %v737_v0 }
 0x146   : > { %v746_v8 = vsel %vm743_vm9, %v745_v4, %v741_v5 }
 0x147   : > { %v766_v9 = vmul.f32 %v764_v1, %v746_v8 }
 0x149   : > { %768 = vrot.lane.b32.xlu0 %v766_v9, %s5030_s27 }
 0x19c   : > { %v673_v12 = vpop.permute.xlu0 %672 }
 0x19d   : > { %v675_v13 = vadd.f32 %v673_v12, %v3912_v34  ;;  %v677_v34 = vsub.f32 1.0, %v664_v51 }
 0x19f   : > { %3347 = vtanh.f32 %v675_v13 }
 0x1a5   : > { %v3348_v16 = vpop.eup %3347 }
 0x1a6   : > { %679 = vrot.lane.b32.xlu1 %v3348_v16, %s5028_s22 }
 0x1bb   : > { %v769_v18 = vpop.permute.xlu0 %768 }
 0x1bc   : > { %v771_v19 = vadd.f32 %v769_v18, %v695_v17 }
 0x1be   : > { %3349 = vtanh.f32 %v771_v19 }
 0x1bf   : > { %3351 = vpow2.f32 %v3145_v22 }
 0x1c4   : > { %v3350_v20 = vpop.eup %3349 }
 0x1c5   : > { %775 = vrot.lane.b32.xlu1 %v3350_v20, %s5028_s22  ;;  %v3352_v23 = vpop.eup %3351 }
 0x1c6   : > { %v732_v24 = vadd.f32 1.0, %v3352_v23 }
 0x1c8   : > { %3353 = vrcp.f32 %v732_v24  ;;  %v759_v30 = vand.u32 2147483648, %v732_v24  ;;  %vm753_vm12 = vweird.f32 %v732_v24  ;;  %v757_v31 = vand.u32 2147483647, %v732_v24 }
 0x1ca   : > { %v760_v43 = vor.u32 1.1754944e-38, %v759_v30  ;;  %vm758_vm14 = vcmp.eq.f32.partialorder %v757_v31, 8.507059e+37 }
 0x1ce   : > { %v3354_v33 = vpop.eup %3353 }
 0x1cf   : > { %v749_v38 = vmul.f32 %v3354_v33, %v732_v24  ;;  %vm754_vm11 = vweird.f32 %v3354_v33 }
 0x1d0   : > { %vm755_vm13 = vmor %vm753_vm12, %vm754_vm11 }
 0x1d1   : > { %v750_v39 = vsub.f32 1.0, %v749_v38 }
 0x1d3   : > { %v751_v40 = vmul.f32 %v3354_v33, %v750_v39 }
 0x1d5   : > { %v752_v41 = vadd.f32 %v3354_v33, %v751_v40 }
 0x1d7   : > { %v756_v42 = vsel %vm755_vm13, %v3354_v33, %v752_v41 }
 0x1d8   : > { %v761_v45 = vsel %vm758_vm14, %v760_v43, %v756_v42  ;;  %v962_v43 = vstv %s961_s30 }
 0x1d9   : > { %v773_v46 = vsub.f32 1.0, %v761_v45  ;;  %v779_v49 = vmul.f32 0.0, %v761_v45  ;;  %vm4048_vm9 = vcmp.eq.s32.totalorder %v962_v43, 1 }
 0x218   : > { %v680_v26 = vpop.permute.xlu1 %679 }
 0x219   : > { %v682_v28 = vmul.f32 %v680_v26, %v677_v34 }
 0x21b   : > { %v684_v32 = vadd.f32 %v683_v27, %v682_v28 }
 0x21d   : > { %v3999_v35 = vsel %vm3993_vm10, %v684_v32, 0.0 }
 0x21e   : > { %786 = vrot.lane.b32.xlu2 %v3999_v35, %s5028_s22 }
 0x237   : > { %v776_v47 = vpop.permute.xlu1 %775 }
 0x238   : > { %v778_v50 = vmul.f32 %v776_v47, %v773_v46 }
 0x23a   : > { %v780_v51 = vadd.f32 %v779_v49, %v778_v50  ;;  %v2853_v49 = vld [vmem:[%s5101_s8 + $0x8] sm:$0xff] }
 0x23c   : > { %v4005_v53 = vsel %vm3993_vm10, %v780_v51, 0.0 }
 0x23d   : > { %3153 = vmatmul.msk.f32.vlgmr.msrb.gmra.mxu3 %vm437_vm0, %v4005_v53 }
 0x23e   : > { %1263 = vmatpush.msrb.mxu3 %v3783_v3 }
 0x240   : > { %1264 = vmatpush.msrb.mxu3 %v3801_v7 }
 0x242   : > { %1265 = vmatpush.msrb.mxu3 %v3820_v11 }
 0x244   : > { %1266 = vmatpush.msrb.mxu3 %v3839_v15 }
 0x278   : > { %v787_v54 = vpop.permute.xlu2 %786 }
 0x279   : > { %789 = vst.msk [vmem:[%s4018_s21] sm:$0xff] %vm437_vm0, %v787_v54  ;;  %3147 = vmatmul.msk.f32.vlgmr.msrb.gmra.mxu2 %vm437_vm0, %v787_v54 }
 0x27a   : > { %1190 = vmatpush.msrb.mxu2 %v3777_v2 }
 0x27c   : > { %1191 = vmatpush.msrb.mxu2 %v3796_v6 }
 0x27e   : > { %1192 = vmatpush.msrb.mxu2 %v3815_v10 }
 0x280   : > { %1193 = vmatpush.msrb.mxu2 %v3833_v14 }
 0x2c0   : > { %v896_v55 = vpop.f32.mrf.mxu3 }
 0x2c1   : > { %v897_v56 = vadd.f32 %v3925_v37, %v896_v55 }
 0x2c3   : > { %900 = vrot.lane.b32.xlu1 %v897_v56, %s5028_s22  ;;  %s4038_s22 = scalar_lea.vmem [#allocation2], %s3276_s20 }
 0x2c4   : > { %v875_v20 = vld [vmem:[%s4038_s22] sm:$0xff]  ;;  %v876_v54 = vld [vmem:[%s4038_s22 + $0x8] sm:$0xff]  ;;  %s3160_s22 = sadd.s32 4294967293, %s3975_s16 }
 0x2c5   : > { %p1052_p1 = scmp.gt.s32.totalorder %s3160_s22, 0 }
 0x2c7   : > { %s5124_s22 = smov (!%p1052_p1, %s3160_s22), 0 }
 0x2c8   : > { %s3161_s20 = sshll.u32 %s5124_s22, 3 }
 0x2c9   : > { %s1055_s30 = sshra.s32 %s3161_s20, 3 }
 0x2ca   : > { %s3277_s1 = sshll.u32 %s1055_s30, 4  ;;  %s5082_s30 = smov 64  }
 0x2cb   : > { %s4095_s2 = scalar_lea.vmem [#allocation2], %s3277_s1 }
 0x2cc   : > { %s1147_s1 = scalar_select %p982_p2, 1, 0 }
 0x2fc   : > { %v824_v57 = vpop.f32.mrf.mxu2 }
 0x2fd   : > { %v825_v58 = vadd.f32 %v3920_v36, %v824_v57 }
 0x2ff   : > { %848 = vrot.lane.b32.xlu2 %v825_v58, %s5030_s27  ;;  %v827_v59 = vadd.f32 %v825_v58, %v3930_v44 }
 0x301   : > { %v3148_v60 = vmul.f32 -1.442695, %v827_v59 }
 0x303   : > { %3355 = vpow2.f32 %v3148_v60 }
 0x309   : > { %v3356_v61 = vpop.eup %3355 }
 0x30a   : > { %v831_v62 = vadd.f32 1.0, %v3356_v61 }
 0x30c   : > { %3357 = vrcp.f32 %v831_v62  ;;  %v843_v8 = vand.u32 2147483648, %v831_v62  ;;  %vm837_vm2 = vweird.f32 %v831_v62  ;;  %v841_v9 = vand.u32 2147483647, %v831_v62 }
 0x30e   : > { %v844_v13 = vor.u32 1.1754944e-38, %v843_v8  ;;  %vm842_vm4 = vcmp.eq.f32.partialorder %v841_v9, 8.507059e+37 }
 0x312   : > { %v3358_v63 = vpop.eup %3357 }
 0x313   : > { %v833_v0 = vmul.f32 %v3358_v63, %v831_v62  ;;  %vm838_vm15 = vweird.f32 %v3358_v63 }
 0x314   : > { %vm839_vm3 = vmor %vm837_vm2, %vm838_vm15 }
 0x315   : > { %v834_v1 = vsub.f32 1.0, %v833_v0 }
 0x317   : > { %v835_v4 = vmul.f32 %v3358_v63, %v834_v1 }
 0x319   : > { %v836_v5 = vadd.f32 %v3358_v63, %v835_v4 }
 0x31b   : > { %v840_v12 = vsel %vm839_vm3, %v3358_v63, %v836_v5 }
 0x31c   : > { %v845_v17 = vsel %vm842_vm4, %v844_v13, %v840_v12 }
 0x31d   : > { %v864_v46 = vmul.f32 %v845_v17, %v3999_v35 }
 0x335   : > { %v901_v19 = vpop.permute.xlu1 %900 }
 0x336   : > { %v903_v21 = vadd.f32 %v901_v19, %v875_v20  ;;  %v904_v58 = vadd.f32 %v901_v19, %v876_v54 }
 0x338   : > { %v3154_v22 = vmul.f32 -1.442695, %v903_v21  ;;  %v3155_v60 = vmul.f32 -1.442695, %v904_v58 }
 0x33a   : > { %3359 = vpow2.f32 %v3154_v22 }
 0x340   : > { %v3360_v23 = vpop.eup %3359 }
 0x341   : > { %v911_v24 = vadd.f32 1.0, %v3360_v23 }
 0x343   : > { %3361 = vrcp.f32 %v911_v24  ;;  %v924_v33 = vand.u32 2147483648, %v911_v24  ;;  %vm918_vm6 = vweird.f32 %v911_v24  ;;  %v922_v38 = vand.u32 2147483647, %v911_v24 }
 0x345   : > { %v925_v40 = vor.u32 1.1754944e-38, %v924_v33  ;;  %vm923_vm8 = vcmp.eq.f32.partialorder %v922_v38, 8.507059e+37 }
 0x349   : > { %v3362_v34 = vpop.eup %3361 }
 0x34a   : > { %v914_v25 = vmul.f32 %v3362_v34, %v911_v24  ;;  %vm919_vm5 = vweird.f32 %v3362_v34 }
 0x34b   : > { %vm920_vm7 = vmor %vm918_vm6, %vm919_vm5 }
 0x34c   : > { %v915_v26 = vsub.f32 1.0, %v914_v25 }
 0x34e   : > { %v916_v27 = vmul.f32 %v3362_v34, %v915_v26 }
 0x350   : > { %v917_v32 = vadd.f32 %v3362_v34, %v916_v27 }
 0x352   : > { %v921_v39 = vsel %vm920_vm7, %v3362_v34, %v917_v32 }
 0x353   : > { %v926_v41 = vsel %vm923_vm8, %v925_v40, %v921_v39  ;;  %v1060_v40 = vld [vmem:[%s4095_s2] sm:$0xff] }
 0x359   : > { %v849_v16 = vpop.permute.xlu2 %848 }
 0x35a   : > { %v851_v18 = vmul.f32 %v849_v16, %v845_v17 }
 0x35c   : > { %853 = vrot.lane.b32.xlu0 %v851_v18, %s5030_s27 }
 0x364   : > { %943 = vrot.lane.b32.xlu0 %v897_v56, %s5076_s29 }
 0x3ce   : > { %v854_v28 = vpop.permute.xlu0 %853 }
 0x3cf   : > { %v856_v29 = vadd.f32 %v854_v28, %v3930_v44  ;;  %v858_v44 = vsub.f32 1.0, %v845_v17 }
 0x3d1   : > { %3363 = vtanh.f32 %v856_v29 }
 0x3d6   : > { %v944_v30 = vpop.permute.xlu0 %943 }
 0x3d7   : > { %v3364_v31 = vpop.eup %3363  ;;  %v946_v42 = vmul.f32 %v944_v30, %v926_v41 }
 0x3d8   : > { %860 = vrot.lane.b32.xlu2 %v3364_v31, %s5077_s19 }
 0x3d9   : > { %948 = vrot.lane.b32.xlu1 %v946_v42, %s5030_s27 }
 0x432   : > { %v861_v45 = vpop.permute.xlu2 %860 }
 0x433   : > { %v863_v47 = vmul.f32 %v861_v45, %v858_v44 }
 0x435   : > { %v4052_v50 = vadd.f32 %v864_v46, %v863_v47 }
 0x437   : > { %v4058_v51 = vsel %vm4048_vm9, %v4052_v50, %v3999_v35 }
 0x438   : > { %988 = vrot.lane.b32.xlu2 %v4058_v51, %s5077_s19 }
 0x44b   : > { %v949_v55 = vpop.permute.xlu1 %948 }
 0x44c   : > { %v951_v56 = vadd.f32 %v949_v55, %v876_v54 }
 0x44e   : > { %3365 = vtanh.f32 %v951_v56 }
 0x44f   : > { %3367 = vpow2.f32 %v3155_v60 }
 0x454   : > { %v3366_v57 = vpop.eup %3365 }
 0x455   : > { %955 = vrot.lane.b32.xlu0 %v3366_v57, %s5077_s19  ;;  %v3368_v35 = vpop.eup %3367 }
 0x456   : > { %v912_v61 = vadd.f32 1.0, %v3368_v35 }
 0x458   : > { %3369 = vrcp.f32 %v912_v61  ;;  %v939_v5 = vand.u32 2147483648, %v912_v61  ;;  %vm933_vm11 = vweird.f32 %v912_v61 }
 0x45e   : > { %v3370_v62 = vpop.eup %3369 }
 0x45f   : > { %v929_v63 = vmul.f32 %v3370_v62, %v912_v61  ;;  %vm934_vm10 = vweird.f32 %v3370_v62 }
 0x460   : > { %vm935_vm12 = vmor %vm933_vm11, %vm934_vm10 }
 0x461   : > { %v930_v0 = vsub.f32 1.0, %v929_v63 }
 0x463   : > { %v931_v1 = vmul.f32 %v3370_v62, %v930_v0 }
 0x465   : > { %v932_v4 = vadd.f32 %v3370_v62, %v931_v1  ;;  %v1148_v1 = vstv %s1147_s1  ;;  %s3171_s1 = sadd.s32 4294967292, %s3975_s16 }
 0x466   : > { %vm4105_vm8 = vcmp.eq.s32.totalorder %v1148_v1, 1  ;;  %p1238_p3 = scmp.gt.s32.totalorder %s3171_s1, 0 }
 0x467   : > { %v936_v8 = vsel %vm935_vm12, %v3370_v62, %v932_v4 }
 0x468   : > { %s5126_s1 = smov (!%p1238_p3, %s3171_s1), 0  ;;  %p5046_p3 = scmp.gt.s32.totalorder %s3975_s16, 7 }
 0x469   : > { %s3172_s3 = sshll.u32 %s5126_s1, 3 }
 0x492   : > { %v989_v59 = vpop.permute.xlu2 %988 }
 0x493   : > { %3158 = vmatmul.msk.f32.vlgmr.msra.gmra.mxu2 %vm437_vm0, %v989_v59 }
 0x494   : > { %1376 = vmatpush.msra.mxu2 %v3777_v2  ;;  %v937_v2 = vand.u32 2147483647, %v912_v61 }
 0x496   : > { %1377 = vmatpush.msra.mxu2 %v3796_v6  ;;  %v940_v6 = vor.u32 1.1754944e-38, %v939_v5  ;;  %vm938_vm13 = vcmp.eq.f32.partialorder %v937_v2, 8.507059e+37 }
 0x498   : > { %1378 = vmatpush.msra.mxu2 %v3815_v10  ;;  %v941_v10 = vsel %vm938_vm13, %v940_v6, %v936_v8 }
 0x499   : > { %v953_v9 = vsub.f32 1.0, %v941_v10 }
 0x49a   : > { %1379 = vmatpush.msra.mxu2 %v3833_v14  ;;  %v959_v14 = vmul.f32 %v941_v10, %v4005_v53  ;;  %v1061_v10 = vld [vmem:[%s4095_s2 + $0x8] sm:$0xff] }
 0x4c7   : > { %v956_v12 = vpop.permute.xlu0 %955 }
 0x4c8   : > { %v958_v13 = vmul.f32 %v956_v12, %v953_v9 }
 0x4ca   : > { %v4070_v16 = vadd.f32 %v959_v14, %v958_v13 }
 0x4cc   : > { %v4076_v17 = vsel %vm4048_vm9, %v4070_v16, %v4005_v53 }
 0x4cd   : > { %3164 = vmatmul.msk.f32.vlgmr.msra.gmra.mxu3 %vm437_vm0, %v4076_v17 }
 0x4ce   : > { %1449 = vmatpush.msra.mxu3 %v3783_v3 }
 0x4d0   : > { %1450 = vmatpush.msra.mxu3 %v3801_v7 }
 0x4d2   : > { %1451 = vmatpush.msra.mxu3 %v3820_v11 }
 0x4d4   : > { %1452 = vmatpush.msra.mxu3 %v3839_v15 }
 0x516   : > { %v1009_v18 = vpop.f32.mrf.mxu2 }
 0x517   : > { %v1010_v19 = vadd.f32 %v3920_v36, %v1009_v18 }
 0x519   : > { %1033 = vrot.lane.b32.xlu1 %v1010_v19, %s5030_s27  ;;  %v1012_v3 = vadd.f32 %v1010_v19, %v3939_v48 }
 0x51b   : > { %v3159_v22 = vmul.f32 -1.442695, %v1012_v3 }
 0x51d   : > { %3371 = vpow2.f32 %v3159_v22 }
 0x523   : > { %v3372_v7 = vpop.eup %3371 }
 0x524   : > { %v1016_v11 = vadd.f32 1.0, %v3372_v7 }
 0x526   : > { %3373 = vrcp.f32 %v1016_v11  ;;  %v1028_v27 = vand.u32 2147483648, %v1016_v11  ;;  %vm1022_vm15 = vweird.f32 %v1016_v11  ;;  %v1026_v28 = vand.u32 2147483647, %v1016_v11 }
 0x528   : > { %v1029_v32 = vor.u32 1.1754944e-38, %v1028_v27  ;;  %vm1027_vm3 = vcmp.eq.f32.partialorder %v1026_v28, 8.507059e+37 }
 0x52c   : > { %v3374_v23 = vpop.eup %3373 }
 0x52d   : > { %v1018_v24 = vmul.f32 %v3374_v23, %v1016_v11  ;;  %vm1023_vm14 = vweird.f32 %v3374_v23 }
 0x52e   : > { %vm1024_vm2 = vmor %vm1022_vm15, %vm1023_vm14 }
 0x52f   : > { %v1019_v34 = vsub.f32 1.0, %v1018_v24 }
 0x531   : > { %v1020_v25 = vmul.f32 %v3374_v23, %v1019_v34 }
 0x533   : > { %v1021_v26 = vadd.f32 %v3374_v23, %v1020_v25 }
 0x535   : > { %v1025_v29 = vsel %vm1024_vm2, %v3374_v23, %v1021_v26 }
 0x536   : > { %v1030_v33 = vsel %vm1027_vm3, %v1029_v32, %v1025_v29 }
 0x537   : > { %v1043_v0 = vsub.f32 1.0, %v1030_v33  ;;  %v1049_v5 = vmul.f32 %v1030_v33, %v4058_v51 }
 0x550   : > { %v1082_v20 = vpop.f32.mrf.mxu3 }
 0x551   : > { %v1083_v21 = vadd.f32 %v3925_v37, %v1082_v20 }
 0x553   : > { %1129 = vrot.lane.b32.xlu1 %v1083_v21, %s5076_s29  ;;  %1086 = vrot.lane.b32.xlu0 %v1083_v21, %s5077_s19 }
 0x58b   : > { %v1034_v38 = vpop.permute.xlu1 %1033 }
 0x58c   : > { %v1036_v39 = vmul.f32 %v1034_v38, %v1030_v33  ;;  %v4135_v38 = vld [vmem:[%s5068_s6 + $0x18] sm:$0xff] }
 0x58e   : > { %1038 = vrot.lane.b32.xlu2 %v1036_v39, %s5030_s27 }
 0x5c5   : > { %v1087_v41 = vpop.permute.xlu0 %1086  ;;  %v1130_v60 = vpop.permute.xlu1 %1129 }
 0x5c6   : > { %v1089_v30 = vadd.f32 %v1087_v41, %v1060_v40  ;;  %v1090_v13 = vadd.f32 %v1087_v41, %v1061_v10  ;;  %v4142_v40 = vld [vmem:[%s5068_s6 + $0x10] sm:$0xff]  ;;  %v4154_v41 = vld [vmem:[%s5068_s6 + $0x8] sm:$0xff] }
 0x5c8   : > { %v3165_v31 = vmul.f32 -1.442695, %v1089_v30  ;;  %v3166_v18 = vmul.f32 -1.442695, %v1090_v13  ;;  %v4160_v30 = vld [vmem:[%s5067_s4 + $0x10] sm:$0xff] }
 0x5ca   : > { %3375 = vpow2.f32 %v3165_v31  ;;  %v4167_v31 = vld [vmem:[%s5067_s4 + $0x8] sm:$0xff] }
 0x5d0   : > { %v3376_v42 = vpop.eup %3375 }
 0x5d1   : > { %v1097_v44 = vadd.f32 1.0, %v3376_v42  ;;  %v4173_v42 = vld [vmem:[%s5067_s4] sm:$0xff] }
 0x5d3   : > { %3377 = vrcp.f32 %v1097_v44  ;;  %v1110_v47 = vand.u32 2147483648, %v1097_v44  ;;  %v1108_v55 = vand.u32 2147483647, %v1097_v44  ;;  %vm1104_vm5 = vweird.f32 %v1097_v44 }
 0x5d5   : > { %v1111_v57 = vor.u32 1.1754944e-38, %v1110_v47  ;;  %vm1109_vm7 = vcmp.eq.f32.partialorder %v1108_v55, 8.507059e+37 }
 0x5d9   : > { %v3378_v43 = vpop.eup %3377 }
 0x5da   : > { %v1100_v45 = vmul.f32 %v3378_v43, %v1097_v44  ;;  %vm1105_vm4 = vweird.f32 %v3378_v43 }
 0x5db   : > { %vm1106_vm6 = vmor %vm1104_vm5, %vm1105_vm4 }
 0x5dc   : > { %v1101_v46 = vsub.f32 1.0, %v1100_v45 }
 0x5de   : > { %v1102_v54 = vmul.f32 %v3378_v43, %v1101_v46 }
 0x5e0   : > { %v1103_v56 = vadd.f32 %v3378_v43, %v1102_v54 }
 0x5e2   : > { %v1107_v58 = vsel %vm1106_vm6, %v3378_v43, %v1103_v56 }
 0x5e3   : > { %v1112_v59 = vsel %vm1109_vm7, %v1111_v57, %v1107_v58 }
 0x5e4   : > { %v1132_v35 = vmul.f32 %v1130_v60, %v1112_v59 }
 0x5e6   : > { %1134 = vrot.lane.b32.xlu0 %v1132_v35, %s5030_s27  ;;  %s1241_s27 = sshra.s32 %s3172_s3, 3 }
 0x5e7   : > { %s3278_s2 = sshll.u32 %s1241_s27, 4 }
 0x5e8   : > { %v1039_v61 = vpop.permute.xlu2 %1038  ;;  %s4186_s20 = scalar_lea.vmem [#allocation2], %s3278_s2  ;;  %s3193_s2 = sadd.s32 4294967290, %s3975_s16 }
 0x5e9   : > { %v1041_v62 = vadd.f32 %v1039_v61, %v3939_v48  ;;  %s1333_s3 = scalar_select %p1168_p4, 1, 0 }
 0x5ea   : > { %p1610_p9 = scmp.gt.s32.totalorder %s3193_s2, 0 }
 0x5eb   : > { %3379 = vtanh.f32 %v1041_v62 }
 0x5ec   : > { %s5130_s2 = smov (!%p1610_p9, %s3193_s2), 0  ;;  %p5045_p9 = scmp.gt.s32.totalorder %s3975_s16, 8 }
 0x5f1   : > { %v3380_v63 = vpop.eup %3379 }
 0x5f2   : > { %1045 = vrot.lane.b32.xlu2 %v3380_v63, %s5077_s19 }
 0x64c   : > { %v1046_v4 = vpop.permute.xlu2 %1045 }
 0x64d   : > { %v1048_v2 = vmul.f32 %v1046_v4, %v1043_v0 }
 0x64f   : > { %v4109_v6 = vadd.f32 %v1049_v5, %v1048_v2 }
 0x651   : > { %v4115_v48 = vsel %vm4105_vm8, %v4109_v6, %v4058_v51 }
 0x652   : > { %1174 = vrot.lane.b32.xlu1 %v4115_v48, %s5077_s19 }
 0x658   : > { %v1135_v9 = vpop.permute.xlu0 %1134 }
 0x659   : > { %v1137_v12 = vadd.f32 %v1135_v9, %v1061_v10 }
 0x65b   : > { %3381 = vtanh.f32 %v1137_v12 }
 0x65c   : > { %3383 = vpow2.f32 %v3166_v18 }
 0x661   : > { %v3382_v14 = vpop.eup %3381 }
 0x662   : > { %1141 = vrot.lane.b32.xlu2 %v3382_v14, %s5077_s19  ;;  %v3384_v19 = vpop.eup %3383 }
 0x663   : > { %v1098_v20 = vadd.f32 1.0, %v3384_v19 }
 0x665   : > { %3385 = vrcp.f32 %v1098_v20  ;;  %v1125_v11 = vand.u32 2147483648, %v1098_v20  ;;  %vm1119_vm11 = vweird.f32 %v1098_v20  ;;  %v1123_v23 = vand.u32 2147483647, %v1098_v20 }
 0x667   : > { %v1126_v34 = vor.u32 1.1754944e-38, %v1125_v11  ;;  %vm1124_vm13 = vcmp.eq.f32.partialorder %v1123_v23, 8.507059e+37 }
 0x66b   : > { %v3386_v21 = vpop.eup %3385 }
 0x66c   : > { %v1115_v3 = vmul.f32 %v3386_v21, %v1098_v20  ;;  %vm1120_vm10 = vweird.f32 %v3386_v21 }
 0x66d   : > { %vm1121_vm12 = vmor %vm1119_vm11, %vm1120_vm10 }
 0x66e   : > { %v1116_v51 = vsub.f32 1.0, %v1115_v3 }
 0x670   : > { %v1117_v22 = vmul.f32 %v3386_v21, %v1116_v51 }
 0x672   : > { %v1118_v7 = vadd.f32 %v3386_v21, %v1117_v22 }
 0x674   : > { %v1122_v24 = vsel %vm1121_vm12, %v3386_v21, %v1118_v7 }
 0x675   : > { %v1127_v25 = vsel %vm1124_vm13, %v1126_v34, %v1122_v24 }
 0x676   : > { %v1139_v26 = vsub.f32 1.0, %v1127_v25  ;;  %v1145_v28 = vmul.f32 %v1127_v25, %v4076_v17  ;;  %v1247_v25 = vld [vmem:[%s4186_s20 + $0x8] sm:$0xff] }
 0x6bc   : > { %v1142_v27 = vpop.permute.xlu2 %1141 }
 0x6bd   : > { %v1144_v29 = vmul.f32 %v1142_v27, %v1139_v26 }
 0x6bf   : > { %v4122_v32 = vadd.f32 %v1145_v28, %v1144_v29 }
 0x6c1   : > { %v4128_v33 = vsel %vm4105_vm8, %v4122_v32, %v4076_v17  ;;  %v4148_v17 = vld [vmem:[%s5067_s4 + $0x18] sm:$0xff] }
 0x6c2   : > { %3175 = vmatmul.msk.f32.vlgmr.msrb.gmra.mxu3 %vm437_vm0, %v4128_v33 }
 0x6c3   : > { %1635 = vmatpush.msrb.mxu3 %v4135_v38 }
 0x6c4   : > { %v1175_v39 = vpop.permute.xlu1 %1174 }
 0x6c5   : > { %3169 = vmatmul.msk.f32.vlgmr.msrb.gmra.mxu2 %vm437_vm0, %v1175_v39  ;;  %1636 = vmatpush.msrb.mxu3 %v4142_v40 }
 0x6c6   : > { %1562 = vmatpush.msrb.mxu2 %v4148_v17 }
 0x6c7   : > { %1637 = vmatpush.msrb.mxu3 %v4154_v41 }
 0x6c8   : > { %1563 = vmatpush.msrb.mxu2 %v4160_v30 }
 0x6c9   : > { %1638 = vmatpush.msrb.mxu3 %v3839_v15 }
 0x6ca   : > { %1564 = vmatpush.msrb.mxu2 %v4167_v31 }
 0x6cc   : > { %1565 = vmatpush.msrb.mxu2 %v4173_v42 }
 0x745   : > { %v1268_v44 = vpop.f32.mrf.mxu3 }
 0x746   : > { %v1269_v43 = vadd.f32 %v3925_v37, %v1268_v44 }
 0x748   : > { %1272 = vrot.lane.b32.xlu2 %v1269_v43, %s5077_s19  ;;  %v1195_v15 = vpop.f32.mrf.mxu2 }
 0x749   : > { %v1196_v45 = vadd.f32 %v3920_v36, %v1195_v15  ;;  %v1246_v36 = vld [vmem:[%s4186_s20] sm:$0xff]  ;;  %s3183_s20 = sshll.u32 %s5128_s10, 3 }
 0x74b   : > { %1219 = vrot.lane.b32.xlu0 %v1196_v45, %s5082_s30  ;;  %v1198_v46 = vadd.f32 %v1196_v45, %v3945_v52 }
 0x74d   : > { %v3170_v47 = vmul.f32 -1.442695, %v1198_v46 }
 0x74f   : > { %3387 = vpow2.f32 %v3170_v47 }
 0x753   : > { %1315 = vrot.lane.b32.xlu0 %v1269_v43, %s5076_s29 }
 0x755   : > { %v3388_v37 = vpop.eup %3387 }
 0x756   : > { %v1202_v54 = vadd.f32 1.0, %v3388_v37 }
 0x758   : > { %3389 = vrcp.f32 %v1202_v54  ;;  %v1214_v1 = vand.u32 2147483648, %v1202_v54  ;;  %vm1208_vm15 = vweird.f32 %v1202_v54  ;;  %v1212_v5 = vand.u32 2147483647, %v1202_v54 }
 0x75a   : > { %v1215_v9 = vor.u32 1.1754944e-38, %v1214_v1  ;;  %vm1213_vm3 = vcmp.eq.f32.partialorder %v1212_v5, 8.507059e+37 }
 0x75e   : > { %v3390_v58 = vpop.eup %3389 }
 0x75f   : > { %v1204_v59 = vmul.f32 %v3390_v58, %v1202_v54  ;;  %vm1209_vm14 = vweird.f32 %v3390_v58 }
 0x760   : > { %vm1210_vm2 = vmor %vm1208_vm15, %vm1209_vm14 }
 0x761   : > { %v1205_v61 = vsub.f32 1.0, %v1204_v59 }
 0x763   : > { %v1206_v62 = vmul.f32 %v3390_v58, %v1205_v61 }
 0x765   : > { %v1207_v0 = vadd.f32 %v3390_v58, %v1206_v62 }
 0x767   : > { %v1211_v10 = vsel %vm1210_vm2, %v3390_v58, %v1207_v0 }
 0x768   : > { %v1216_v13 = vsel %vm1213_vm3, %v1215_v9, %v1211_v10 }
 0x769   : > { %v1229_v54 = vsub.f32 1.0, %v1216_v13 }
 0x7a2   : > { %v1273_v55 = vpop.permute.xlu2 %1272 }
 0x7a3   : > { %v1275_v56 = vadd.f32 %v1273_v55, %v1246_v36  ;;  %v1276_v29 = vadd.f32 %v1273_v55, %v1247_v25  ;;  %v1334_v36 = vstv %s1333_s3  ;;  %s1427_s3 = sshra.s32 %s3183_s20, 3  ;;  %s3194_s20 = sshll.u32 %s5130_s2, 3 }
 0x7a4   : > { %vm4199_vm13 = vcmp.eq.s32.totalorder %v1334_v36, 1  ;;  %s3279_s13 = sshll.u32 %s1427_s3, 4  ;;  %s1613_s3 = sshra.s32 %s3194_s20, 3 }
 0x7a5   : > { %v3176_v57 = vmul.f32 -1.442695, %v1275_v56  ;;  %v3177_v39 = vmul.f32 -1.442695, %v1276_v29  ;;  %s4263_s27 = scalar_lea.vmem [#allocation2], %s3279_s13 }
 0x7a6   : > { %s1519_s13 = scalar_select %p1354_p8, 1, 0 }
 0x7a7   : > { %3391 = vpow2.f32 %v3176_v57  ;;  %v1235_v57 = vmul.f32 %v1216_v13, %v4115_v48  ;;  %s1705_s20 = scalar_select %p1540_p10, 1, 0 }
 0x7ad   : > { %v3392_v60 = vpop.eup %3391 }
 0x7ae   : > { %v1283_v35 = vadd.f32 1.0, %v3392_v60 }
 0x7b0   : > { %3393 = vrcp.f32 %v1283_v35  ;;  %v1296_v20 = vand.u32 2147483648, %v1283_v35  ;;  %vm1290_vm5 = vweird.f32 %v1283_v35  ;;  %v1294_v21 = vand.u32 2147483647, %v1283_v35 }
 0x7b2   : > { %v1297_v51 = vor.u32 1.1754944e-38, %v1296_v20  ;;  %vm1295_vm7 = vcmp.eq.f32.partialorder %v1294_v21, 8.507059e+37  ;;  %v4254_v20 = vld [vmem:[%s5071_s5] ss:$0 sm:$0xff] }
 0x7b6   : > { %v3394_v63 = vpop.eup %3393 }
 0x7b7   : > { %v1286_v4 = vmul.f32 %v3394_v63, %v1283_v35  ;;  %vm1291_vm4 = vweird.f32 %v3394_v63 }
 0x7b8   : > { %vm1292_vm6 = vmor %vm1290_vm5, %vm1291_vm4 }
 0x7b9   : > { %v1287_v2 = vsub.f32 1.0, %v1286_v4 }
 0x7bb   : > { %v1288_v12 = vmul.f32 %v3394_v63, %v1287_v2 }
 0x7bd   : > { %v1220_v14 = vpop.permute.xlu0 %1219  ;;  %v1289_v19 = vadd.f32 %v3394_v63, %v1288_v12  ;;  %v4236_v12 = vld [vmem:[%s5068_s6] sm:$0xff] }
 0x7be   : > { %v1222_v18 = vmul.f32 %v1220_v14, %v1216_v13  ;;  %v4247_v13 = vld [vmem:[%s5072_s7] ss:$0 sm:$0xff] }
 0x7bf   : > { %v1293_v3 = vsel %vm1292_vm6, %v3394_v63, %v1289_v19 }
 0x7c0   : > { %1224 = vrot.lane.b32.xlu1 %v1222_v18, %s5082_s30  ;;  %v1298_v22 = vsel %vm1295_vm7, %v1297_v51, %v1293_v3  ;;  %v3541_v3 = vld [vmem:[#allocation2 + $0x40] sm:$0xff] }
 0x7c5   : > { %v1316_v7 = vpop.permute.xlu0 %1315 }
 0x7c6   : > { %v1318_v11 = vmul.f32 %v1316_v7, %v1298_v22 }
 0x7c8   : > { %1320 = vrot.lane.b32.xlu2 %v1318_v11, %s5082_s30  ;;  %v1432_v11 = vld [vmem:[%s4263_s27] sm:$0xff] }
 0x822   : > { %v1321_v34 = vpop.permute.xlu2 %1320 }
 0x823   : > { %v1323_v26 = vadd.f32 %v1321_v34, %v1247_v25 }
 0x832   : > { %v1225_v23 = vpop.permute.xlu1 %1224 }
 0x833   : > { %v1227_v24 = vadd.f32 %v1225_v23, %v3945_v52 }
 0x835   : > { %3395 = vtanh.f32 %v1227_v24 }
 0x836   : > { %3397 = vtanh.f32 %v1323_v26 }
 0x837   : > { %3399 = vpow2.f32 %v3177_v39 }
 0x83b   : > { %v3396_v27 = vpop.eup %3395 }
 0x83c   : > { %1231 = vrot.lane.b32.xlu1 %v3396_v27, %s5077_s19  ;;  %v3398_v28 = vpop.eup %3397 }
 0x83d   : > { %v3400_v44 = vpop.eup %3399 }
 0x83e   : > { %v1284_v43 = vadd.f32 1.0, %v3400_v44 }
 0x840   : > { %3401 = vrcp.f32 %v1284_v43  ;;  %v1311_v37 = vand.u32 2147483648, %v1284_v43  ;;  %vm1305_vm11 = vweird.f32 %v1284_v43  ;;  %v1309_v56 = vand.u32 2147483647, %v1284_v43 }
 0x842   : > { %v1312_v35 = vor.u32 1.1754944e-38, %v1311_v37  ;;  %vm1310_vm14 = vcmp.eq.f32.partialorder %v1309_v56, 8.507059e+37 }
 0x844   : > { %1327 = vrot.lane.b32.xlu1 %v3398_v28, %s5077_s19 }
 0x846   : > { %v3402_v52 = vpop.eup %3401 }
 0x847   : > { %v1301_v15 = vmul.f32 %v3402_v52, %v1284_v43  ;;  %vm1306_vm10 = vweird.f32 %v3402_v52 }
 0x848   : > { %vm1307_vm12 = vmor %vm1305_vm11, %vm1306_vm10 }
 0x849   : > { %v1302_v45 = vsub.f32 1.0, %v1301_v15 }
 0x84b   : > { %v1303_v46 = vmul.f32 %v3402_v52, %v1302_v45 }
 0x84d   : > { %v1304_v47 = vadd.f32 %v3402_v52, %v1303_v46 }
 0x84f   : > { %v1308_v59 = vsel %vm1307_vm12, %v3402_v52, %v1304_v47 }
 0x850   : > { %v1313_v62 = vsel %vm1310_vm14, %v1312_v35, %v1308_v59 }
 0x851   : > { %v1325_v1 = vsub.f32 1.0, %v1313_v62  ;;  %v1331_v5 = vmul.f32 %v1313_v62, %v4128_v33 }
 0x8ae   : > { %v1232_v55 = vpop.permute.xlu1 %1231 }
 0x8af   : > { %v1234_v58 = vmul.f32 %v1232_v55, %v1229_v54 }
 0x8b1   : > { %v4203_v61 = vadd.f32 %v1235_v57, %v1234_v58 }
 0x8b3   : > { %v4209_v63 = vsel %vm4199_vm13, %v4203_v61, %v4115_v48  ;;  %v1336_v0 = vsel %vm4199_vm13, %v4203_v61, 0.0  ;;  %v2859_v61 = vld [vmem:[%s5101_s8 + $0x38] sm:$0xff] }
 0x8b4   : > { %1360 = vrot.lane.b32.xlu0 %v4209_v63, %s5077_s19  ;;  %2875 = vmatpush.msrb.mxu0 %v2859_v61 }
 0x8b6   : > { %v1328_v4 = vpop.permute.xlu1 %1327 }
 0x8b7   : > { %v1330_v2 = vmul.f32 %v1328_v4, %v1325_v1 }
 0x8b9   : > { %v4217_v10 = vadd.f32 %v1331_v5, %v1330_v2 }
 0x8bb   : > { %v4223_v48 = vsel %vm4199_vm13, %v4217_v10, %v4128_v33  ;;  %v1345_v9 = vsel %vm4199_vm13, %v4217_v10, 0.0 }
 0x8bc   : > { %3186 = vmatmul.msk.f32.vlgmr.msra.gmra.mxu3 %vm437_vm0, %v4223_v48 }
 0x8bd   : > { %1821 = vmatpush.msra.mxu3 %v4135_v38 }
 0x8bf   : > { %1822 = vmatpush.msra.mxu3 %v4142_v40 }
 0x8c1   : > { %1823 = vmatpush.msra.mxu3 %v4154_v41 }
 0x8c3   : > { %1824 = vmatpush.msra.mxu3 %v4236_v12 }
 0x926   : > { %v1361_v33 = vpop.permute.xlu0 %1360 }
 0x927   : > { %3180 = vmatmul.msk.f32.vlgmr.msra.gmra.mxu2 %vm437_vm0, %v1361_v33 }
 0x928   : > { %1748 = vmatpush.msra.mxu2 %v4148_v17 }
 0x92a   : > { %1749 = vmatpush.msra.mxu2 %v4160_v30 }
 0x92c   : > { %1750 = vmatpush.msra.mxu2 %v4167_v31 }
 0x92e   : > { %1751 = vmatpush.msra.mxu2 %v4173_v42 }
 0x93f   : > { %v1454_v14 = vpop.f32.mrf.mxu3 }
 0x940   : > { %v1455_v18 = vadd.f32 %v4247_v13, %v1454_v14 }
 0x942   : > { %1458 = vrot.lane.b32.xlu0 %v1455_v18, %s5077_s19 }
 0x9aa   : > { %v1381_v19 = vpop.f32.mrf.mxu2 }
 0x9ab   : > { %v1382_v21 = vadd.f32 %v4254_v20, %v1381_v19 }
 0x9ad   : > { %1405 = vrot.lane.b32.xlu2 %v1382_v21, %s5082_s30  ;;  %v1384_v51 = vadd.f32 %v3541_v3, %v1382_v21 }
 0x9af   : > { %v3181_v22 = vmul.f32 -1.442695, %v1384_v51 }
 0x9b1   : > { %3403 = vpow2.f32 %v3181_v22 }
 0x9b4   : > { %v1459_v7 = vpop.permute.xlu0 %1458 }
 0x9b5   : > { %1501 = vrot.lane.b32.xlu2 %v1455_v18, %s5076_s29  ;;  %v1461_v23 = vadd.f32 %v1459_v7, %v1432_v11  ;;  %v1433_v18 = vld [vmem:[%s4263_s27 + $0x8] sm:$0xff]  ;;  %s3280_s27 = sshll.u32 %s1613_s3, 4  ;;  %s3204_s3 = sadd.s32 4294967289, %s3975_s16 }
 0x9b6   : > { %v1462_v11 = vadd.f32 %v1459_v7, %v1433_v18  ;;  %p1796_p11 = scmp.gt.s32.totalorder %s3204_s3, 0 }
 0x9b7   : > { %v3187_v24 = vmul.f32 -1.442695, %v1461_v23  ;;  %v3404_v34 = vpop.eup %3403 }
 0x9b8   : > { %v1388_v25 = vadd.f32 1.0, %v3404_v34  ;;  %v3188_v23 = vmul.f32 -1.442695, %v1462_v11  ;;  %s5132_s3 = smov (!%p1796_p11, %s3204_s3), 0 }
 0x9b9   : > { %3405 = vpow2.f32 %v3187_v24 }
 0x9ba   : > { %3407 = vrcp.f32 %v1388_v25  ;;  %v1400_v46 = vand.u32 2147483648, %v1388_v25  ;;  %vm1394_vm2 = vweird.f32 %v1388_v25  ;;  %v1398_v47 = vand.u32 2147483647, %v1388_v25 }
 0x9bc   : > { %v1401_v36 = vor.u32 1.1754944e-38, %v1400_v46  ;;  %vm1399_vm4 = vcmp.eq.f32.partialorder %v1398_v47, 8.507059e+37 }
 0x9bf   : > { %v3406_v26 = vpop.eup %3405 }
 0x9c0   : > { %v1469_v27 = vadd.f32 1.0, %v3406_v26  ;;  %v3408_v28 = vpop.eup %3407 }
 0x9c1   : > { %v1390_v29 = vmul.f32 %v3408_v28, %v1388_v25  ;;  %vm1395_vm15 = vweird.f32 %v3408_v28 }
 0x9c2   : > { %3409 = vrcp.f32 %v1469_v27  ;;  %vm1396_vm3 = vmor %vm1394_vm2, %vm1395_vm15  ;;  %v1482_v59 = vand.u32 2147483648, %v1469_v27  ;;  %vm1476_vm6 = vweird.f32 %v1469_v27  ;;  %v1480_v35 = vand.u32 2147483647, %v1469_v27 }
 0x9c3   : > { %v1391_v39 = vsub.f32 1.0, %v1390_v29 }
 0x9c4   : > { %v1483_v1 = vor.u32 1.1754944e-38, %v1482_v59  ;;  %vm1481_vm10 = vcmp.eq.f32.partialorder %v1480_v35, 8.507059e+37 }
 0x9c5   : > { %v1392_v43 = vmul.f32 %v3408_v28, %v1391_v39 }
 0x9c7   : > { %v1393_v15 = vadd.f32 %v3408_v28, %v1392_v43 }
 0x9c8   : > { %v3410_v44 = vpop.eup %3409 }
 0x9c9   : > { %v1472_v52 = vmul.f32 %v3410_v44, %v1469_v27  ;;  %v1397_v37 = vsel %vm1396_vm3, %v3408_v28, %v1393_v15  ;;  %vm1477_vm5 = vweird.f32 %v3410_v44 }
 0x9ca   : > { %v1402_v55 = vsel %vm1399_vm4, %v1401_v36, %v1397_v37  ;;  %vm1478_vm7 = vmor %vm1476_vm6, %vm1477_vm5 }
 0x9cb   : > { %v1473_v45 = vsub.f32 1.0, %v1472_v52  ;;  %v1415_v39 = vsub.f32 1.0, %v1402_v55  ;;  %v1421_v52 = vmul.f32 %v1402_v55, %v4209_v63 }
 0x9cd   : > { %v1474_v54 = vmul.f32 %v3410_v44, %v1473_v45 }
 0x9cf   : > { %v1475_v58 = vadd.f32 %v3410_v44, %v1474_v54 }
 0x9d1   : > { %v1479_v62 = vsel %vm1478_vm7, %v3410_v44, %v1475_v58  ;;  %v1520_v44 = vstv %s1519_s13  ;;  %s4324_s13 = scalar_lea.vmem [#allocation2], %s3280_s27  ;;  %s3205_s27 = sshll.u32 %s5132_s3, 3 }
 0x9d2   : > { %v1484_v5 = vsel %vm1481_vm10, %v1483_v1, %v1479_v62  ;;  %vm4275_vm15 = vcmp.eq.s32.totalorder %v1520_v44, 1 }
 0xa07   : > { %v1406_v56 = vpop.permute.xlu2 %1405 }
 0xa08   : > { %v1408_v57 = vmul.f32 %v1406_v56, %v1402_v55 }
 0xa0a   : > { %1410 = vrot.lane.b32.xlu1 %v1408_v57, %s5082_s30 }
 0xa0f   : > { %v1502_v4 = vpop.permute.xlu2 %1501 }
 0xa10   : > { %v1504_v2 = vmul.f32 %v1502_v4, %v1484_v5 }
 0xa12   : > { %1506 = vrot.lane.b32.xlu1 %v1504_v2, %s5082_s30 }
 0xa7c   : > { %v1411_v33 = vpop.permute.xlu1 %1410 }
 0xa7d   : > { %v1413_v14 = vadd.f32 %v3541_v3, %v1411_v33  ;;  %v1544_v33 = vld [vmem:[#allocation2 + $0x50] sm:$0xff] }
 0xa7f   : > { %3411 = vtanh.f32 %v1413_v14 }
 0xa84   : > { %v1507_v19 = vpop.permute.xlu1 %1506 }
 0xa85   : > { %v3412_v21 = vpop.eup %3411  ;;  %v1509_v51 = vadd.f32 %v1507_v19, %v1433_v18 }
 0xa86   : > { %1417 = vrot.lane.b32.xlu0 %v3412_v21, %s5077_s19  ;;  %v1618_v21 = vld [vmem:[%s4324_s13] sm:$0xff] }
 0xa87   : > { %3413 = vtanh.f32 %v1509_v51 }
 0xa88   : > { %3415 = vpow2.f32 %v3188_v23 }
 0xa8d   : > { %v3414_v22 = vpop.eup %3413 }
 0xa8e   : > { %1513 = vrot.lane.b32.xlu0 %v3414_v22, %s5077_s19  ;;  %v3416_v24 = vpop.eup %3415 }
 0xa8f   : > { %v1470_v34 = vadd.f32 1.0, %v3416_v24 }
 0xa91   : > { %3417 = vrcp.f32 %v1470_v34  ;;  %v1497_v29 = vand.u32 2147483648, %v1470_v34  ;;  %vm1491_vm12 = vweird.f32 %v1470_v34  ;;  %v1495_v43 = vand.u32 2147483647, %v1470_v34 }
 0xa93   : > { %v1498_v47 = vor.u32 1.1754944e-38, %v1497_v29  ;;  %vm1496_vm2 = vcmp.eq.f32.partialorder %v1495_v43, 8.507059e+37 }
 0xa97   : > { %v3418_v3 = vpop.eup %3417 }
 0xa98   : > { %v1487_v25 = vmul.f32 %v3418_v3, %v1470_v34  ;;  %vm1492_vm11 = vweird.f32 %v3418_v3 }
 0xa99   : > { %vm1493_vm14 = vmor %vm1491_vm12, %vm1492_vm11 }
 0xa9a   : > { %v1488_v26 = vsub.f32 1.0, %v1487_v25 }
 0xa9c   : > { %v1489_v27 = vmul.f32 %v3418_v3, %v1488_v26 }
 0xa9e   : > { %v1490_v28 = vadd.f32 %v3418_v3, %v1489_v27 }
 0xaa0   : > { %v1494_v45 = vsel %vm1493_vm14, %v3418_v3, %v1490_v28 }
 0xaa1   : > { %v1499_v54 = vsel %vm1496_vm2, %v1498_v47, %v1494_v45 }
 0xaa2   : > { %v1511_v55 = vsub.f32 1.0, %v1499_v54  ;;  %v1517_v58 = vmul.f32 %v1499_v54, %v4223_v48 }
 0xaf8   : > { %v1418_v7 = vpop.permute.xlu0 %1417 }
 0xaf9   : > { %v1420_v15 = vmul.f32 %v1418_v7, %v1415_v39 }
 0xafb   : > { %v4279_v37 = vadd.f32 %v1421_v52, %v1420_v15 }
 0xafd   : > { %v4285_v36 = vsel %vm4275_vm15, %v4279_v37, %v4209_v63  ;;  %v1522_v56 = vsel %vm4275_vm15, %v4279_v37, 0.0 }
 0xafe   : > { %1546 = vrot.lane.b32.xlu2 %v4285_v36, %s5077_s19 }
 0xb00   : > { %v1514_v57 = vpop.permute.xlu0 %1513 }
 0xb01   : > { %v1516_v59 = vmul.f32 %v1514_v57, %v1511_v55 }
 0xb03   : > { %v4293_v35 = vadd.f32 %v1517_v58, %v1516_v59 }
 0xb05   : > { %v4299_v63 = vsel %vm4275_vm15, %v4293_v35, %v4223_v48  ;;  %v1531_v62 = vsel %vm4275_vm15, %v4293_v35, 0.0  ;;  %v2857_v35 = vld [vmem:[%s5101_s8 + $0x28] sm:$0xff] }
 0xb06   : > { %3197 = vmatmul.msk.f32.vlgmr.msrb.gmra.mxu3 %vm437_vm0, %v4299_v63 }
 0xb07   : > { %2007 = vmatpush.msrb.mxu3 %v4135_v38 }
 0xb09   : > { %2008 = vmatpush.msrb.mxu3 %v4142_v40 }
 0xb0b   : > { %2009 = vmatpush.msrb.mxu3 %v4154_v41 }
 0xb0d   : > { %2010 = vmatpush.msrb.mxu3 %v4236_v12 }
 0xb58   : > { %v1547_v1 = vpop.permute.xlu2 %1546 }
 0xb59   : > { %3191 = vmatmul.msk.f32.vlgmr.msrb.gmra.mxu2 %vm437_vm0, %v1547_v1 }
 0xb5a   : > { %1934 = vmatpush.msrb.mxu2 %v4148_v17 }
 0xb5c   : > { %1935 = vmatpush.msrb.mxu2 %v4160_v30 }
 0xb5e   : > { %1936 = vmatpush.msrb.mxu2 %v4167_v31 }
 0xb60   : > { %1937 = vmatpush.msrb.mxu2 %v4173_v42 }
 0xb89   : > { %v1640_v48 = vpop.f32.mrf.mxu3 }
 0xb8a   : > { %v1641_v4 = vadd.f32 %v4247_v13, %v1640_v48 }
 0xb8c   : > { %1644 = vrot.lane.b32.xlu2 %v1641_v4, %s5077_s19 }
 0xbdc   : > { %v1567_v5 = vpop.f32.mrf.mxu2 }
 0xbdd   : > { %v1568_v2 = vadd.f32 %v4254_v20, %v1567_v5 }
 0xbdf   : > { %1591 = vrot.lane.b32.xlu1 %v1568_v2, %s5082_s30  ;;  %v1570_v14 = vadd.f32 %v1568_v2, %v1544_v33 }
 0xbe1   : > { %v3192_v18 = vmul.f32 -1.442695, %v1570_v14 }
 0xbe3   : > { %3419 = vpow2.f32 %v3192_v18 }
 0xbe6   : > { %v1645_v19 = vpop.permute.xlu2 %1644 }
 0xbe7   : > { %1687 = vrot.lane.b32.xlu1 %v1641_v4, %s5076_s29  ;;  %v1647_v51 = vadd.f32 %v1645_v19, %v1618_v21  ;;  %v1619_v21 = vld [vmem:[%s4324_s13 + $0x8] sm:$0xff]  ;;  %s1799_s13 = sshra.s32 %s3205_s27, 3 }
 0xbe8   : > { %s1891_s27 = scalar_select %p1726_p13, 1, 0 }
 0xbe9   : > { %v3198_v22 = vmul.f32 -1.442695, %v1647_v51  ;;  %v3420_v11 = vpop.eup %3419 }
 0xbea   : > { %v1574_v23 = vadd.f32 1.0, %v3420_v11 }
 0xbeb   : > { %3421 = vpow2.f32 %v3198_v22 }
 0xbec   : > { %3423 = vrcp.f32 %v1574_v23  ;;  %v1586_v43 = vand.u32 2147483648, %v1574_v23  ;;  %vm1580_vm4 = vweird.f32 %v1574_v23  ;;  %v1584_v7 = vand.u32 2147483647, %v1574_v23 }
 0xbee   : > { %v1587_v45 = vor.u32 1.1754944e-38, %v1586_v43  ;;  %vm1585_vm6 = vcmp.eq.f32.partialorder %v1584_v7, 8.507059e+37  ;;  %v1706_v43 = vstv %s1705_s20  ;;  %s3281_s20 = sshll.u32 %s1799_s13, 4 }
 0xbef   : > { %s4387_s25 = scalar_lea.vmem [#allocation2], %s3281_s20 }
 0xbf1   : > { %v3422_v24 = vpop.eup %3421 }
 0xbf2   : > { %v1655_v34 = vadd.f32 1.0, %v3422_v24  ;;  %v3424_v3 = vpop.eup %3423  ;;  %v1648_v24 = vadd.f32 %v1645_v19, %v1619_v21 }
 0xbf3   : > { %v1576_v25 = vmul.f32 %v3424_v3, %v1574_v23  ;;  %vm1581_vm3 = vweird.f32 %v3424_v3 }
 0xbf4   : > { %3425 = vrcp.f32 %v1655_v34  ;;  %vm1582_vm5 = vmor %vm1580_vm4, %vm1581_vm3  ;;  %v1668_v58 = vand.u32 2147483648, %v1655_v34  ;;  %vm1662_vm10 = vweird.f32 %v1655_v34  ;;  %v1666_v59 = vand.u32 2147483647, %v1655_v34 }
 0xbf5   : > { %v1577_v26 = vsub.f32 1.0, %v1576_v25  ;;  %vm4336_vm4 = vcmp.eq.s32.totalorder %v1706_v43, 1 }
 0xbf6   : > { %v1669_v48 = vor.u32 1.1754944e-38, %v1668_v58  ;;  %vm1667_vm12 = vcmp.eq.f32.partialorder %v1666_v59, 8.507059e+37 }
 0xbf7   : > { %v1578_v28 = vmul.f32 %v3424_v3, %v1577_v26 }
 0xbf9   : > { %v1579_v39 = vadd.f32 %v3424_v3, %v1578_v28 }
 0xbfa   : > { %v3426_v27 = vpop.eup %3425 }
 0xbfb   : > { %v1658_v29 = vmul.f32 %v3426_v27, %v1655_v34  ;;  %v1583_v52 = vsel %vm1582_vm5, %v3424_v3, %v1579_v39  ;;  %vm1663_vm7 = vweird.f32 %v3426_v27  ;;  %v3199_v34 = vmul.f32 -1.442695, %v1648_v24 }
 0xbfc   : > { %v1588_v47 = vsel %vm1585_vm6, %v1587_v45, %v1583_v52  ;;  %vm1664_vm11 = vmor %vm1662_vm10, %vm1663_vm7 }
 0xbfd   : > { %v1659_v44 = vsub.f32 1.0, %v1658_v29  ;;  %v1607_v52 = vmul.f32 %v1588_v47, %v4285_v36 }
 0xbff   : > { %v1660_v15 = vmul.f32 %v3426_v27, %v1659_v44  ;;  %v1601_v44 = vsub.f32 1.0, %v1588_v47 }
 0xc01   : > { %v1661_v57 = vadd.f32 %v3426_v27, %v1660_v15 }
 0xc03   : > { %v1665_v1 = vsel %vm1664_vm11, %v3426_v27, %v1661_v57 }
 0xc04   : > { %v1670_v4 = vsel %vm1667_vm12, %v1669_v48, %v1665_v1 }
 0xc51   : > { %v1592_v54 = vpop.permute.xlu1 %1591 }
 0xc52   : > { %v1594_v55 = vmul.f32 %v1592_v54, %v1588_v47 }
 0xc54   : > { %1596 = vrot.lane.b32.xlu0 %v1594_v55, %s5082_s30 }
 0xc59   : > { %v1688_v5 = vpop.permute.xlu1 %1687 }
 0xc5a   : > { %v1690_v2 = vmul.f32 %v1688_v5, %v1670_v4 }
 0xc5c   : > { %1692 = vrot.lane.b32.xlu0 %v1690_v2, %s5082_s30 }
 0xcc6   : > { %v1597_v14 = vpop.permute.xlu0 %1596 }
 0xcc7   : > { %v1599_v18 = vadd.f32 %v1597_v14, %v1544_v33 }
 0xcc9   : > { %3427 = vtanh.f32 %v1599_v18 }
 0xcce   : > { %v1693_v51 = vpop.permute.xlu0 %1692 }
 0xccf   : > { %v3428_v22 = vpop.eup %3427  ;;  %v1695_v11 = vadd.f32 %v1693_v51, %v1619_v21 }
 0xcd0   : > { %1603 = vrot.lane.b32.xlu2 %v3428_v22, %s5077_s19 }
 0xcd1   : > { %3429 = vtanh.f32 %v1695_v11  ;;  %v1730_v11 = vld [vmem:[#allocation2 + $0x60] sm:$0xff] }
 0xcd2   : > { %3431 = vpow2.f32 %v3199_v34 }
 0xcd7   : > { %v3430_v23 = vpop.eup %3429 }
 0xcd8   : > { %1699 = vrot.lane.b32.xlu2 %v3430_v23, %s5077_s19  ;;  %v3432_v3 = vpop.eup %3431 }
 0xcd9   : > { %v1656_v25 = vadd.f32 1.0, %v3432_v3  ;;  %v1804_v3 = vld [vmem:[%s4387_s25] sm:$0xff] }
 0xcdb   : > { %3433 = vrcp.f32 %v1656_v25  ;;  %v1683_v39 = vand.u32 2147483648, %v1656_v25  ;;  %vm1677_vm2 = vweird.f32 %v1656_v25  ;;  %v1681_v7 = vand.u32 2147483647, %v1656_v25 }
 0xcdd   : > { %v1684_v55 = vor.u32 1.1754944e-38, %v1683_v39  ;;  %vm1682_vm5 = vcmp.eq.f32.partialorder %v1681_v7, 8.507059e+37 }
 0xce1   : > { %v3434_v33 = vpop.eup %3433 }
 0xce2   : > { %v1673_v26 = vmul.f32 %v3434_v33, %v1656_v25  ;;  %vm1678_vm14 = vweird.f32 %v3434_v33 }
 0xce3   : > { %vm1679_vm3 = vmor %vm1677_vm2, %vm1678_vm14 }
 0xce4   : > { %v1674_v27 = vsub.f32 1.0, %v1673_v26 }
 0xce6   : > { %v1675_v28 = vmul.f32 %v3434_v33, %v1674_v27 }
 0xce8   : > { %v1676_v29 = vadd.f32 %v3434_v33, %v1675_v28 }
 0xcea   : > { %v1680_v45 = vsel %vm1679_vm3, %v3434_v33, %v1676_v29 }
 0xceb   : > { %v1685_v58 = vsel %vm1682_vm5, %v1684_v55, %v1680_v45 }
 0xcec   : > { %v1697_v1 = vsub.f32 1.0, %v1685_v58  ;;  %v1703_v4 = vmul.f32 %v1685_v58, %v4299_v63 }
 0xd2a   : > { %v1604_v19 = vpop.permute.xlu2 %1603 }
 0xd2b   : > { %v1606_v15 = vmul.f32 %v1604_v19, %v1601_v44 }
 0xd2d   : > { %v4340_v57 = vadd.f32 %v1607_v52, %v1606_v15 }
 0xd2f   : > { %v4346_v59 = vsel %vm4336_vm4, %v4340_v57, %v4285_v36  ;;  %v1708_v47 = vsel %vm4336_vm4, %v4340_v57, 0.0 }
 0xd30   : > { %1732 = vrot.lane.b32.xlu1 %v4346_v59, %s5077_s19 }
 0xd32   : > { %v1700_v48 = vpop.permute.xlu2 %1699 }
 0xd33   : > { %v1702_v5 = vmul.f32 %v1700_v48, %v1697_v1 }
 0xd35   : > { %v4354_v2 = vadd.f32 %v1703_v4, %v1702_v5 }
 0xd37   : > { %v4360_v36 = vsel %vm4336_vm4, %v4354_v2, %v4299_v63  ;;  %v1717_v14 = vsel %vm4336_vm4, %v4354_v2, 0.0 }
 0xd38   : > { %3208 = vmatmul.msk.f32.vlgmr.msra.gmra.mxu3 %vm437_vm0, %v4360_v36 }
 0xd39   : > { %2193 = vmatpush.msra.mxu3 %v4135_v38 }
 0xd3b   : > { %2194 = vmatpush.msra.mxu3 %v4142_v40 }
 0xd3d   : > { %2195 = vmatpush.msra.mxu3 %v4154_v41 }
 0xd3f   : > { %2196 = vmatpush.msra.mxu3 %v4236_v12 }
 0xda2   : > { %v1733_v18 = vpop.permute.xlu1 %1732 }
 0xda3   : > { %3202 = vmatmul.msk.f32.vlgmr.msra.gmra.mxu2 %vm437_vm0, %v1733_v18 }
 0xda4   : > { %2120 = vmatpush.msra.mxu2 %v4148_v17 }
 0xda6   : > { %2121 = vmatpush.msra.mxu2 %v4160_v30 }
 0xda8   : > { %2122 = vmatpush.msra.mxu2 %v4167_v31 }
 0xdaa   : > { %2123 = vmatpush.msra.mxu2 %v4173_v42 }
 0xdbb   : > { %v1826_v63 = vpop.f32.mrf.mxu3 }
 0xdbc   : > { %v1827_v21 = vadd.f32 %v4247_v13, %v1826_v63 }
 0xdbe   : > { %1830 = vrot.lane.b32.xlu1 %v1827_v21, %s5077_s19 }
 0xe26   : > { %v1753_v51 = vpop.f32.mrf.mxu2 }
 0xe27   : > { %v1754_v22 = vadd.f32 %v4254_v20, %v1753_v51 }
 0xe29   : > { %1777 = vrot.lane.b32.xlu0 %v1754_v22, %s5082_s30  ;;  %v1756_v23 = vadd.f32 %v1754_v22, %v1730_v11 }
 0xe2b   : > { %v3203_v24 = vmul.f32 -1.442695, %v1756_v23 }
 0xe2d   : > { %3435 = vpow2.f32 %v3203_v24 }
 0xe30   : > { %v4385_v34 = vpop.permute.xlu1 %1830 }
 0xe31   : > { %1873 = vrot.lane.b32.xlu0 %v1827_v21, %s5076_s29  ;;  %v1833_v25 = vadd.f32 %v4385_v34, %v1804_v3 }
 0xe33   : > { %v3209_v33 = vmul.f32 -1.442695, %v1833_v25  ;;  %v3436_v26 = vpop.eup %3435 }
 0xe34   : > { %v1760_v27 = vadd.f32 1.0, %v3436_v26 }
 0xe35   : > { %3437 = vpow2.f32 %v3209_v33 }
 0xe36   : > { %3439 = vrcp.f32 %v1760_v27  ;;  %v1772_v55 = vand.u32 2147483648, %v1760_v27  ;;  %vm1766_vm7 = vweird.f32 %v1760_v27  ;;  %v1770_v58 = vand.u32 2147483647, %v1760_v27 }
 0xe38   : > { %v1773_v4 = vor.u32 1.1754944e-38, %v1772_v55  ;;  %vm1771_vm11 = vcmp.eq.f32.partialorder %v1770_v58, 8.507059e+37 }
 0xe3b   : > { %v3438_v28 = vpop.eup %3437 }
 0xe3c   : > { %v1841_v29 = vadd.f32 1.0, %v3438_v28  ;;  %v3440_v39 = vpop.eup %3439 }
 0xe3d   : > { %v1762_v44 = vmul.f32 %v3440_v39, %v1760_v27  ;;  %vm1767_vm6 = vweird.f32 %v3440_v39 }
 0xe3e   : > { %3441 = vrcp.f32 %v1841_v29  ;;  %vm1768_vm10 = vmor %vm1766_vm7, %vm1767_vm6  ;;  %v1854_v51 = vand.u32 2147483648, %v1841_v29  ;;  %vm1848_vm14 = vweird.f32 %v1841_v29  ;;  %v1852_v22 = vand.u32 2147483647, %v1841_v29 }
 0xe3f   : > { %v1763_v43 = vsub.f32 1.0, %v1762_v44 }
 0xe40   : > { %v1855_v24 = vor.u32 1.1754944e-38, %v1854_v51  ;;  %vm1853_vm3 = vcmp.eq.f32.partialorder %v1852_v22, 8.507059e+37 }
 0xe41   : > { %v1764_v19 = vmul.f32 %v3440_v39, %v1763_v43 }
 0xe43   : > { %v1765_v15 = vadd.f32 %v3440_v39, %v1764_v19  ;;  %v1892_v19 = vstv %s1891_s27 }
 0xe44   : > { %v3442_v7 = vpop.eup %3441  ;;  %vm4400_vm5 = vcmp.eq.s32.totalorder %v1892_v19, 1 }
 0xe45   : > { %v1844_v52 = vmul.f32 %v3442_v7, %v1841_v29  ;;  %v1769_v1 = vsel %vm1768_vm10, %v3440_v39, %v1765_v15  ;;  %vm1849_vm12 = vweird.f32 %v3442_v7  ;;  %v1805_v39 = vld [vmem:[%s4387_s25 + $0x8] sm:$0xff]  ;;  %s3215_s25 = sadd.s32 4294967288, %s3975_s16 }
 0xe46   : > { %v1774_v18 = vsel %vm1771_vm11, %v1773_v4, %v1769_v1  ;;  %vm1850_vm2 = vmor %vm1848_vm14, %vm1849_vm12  ;;  %v1834_v55 = vadd.f32 %v4385_v34, %v1805_v39  ;;  %p1982_p1 = scmp.gt.s32.totalorder %s3215_s25, 0 }
 0xe47   : > { %v1845_v45 = vsub.f32 1.0, %v1844_v52  ;;  %v1793_v15 = vmul.f32 %v1774_v18, %v4346_v59 }
 0xe48   : > { %v3210_v4 = vmul.f32 -1.442695, %v1834_v55  ;;  %s5134_s25 = smov (!%p1982_p1, %s3215_s25), 0  ;;  %p5044_p1 = scmp.gt.s32.totalorder %s3975_s16, 9 }
 0xe49   : > { %v1846_v48 = vmul.f32 %v3442_v7, %v1845_v45  ;;  %s3216_s13 = sshll.u32 %s5134_s25, 3 }
 0xe4a   : > { %s1985_s20 = sshra.s32 %s3216_s13, 3 }
 0xe4b   : > { %v1847_v21 = vadd.f32 %v3442_v7, %v1846_v48  ;;  %s3282_s27 = sshll.u32 %s1985_s20, 4 }
 0xe4c   : > { %s4450_s28 = scalar_lea.vmem [#allocation2], %s3282_s27 }
 0xe4d   : > { %v1851_v23 = vsel %vm1850_vm2, %v3442_v7, %v1847_v21  ;;  %v1787_v7 = vsub.f32 1.0, %v1774_v18  ;;  %s2263_s20 = scalar_select %p5045_p9, 1, 0 }
 0xe4e   : > { %v1856_v25 = vsel %vm1853_vm3, %v1855_v24, %v1851_v23 }
 0xe9b   : > { %v1778_v5 = vpop.permute.xlu0 %1777 }
 0xe9c   : > { %v1780_v63 = vmul.f32 %v1778_v5, %v1774_v18 }
 0xe9e   : > { %1782 = vrot.lane.b32.xlu2 %v1780_v63, %s5082_s30 }
 0xea3   : > { %v1874_v3 = vpop.permute.xlu0 %1873 }
 0xea4   : > { %v1876_v33 = vmul.f32 %v1874_v3, %v1856_v25 }
 0xea6   : > { %1878 = vrot.lane.b32.xlu1 %v1876_v33, %s5082_s30 }
 0xef8   : > { %v1783_v26 = vpop.permute.xlu2 %1782 }
 0xef9   : > { %v1785_v27 = vadd.f32 %v1783_v26, %v1730_v11 }
 0xefb   : > { %3443 = vtanh.f32 %v1785_v27 }
 0xf01   : > { %v3444_v28 = vpop.eup %3443 }
 0xf02   : > { %1789 = vrot.lane.b32.xlu2 %v3444_v28, %s5077_s19 }
 0xf18   : > { %v1879_v44 = vpop.permute.xlu1 %1878 }
 0xf19   : > { %v1881_v29 = vadd.f32 %v1879_v44, %v1805_v39 }
 0xf1b   : > { %3445 = vtanh.f32 %v1881_v29 }
 0xf1c   : > { %3447 = vpow2.f32 %v3210_v4 }
 0xf21   : > { %v3446_v43 = vpop.eup %3445 }
 0xf22   : > { %1885 = vrot.lane.b32.xlu1 %v3446_v43, %s5077_s19  ;;  %v3448_v5 = vpop.eup %3447 }
 0xf23   : > { %v1842_v18 = vadd.f32 1.0, %v3448_v5 }
 0xf25   : > { %3449 = vrcp.f32 %v1842_v18  ;;  %vm1863_vm7 = vweird.f32 %v1842_v18  ;;  %v1867_v23 = vand.u32 2147483647, %v1842_v18 }
 0xf27   : > { %vm1868_vm11 = vcmp.eq.f32.partialorder %v1867_v23, 8.507059e+37 }
 0xf2b   : > { %v3450_v34 = vpop.eup %3449 }
 0xf2c   : > { %v1859_v63 = vmul.f32 %v3450_v34, %v1842_v18  ;;  %vm1864_vm6 = vweird.f32 %v3450_v34 }
 0xf2d   : > { %vm1865_vm10 = vmor %vm1863_vm7, %vm1864_vm6 }
 0xf2e   : > { %v1860_v21 = vsub.f32 1.0, %v1859_v63 }
 0xf30   : > { %v1861_v51 = vmul.f32 %v3450_v34, %v1860_v21 }
 0xf32   : > { %v1862_v22 = vadd.f32 %v3450_v34, %v1861_v51 }
 0xf34   : > { %v1866_v24 = vsel %vm1865_vm10, %v3450_v34, %v1862_v22 }
 0xf5c   : > { %v1790_v52 = vpop.permute.xlu2 %1789 }
 0xf5d   : > { %v1792_v11 = vmul.f32 %v1790_v52, %v1787_v7  ;;  %v1990_v7 = vld [vmem:[%s4450_s28] sm:$0xff] }
 0xf5f   : > { %v4405_v58 = vadd.f32 %v1793_v15, %v1792_v11 }
 0xf61   : > { %v4411_v1 = vsel %vm4400_vm5, %v4405_v58, %v4346_v59  ;;  %v1894_v48 = vsel %vm4400_vm5, %v4405_v58, 0.0  ;;  %v1869_v59 = vand.u32 2147483648, %v1842_v18 }
 0xf62   : > { %1918 = vrot.lane.b32.xlu0 %v4411_v1, %s5077_s19 }
 0xf63   : > { %v1870_v3 = vor.u32 1.1754944e-38, %v1869_v59 }
 0xf65   : > { %v1871_v25 = vsel %vm1868_vm11, %v1870_v3, %v1866_v24 }
 0xf66   : > { %v1883_v33 = vsub.f32 1.0, %v1871_v25  ;;  %v1889_v27 = vmul.f32 %v1871_v25, %v4360_v36 }
 0xf94   : > { %v1886_v26 = vpop.permute.xlu1 %1885 }
 0xf95   : > { %v1888_v28 = vmul.f32 %v1886_v26, %v1883_v33 }
 0xf97   : > { %v4419_v39 = vadd.f32 %v1889_v27, %v1888_v28 }
 0xf99   : > { %v4425_v44 = vsel %vm4400_vm5, %v4419_v39, %v4360_v36  ;;  %v1903_v29 = vsel %vm4400_vm5, %v4419_v39, 0.0 }
 0xf9a   : > { %3219 = vmatmul.msk.f32.vlgmr.msrb.gmra.mxu3 %vm437_vm0, %v4425_v44 }
 0xf9b   : > { %2379 = vmatpush.msrb.mxu3 %v4135_v38 }
 0xf9d   : > { %2380 = vmatpush.msrb.mxu3 %v4142_v40 }
 0xf9f   : > { %2381 = vmatpush.msrb.mxu3 %v4154_v41 }
 0xfa1   : > { %2382 = vmatpush.msrb.mxu3 %v4236_v12 }
 0xfd4   : > { %v1919_v43 = vpop.permute.xlu0 %1918 }
 0xfd5   : > { %3213 = vmatmul.msk.f32.vlgmr.msrb.gmra.mxu2 %vm437_vm0, %v1919_v43 }
 0xfd6   : > { %2306 = vmatpush.msrb.mxu2 %v4148_v17  ;;  %v1916_v17 = vld [vmem:[#allocation2 + $0x70] sm:$0xff] }
 0xfd8   : > { %2307 = vmatpush.msrb.mxu2 %v4160_v30 }
 0xfda   : > { %2308 = vmatpush.msrb.mxu2 %v4167_v31 }
 0xfdc   : > { %2309 = vmatpush.msrb.mxu2 %v4173_v42 }
0x101d   : > { %v2012_v36 = vpop.f32.mrf.mxu3 }
0x101e   : > { %v2013_v38 = vadd.f32 %v4247_v13, %v2012_v36 }
0x1020   : > { %2059 = vrot.lane.b32.xlu1 %v2013_v38, %s5076_s29  ;;  %2016 = vrot.lane.b32.xlu0 %v2013_v38, %s5077_s19 }
0x1058   : > { %v1939_v40 = vpop.f32.mrf.mxu2 }
0x1059   : > { %v1940_v41 = vadd.f32 %v4254_v20, %v1939_v40 }
0x105b   : > { %1963 = vrot.lane.b32.xlu2 %v1940_v41, %s5082_s30  ;;  %v1942_v30 = vadd.f32 %v1940_v41, %v1916_v17 }
0x105d   : > { %v3214_v31 = vmul.f32 -1.442695, %v1942_v30 }
0x105f   : > { %3451 = vpow2.f32 %v3214_v31 }
0x1065   : > { %v3452_v42 = vpop.eup %3451 }
0x1066   : > { %v1946_v15 = vadd.f32 1.0, %v3452_v42 }
0x1068   : > { %v1958_v27 = vand.u32 2147483648, %v1946_v15  ;;  %vm1952_vm7 = vweird.f32 %v1946_v15  ;;  %v1956_v36 = vand.u32 2147483647, %v1946_v15 }
0x106a   : > { %v1959_v41 = vor.u32 1.1754944e-38, %v1958_v27  ;;  %vm1957_vm11 = vcmp.eq.f32.partialorder %v1956_v36, 8.507059e+37 }
0x1092   : > { %v2017_v19 = vpop.permute.xlu0 %2016  ;;  %v2060_v28 = vpop.permute.xlu1 %2059 }
0x1093   : > { %v2019_v52 = vadd.f32 %v2017_v19, %v1990_v7 }
0x1095   : > { %v3220_v11 = vmul.f32 -1.442695, %v2019_v52 }
0x1097   : > { %3453 = vpow2.f32 %v3220_v11 }
0x1098   : > { %3455 = vrcp.f32 %v1946_v15 }
0x109d   : > { %v3454_v55 = vpop.eup %3453 }
0x109e   : > { %v2027_v4 = vadd.f32 1.0, %v3454_v55  ;;  %v3456_v5 = vpop.eup %3455 }
0x109f   : > { %v1948_v18 = vmul.f32 %v3456_v5, %v1946_v15  ;;  %vm1953_vm3 = vweird.f32 %v3456_v5  ;;  %v1991_v15 = vld [vmem:[%s4450_s28 + $0x8] sm:$0xff]  ;;  %s2077_s28 = scalar_select %p5046_p3, 1, 0 }
0x10a0   : > { %3457 = vrcp.f32 %v2027_v4  ;;  %v2040_v22 = vand.u32 2147483648, %v2027_v4  ;;  %v2038_v24 = vand.u32 2147483647, %v2027_v4  ;;  %vm2034_vm14 = vweird.f32 %v2027_v4  ;;  %vm1954_vm10 = vmor %vm1952_vm7, %vm1953_vm3 }
0x10a1   : > { %v1949_v63 = vsub.f32 1.0, %v1948_v18  ;;  %v2020_v18 = vadd.f32 %v2017_v19, %v1991_v15  ;;  %v2078_v27 = vstv %s2077_s28  ;;  %s2171_s28 = sshra.s32 %s3227_s15, 3 }
0x10a2   : > { %v2041_v25 = vor.u32 1.1754944e-38, %v2040_v22  ;;  %vm2039_vm6 = vcmp.eq.f32.partialorder %v2038_v24, 8.507059e+37  ;;  %s3283_s13 = sshll.u32 %s2171_s28, 4 }
0x10a3   : > { %v1950_v59 = vmul.f32 %v3456_v5, %v1949_v63  ;;  %s4544_s26 = scalar_lea.vmem [#allocation2], %s3283_s13 }
0x10a5   : > { %v1951_v33 = vadd.f32 %v3456_v5, %v1950_v59 }
0x10a6   : > { %v3458_v34 = vpop.eup %3457 }
0x10a7   : > { %v2030_v21 = vmul.f32 %v3458_v34, %v2027_v4  ;;  %vm2035_vm12 = vweird.f32 %v3458_v34  ;;  %v1955_v40 = vsel %vm1954_vm10, %v3456_v5, %v1951_v33 }
0x10a8   : > { %vm2036_vm2 = vmor %vm2034_vm14, %vm2035_vm12  ;;  %v1960_v31 = vsel %vm1957_vm11, %v1959_v41, %v1955_v40 }
0x10a9   : > { %v2031_v51 = vsub.f32 1.0, %v2030_v21  ;;  %v1973_v41 = vsub.f32 1.0, %v1960_v31 }
0x10ab   : > { %v2032_v23 = vmul.f32 %v3458_v34, %v2031_v51 }
0x10ad   : > { %v2033_v3 = vadd.f32 %v3458_v34, %v2032_v23 }
0x10af   : > { %v2037_v26 = vsel %vm2036_vm2, %v3458_v34, %v2033_v3  ;;  %v3221_v34 = vmul.f32 -1.442695, %v2020_v18 }
0x10b0   : > { %v2042_v43 = vsel %vm2039_vm6, %v2041_v25, %v2037_v26  ;;  %vm4462_vm6 = vcmp.eq.s32.totalorder %v2078_v27, 1 }
0x10b1   : > { %v2062_v38 = vmul.f32 %v2060_v28, %v2042_v43 }
0x10b3   : > { %2064 = vrot.lane.b32.xlu0 %v2062_v38, %s5082_s30 }
0x10b5   : > { %v1964_v30 = vpop.permute.xlu2 %1963 }
0x10b6   : > { %v1966_v42 = vmul.f32 %v1964_v30, %v1960_v31 }
0x10b8   : > { %1968 = vrot.lane.b32.xlu2 %v1966_v42, %s5082_s30 }
0x1112   : > { %v1969_v7 = vpop.permute.xlu2 %1968 }
0x1113   : > { %v1971_v52 = vadd.f32 %v1969_v7, %v1916_v17 }
0x1115   : > { %3459 = vtanh.f32 %v1971_v52  ;;  %v1979_v52 = vmul.f32 %v1960_v31, %v4411_v1 }
0x111b   : > { %v3460_v11 = vpop.eup %3459 }
0x111c   : > { %1975 = vrot.lane.b32.xlu1 %v3460_v11, %s5077_s19 }
0x1125   : > { %v2065_v55 = vpop.permute.xlu0 %2064 }
0x1126   : > { %v2067_v4 = vadd.f32 %v2065_v55, %v1991_v15  ;;  %v4483_v15 = vld [vmem:[%s5068_s6 + $0x18] sm:$0xff] }
0x1128   : > { %3461 = vtanh.f32 %v2067_v4 }
0x1129   : > { %3463 = vpow2.f32 %v3221_v34  ;;  %v4522_v34 = vld [vmem:[%s5067_s4 + $0x10] sm:$0xff] }
0x112e   : > { %v3462_v5 = vpop.eup %3461 }
0x112f   : > { %2071 = vrot.lane.b32.xlu2 %v3462_v5, %s5077_s19  ;;  %v3464_v63 = vpop.eup %3463  ;;  %v4508_v5 = vld [vmem:[%s5068_s6 + $0x8] sm:$0xff] }
0x1130   : > { %v2028_v21 = vadd.f32 1.0, %v3464_v63  ;;  %v4534_v63 = vld [vmem:[%s5067_s4] sm:$0xff] }
0x1132   : > { %3465 = vrcp.f32 %v2028_v21  ;;  %v2055_v24 = vand.u32 2147483648, %v2028_v21  ;;  %vm2049_vm14 = vweird.f32 %v2028_v21  ;;  %v2053_v3 = vand.u32 2147483647, %v2028_v21 }
0x1134   : > { %v2056_v33 = vor.u32 1.1754944e-38, %v2055_v24  ;;  %vm2054_vm3 = vcmp.eq.f32.partialorder %v2053_v3, 8.507059e+37 }
0x1138   : > { %v3466_v17 = vpop.eup %3465 }
0x1139   : > { %v2045_v51 = vmul.f32 %v3466_v17, %v2028_v21  ;;  %vm2050_vm12 = vweird.f32 %v3466_v17 }
0x113a   : > { %vm2051_vm2 = vmor %vm2049_vm14, %vm2050_vm12 }
0x113b   : > { %v2046_v22 = vsub.f32 1.0, %v2045_v51  ;;  %v2176_v51 = vld [vmem:[%s4544_s26] sm:$0xff] }
0x113d   : > { %v2047_v59 = vmul.f32 %v3466_v17, %v2046_v22 }
0x113f   : > { %v2048_v23 = vadd.f32 %v3466_v17, %v2047_v59 }
0x1141   : > { %v2052_v25 = vsel %vm2051_vm2, %v3466_v17, %v2048_v23 }
0x1142   : > { %v2057_v19 = vsel %vm2054_vm3, %v2056_v33, %v2052_v25 }
0x1143   : > { %v2069_v26 = vsub.f32 1.0, %v2057_v19  ;;  %v2075_v43 = vmul.f32 %v2057_v19, %v4425_v44 }
0x1189   : > { %v2072_v28 = vpop.permute.xlu2 %2071 }
0x118a   : > { %v2074_v36 = vmul.f32 %v2072_v28, %v2069_v26 }
0x118c   : > { %v4466_v40 = vadd.f32 %v2075_v43, %v2074_v36 }
0x118e   : > { %v1976_v30 = vpop.permute.xlu1 %1975  ;;  %v4472_v42 = vsel %vm4462_vm6, %v4466_v40, %v4425_v44  ;;  %v2089_v7 = vsel %vm4462_vm6, %v4466_v40, 0.0  ;;  %v4491_v44 = vld [vmem:[%s5068_s6 + $0x10] sm:$0xff] }
0x118f   : > { %v1978_v11 = vmul.f32 %v1976_v30, %v1973_v41  ;;  %3230 = vmatmul.msk.f32.vlgmr.msra.gmra.mxu3 %vm437_vm0, %v4472_v42 }
0x1190   : > { %2565 = vmatpush.msra.mxu3 %v4483_v15 }
0x1191   : > { %v4486_v55 = vadd.f32 %v1979_v52, %v1978_v11 }
0x1192   : > { %2566 = vmatpush.msra.mxu3 %v4491_v44 }
0x1193   : > { %v4498_v31 = vsel %vm4462_vm6, %v4486_v55, %v4411_v1  ;;  %v2080_v4 = vsel %vm4462_vm6, %v4486_v55, 0.0  ;;  %v4516_v1 = vld [vmem:[%s5067_s4 + $0x18] sm:$0xff] }
0x1194   : > { %2104 = vrot.lane.b32.xlu0 %v4498_v31, %s5077_s19  ;;  %2567 = vmatpush.msra.mxu3 %v4508_v5 }
0x1196   : > { %2568 = vmatpush.msra.mxu3 %v4236_v12  ;;  %v4528_v12 = vld [vmem:[%s5067_s4 + $0x8] sm:$0xff] }
0x1206   : > { %v2105_v18 = vpop.permute.xlu0 %2104 }
0x1207   : > { %3224 = vmatmul.msk.f32.vlgmr.msra.gmra.mxu2 %vm437_vm0, %v2105_v18  ;;  %v2102_v18 = vld [vmem:[#allocation2 + $0x80] sm:$0xff] }
0x1208   : > { %2492 = vmatpush.msra.mxu2 %v4516_v1 }
0x120a   : > { %2493 = vmatpush.msra.mxu2 %v4522_v34 }
0x120c   : > { %2494 = vmatpush.msra.mxu2 %v4528_v12 }
0x120e   : > { %2495 = vmatpush.msra.mxu2 %v4534_v63 }
0x1212   : > { %v2198_v21 = vpop.f32.mrf.mxu3 }
0x1213   : > { %v2199_v17 = vadd.f32 %v4247_v13, %v2198_v21 }
0x1215   : > { %2245 = vrot.lane.b32.xlu0 %v2199_v17, %s5076_s29  ;;  %2202 = vrot.lane.b32.xlu1 %v2199_v17, %s5077_s19 }
0x1287   : > { %v2203_v22 = vpop.permute.xlu1 %2202  ;;  %v2246_v52 = vpop.permute.xlu0 %2245 }
0x1288   : > { %v2205_v59 = vadd.f32 %v2203_v22, %v2176_v51 }
0x128a   : > { %v3231_v23 = vmul.f32 -1.442695, %v2205_v59  ;;  %v2125_v13 = vpop.f32.mrf.mxu2 }
0x128b   : > { %v2126_v24 = vadd.f32 %v4254_v20, %v2125_v13 }
0x128c   : > { %3467 = vpow2.f32 %v3231_v23 }
0x128d   : > { %2149 = vrot.lane.b32.xlu2 %v2126_v24, %s5082_s30  ;;  %v2128_v21 = vadd.f32 %v2126_v24, %v2102_v18 }
0x128f   : > { %v3225_v17 = vmul.f32 -1.442695, %v2128_v21 }
0x1292   : > { %v3468_v3 = vpop.eup %3467 }
0x1293   : > { %v2213_v25 = vadd.f32 1.0, %v3468_v3 }
0x1295   : > { %3469 = vrcp.f32 %v2213_v25  ;;  %v2226_v27 = vand.u32 2147483648, %v2213_v25  ;;  %v2224_v43 = vand.u32 2147483647, %v2213_v25  ;;  %vm2220_vm10 = vweird.f32 %v2213_v25 }
0x1296   : > { %3471 = vpow2.f32 %v3225_v17 }
0x1297   : > { %v2227_v41 = vor.u32 1.1754944e-38, %v2226_v27  ;;  %vm2225_vm12 = vcmp.eq.f32.partialorder %v2224_v43, 8.507059e+37 }
0x129b   : > { %v3470_v33 = vpop.eup %3469 }
0x129c   : > { %v2216_v19 = vmul.f32 %v3470_v33, %v2213_v25  ;;  %vm2221_vm7 = vweird.f32 %v3470_v33  ;;  %v3472_v51 = vpop.eup %3471 }
0x129d   : > { %vm2222_vm11 = vmor %vm2220_vm10, %vm2221_vm7  ;;  %v2132_v59 = vadd.f32 1.0, %v3472_v51 }
0x129e   : > { %v2217_v26 = vsub.f32 1.0, %v2216_v19 }
0x129f   : > { %3473 = vrcp.f32 %v2132_v59  ;;  %vm2138_vm2 = vweird.f32 %v2132_v59 }
0x12a0   : > { %v2218_v28 = vmul.f32 %v3470_v33, %v2217_v26  ;;  %v2142_v26 = vand.u32 2147483647, %v2132_v59 }
0x12a2   : > { %v2219_v36 = vadd.f32 %v3470_v33, %v2218_v28  ;;  %vm2143_vm7 = vcmp.eq.f32.partialorder %v2142_v26, 8.507059e+37 }
0x12a4   : > { %v2223_v30 = vsel %vm2222_vm11, %v3470_v33, %v2219_v36  ;;  %v2144_v33 = vand.u32 2147483648, %v2132_v59 }
0x12a5   : > { %v2228_v20 = vsel %vm2225_vm12, %v2227_v41, %v2223_v30  ;;  %v3474_v23 = vpop.eup %3473  ;;  %v2177_v41 = vld [vmem:[%s4544_s26 + $0x8] sm:$0xff]  ;;  %s3237_s26 = sadd.s32 4294967286, %s3975_s16 }
0x12a6   : > { %v2248_v11 = vmul.f32 %v2246_v52, %v2228_v20  ;;  %v2134_v13 = vmul.f32 %v3474_v23, %v2132_v59  ;;  %vm2139_vm14 = vweird.f32 %v3474_v23  ;;  %v2145_v28 = vor.u32 1.1754944e-38, %v2144_v33  ;;  %p2354_p11 = scmp.gt.s32.totalorder %s3237_s26, 0 }
0x12a7   : > { %vm2140_vm3 = vmor %vm2138_vm2, %vm2139_vm14 }
0x12a8   : > { %2250 = vrot.lane.b32.xlu2 %v2248_v11, %s5082_s30  ;;  %v2135_v3 = vsub.f32 1.0, %v2134_v13  ;;  %v2206_v11 = vadd.f32 %v2203_v22, %v2177_v41  ;;  %s5138_s26 = smov (!%p2354_p11, %s3237_s26), 0  ;;  %p5043_p11 = scmp.gt.s32.totalorder %s3975_s16, 10 }
0x12aa   : > { %v2136_v25 = vmul.f32 %v3474_v23, %v2135_v3  ;;  %v3232_v21 = vmul.f32 -1.442695, %v2206_v11 }
0x12ac   : > { %v2137_v19 = vadd.f32 %v3474_v23, %v2136_v25 }
0x12ae   : > { %v2141_v27 = vsel %vm2140_vm3, %v3474_v23, %v2137_v19 }
0x12af   : > { %v2146_v43 = vsel %vm2143_vm7, %v2145_v28, %v2141_v27 }
0x12e7   : > { %v2150_v24 = vpop.permute.xlu2 %2149 }
0x12e8   : > { %v2152_v36 = vmul.f32 %v2150_v24, %v2146_v43 }
0x12ea   : > { %2154 = vrot.lane.b32.xlu1 %v2152_v36, %s5082_s30 }
0x1302   : > { %v2251_v30 = vpop.permute.xlu2 %2250 }
0x1303   : > { %v2253_v20 = vadd.f32 %v2251_v30, %v2177_v41  ;;  %v2264_v41 = vstv %s2263_s20  ;;  %s3238_s20 = sshll.u32 %s5138_s26, 3 }
0x1304   : > { %vm4558_vm2 = vcmp.eq.s32.totalorder %v2264_v41, 1  ;;  %s2357_s27 = sshra.s32 %s3238_s20, 3 }
0x1305   : > { %3475 = vtanh.f32 %v2253_v20  ;;  %s3284_s15 = sshll.u32 %s2357_s27, 4 }
0x1306   : > { %3477 = vpow2.f32 %v3232_v21  ;;  %s4606_s28 = scalar_lea.vmem [#allocation2], %s3284_s15  ;;  %s3248_s15 = sadd.s32 4294967285, %s3975_s16 }
0x1307   : > { %s2449_s27 = scalar_select %p5044_p1, 1, 0 }
0x1308   : > { %p2540_p7 = scmp.gt.s32.totalorder %s3248_s15, 0 }
0x130a   : > { %s5140_s15 = smov (!%p2540_p7, %s3248_s15), 0 }
0x130b   : > { %v3476_v52 = vpop.eup %3475 }
0x130c   : > { %2257 = vrot.lane.b32.xlu1 %v3476_v52, %s5077_s19  ;;  %v3478_v17 = vpop.eup %3477 }
0x130d   : > { %v2214_v51 = vadd.f32 1.0, %v3478_v17 }
0x130f   : > { %3479 = vrcp.f32 %v2214_v51  ;;  %v2241_v22 = vand.u32 2147483648, %v2214_v51  ;;  %vm2235_vm11 = vweird.f32 %v2214_v51  ;;  %v2239_v27 = vand.u32 2147483647, %v2214_v51 }
0x1311   : > { %v2242_v24 = vor.u32 1.1754944e-38, %v2241_v22  ;;  %vm2240_vm14 = vcmp.eq.f32.partialorder %v2239_v27, 8.507059e+37 }
0x1315   : > { %v3480_v13 = vpop.eup %3479 }
0x1316   : > { %v2231_v25 = vmul.f32 %v3480_v13, %v2214_v51  ;;  %vm2236_vm10 = vweird.f32 %v3480_v13  ;;  %v3549_v51 = vld [vmem:[%s5068_s6] sm:$0xff]  ;;  %s3157_s6 = sshll.u32 %s5146_s18, 3 }
0x1317   : > { %vm2237_vm12 = vmor %vm2235_vm11, %vm2236_vm10 }
0x1318   : > { %v2232_v19 = vsub.f32 1.0, %v2231_v25 }
0x131a   : > { %v2233_v33 = vmul.f32 %v3480_v13, %v2232_v19  ;;  %v2362_v19 = vld [vmem:[%s4606_s28] sm:$0xff] }
0x131c   : > { %v2234_v26 = vadd.f32 %v3480_v13, %v2233_v33 }
0x131e   : > { %v2238_v28 = vsel %vm2237_vm12, %v3480_v13, %v2234_v26  ;;  %v2165_v13 = vmul.f32 %v2146_v43, %v4498_v31 }
0x135c   : > { %v2155_v59 = vpop.permute.xlu1 %2154 }
0x135d   : > { %v2157_v23 = vadd.f32 %v2155_v59, %v2102_v18  ;;  %v2243_v18 = vsel %vm2240_vm14, %v2242_v24, %v2238_v28  ;;  %v2159_v59 = vsub.f32 1.0, %v2146_v43 }
0x135e   : > { %v2255_v36 = vsub.f32 1.0, %v2243_v18  ;;  %v2261_v20 = vmul.f32 %v2243_v18, %v4472_v42 }
0x135f   : > { %3481 = vtanh.f32 %v2157_v23 }
0x1365   : > { %v3482_v3 = vpop.eup %3481 }
0x1366   : > { %2161 = vrot.lane.b32.xlu0 %v3482_v3, %s5077_s19 }
0x137e   : > { %v2258_v30 = vpop.permute.xlu1 %2257 }
0x137f   : > { %v2260_v52 = vmul.f32 %v2258_v30, %v2255_v36  ;;  %v4612_v36 = vld [vmem:[%s5071_s5] ss:$0 sm:$0xff] }
0x1381   : > { %v4562_v21 = vadd.f32 %v2261_v20, %v2260_v52 }
0x1383   : > { %v4568_v17 = vsel %vm4558_vm2, %v4562_v21, %v4472_v42  ;;  %v2275_v8 = vsel %vm4558_vm2, %v4562_v21, 0.0 }
0x1384   : > { %3241 = vmatmul.msk.f32.vlgmr.msrb.gmra.mxu3 %vm437_vm0, %v4568_v17 }
0x1385   : > { %2751 = vmatpush.msrb.mxu3 %v4483_v15 }
0x1387   : > { %2752 = vmatpush.msrb.mxu3 %v4491_v44 }
0x1389   : > { %2753 = vmatpush.msrb.mxu3 %v4508_v5  ;;  %v4592_v5 = vld [vmem:[%s5072_s7] ss:$0 sm:$0xff] }
0x138b   : > { %2754 = vmatpush.msrb.mxu3 %v3549_v51 }
0x13d8   : > { %v2162_v23 = vpop.permute.xlu0 %2161 }
0x13d9   : > { %v2164_v42 = vmul.f32 %v2162_v23, %v2159_v59 }
0x13db   : > { %v4579_v3 = vadd.f32 %v2165_v13, %v2164_v42  ;;  %v2288_v13 = vld [vmem:[#allocation2 + $0x90] sm:$0xff] }
0x13dd   : > { %v4585_v15 = vsel %vm4558_vm2, %v4579_v3, %v4498_v31 }
0x13de   : > { %2290 = vrot.lane.b32.xlu2 %v4585_v15, %s5077_s19 }
0x1407   : > { %v2384_v44 = vpop.f32.mrf.mxu3 }
0x1408   : > { %v2385_v43 = vadd.f32 %v4592_v5, %v2384_v44 }
0x140a   : > { %2388 = vrot.lane.b32.xlu0 %v2385_v43, %s5077_s19  ;;  %2431 = vrot.lane.b32.xlu2 %v2385_v43, %s5076_s29 }
0x1438   : > { %v2291_v25 = vpop.permute.xlu2 %2290 }
0x1439   : > { %3235 = vmatmul.msk.f32.vlgmr.msrb.gmra.mxu2 %vm437_vm0, %v2291_v25 }
0x143a   : > { %2678 = vmatpush.msrb.mxu2 %v4516_v1 }
0x143c   : > { %2679 = vmatpush.msrb.mxu2 %v4522_v34 }
0x143e   : > { %2680 = vmatpush.msrb.mxu2 %v4528_v12 }
0x1440   : > { %2681 = vmatpush.msrb.mxu2 %v4534_v63 }
0x1464   : > { %v2432_v59 = vpop.permute.xlu2 %2431 }
0x147c   : > { %v2389_v31 = vpop.permute.xlu0 %2388 }
0x147d   : > { %v2391_v1 = vadd.f32 %v2389_v31, %v2362_v19 }
0x147f   : > { %v3242_v33 = vmul.f32 -1.442695, %v2391_v1 }
0x1481   : > { %3483 = vpow2.f32 %v3242_v33 }
0x1487   : > { %v3484_v34 = vpop.eup %3483 }
0x1488   : > { %v2399_v12 = vadd.f32 1.0, %v3484_v34 }
0x148a   : > { %3485 = vrcp.f32 %v2399_v12  ;;  %v2412_v18 = vand.u32 2147483648, %v2399_v12  ;;  %vm2406_vm7 = vweird.f32 %v2399_v12  ;;  %v2410_v30 = vand.u32 2147483647, %v2399_v12 }
0x148c   : > { %v2413_v52 = vor.u32 1.1754944e-38, %v2412_v18  ;;  %vm2411_vm11 = vcmp.eq.f32.partialorder %v2410_v30, 8.507059e+37 }
0x1490   : > { %v3486_v63 = vpop.eup %3485 }
0x1491   : > { %v2402_v26 = vmul.f32 %v3486_v63, %v2399_v12  ;;  %vm2407_vm3 = vweird.f32 %v3486_v63 }
0x1492   : > { %vm2408_vm10 = vmor %vm2406_vm7, %vm2407_vm3 }
0x1493   : > { %v2403_v22 = vsub.f32 1.0, %v2402_v26 }
0x1495   : > { %v2404_v27 = vmul.f32 %v3486_v63, %v2403_v22 }
0x1497   : > { %v2405_v28 = vadd.f32 %v3486_v63, %v2404_v27 }
0x1499   : > { %v2409_v20 = vsel %vm2408_vm10, %v3486_v63, %v2405_v28 }
0x149a   : > { %v2414_v51 = vsel %vm2411_vm11, %v2413_v52, %v2409_v20 }
0x149b   : > { %v2434_v23 = vmul.f32 %v2432_v59, %v2414_v51 }
0x14bc   : > { %v2311_v24 = vpop.f32.mrf.mxu2 }
0x14bd   : > { %v2312_v41 = vadd.f32 %v4612_v36, %v2311_v24 }
0x14bf   : > { %2335 = vrot.lane.b32.xlu1 %v2312_v41, %s5082_s30  ;;  %v2314_v42 = vadd.f32 %v2312_v41, %v2288_v13  ;;  %v2363_v41 = vld [vmem:[%s4606_s28 + $0x8] sm:$0xff]  ;;  %s3249_s28 = sshll.u32 %s5140_s15, 3 }
0x14c0   : > { %v2392_v51 = vadd.f32 %v2389_v31, %v2363_v41  ;;  %s2543_s13 = sshra.s32 %s3249_s28, 3 }
0x14c1   : > { %v3236_v44 = vmul.f32 -1.442695, %v2314_v42  ;;  %s3285_s20 = sshll.u32 %s2543_s13, 4  ;;  %s3259_s13 = sadd.s32 4294967284, %s3975_s16 }
0x14c2   : > { %v3243_v59 = vmul.f32 -1.442695, %v2392_v51  ;;  %s2635_s28 = scalar_select %p5043_p11, 1, 0 }
0x14c3   : > { %3487 = vpow2.f32 %v3236_v44  ;;  %p2726_p7 = scmp.gt.s32.totalorder %s3259_s13, 0 }
0x14c5   : > { %s5142_s13 = smov (!%p2726_p7, %s3259_s13), 0  ;;  %p5040_p7 = scmp.gt.s32.totalorder %s3975_s16, 11 }
0x14c7   : > { %2436 = vrot.lane.b32.xlu1 %v2434_v23, %s5082_s30 }
0x14c9   : > { %v3488_v43 = vpop.eup %3487 }
0x14ca   : > { %v2318_v25 = vadd.f32 1.0, %v3488_v43 }
0x14cc   : > { %3489 = vrcp.f32 %v2318_v25  ;;  %v2330_v63 = vand.u32 2147483648, %v2318_v25  ;;  %vm2324_vm14 = vweird.f32 %v2318_v25  ;;  %v2328_v26 = vand.u32 2147483647, %v2318_v25 }
0x14ce   : > { %v2331_v27 = vor.u32 1.1754944e-38, %v2330_v63  ;;  %vm2329_vm7 = vcmp.eq.f32.partialorder %v2328_v26, 8.507059e+37 }
0x14d2   : > { %v3490_v19 = vpop.eup %3489 }
0x14d3   : > { %v2320_v1 = vmul.f32 %v3490_v19, %v2318_v25  ;;  %vm2325_vm12 = vweird.f32 %v3490_v19 }
0x14d4   : > { %vm2326_vm3 = vmor %vm2324_vm14, %vm2325_vm12 }
0x14d5   : > { %v2321_v33 = vsub.f32 1.0, %v2320_v1 }
0x14d7   : > { %v2322_v34 = vmul.f32 %v3490_v19, %v2321_v33 }
0x14d9   : > { %v2323_v12 = vadd.f32 %v3490_v19, %v2322_v34 }
0x14db   : > { %v2327_v22 = vsel %vm2326_vm3, %v3490_v19, %v2323_v12 }
0x14dc   : > { %v2332_v24 = vsel %vm2329_vm7, %v2331_v27, %v2327_v22 }
0x1531   : > { %v2336_v28 = vpop.permute.xlu1 %2335 }
0x1532   : > { %v2338_v18 = vmul.f32 %v2336_v28, %v2332_v24 }
0x1534   : > { %2340 = vrot.lane.b32.xlu0 %v2338_v18, %s5082_s30  ;;  %v2450_v18 = vstv %s2449_s27  ;;  %s4658_s27 = scalar_lea.vmem [#allocation2], %s3285_s20  ;;  %s3260_s20 = sshll.u32 %s5142_s13, 3 }
0x1535   : > { %vm4625_vm3 = vcmp.eq.s32.totalorder %v2450_v18, 1 }
0x1539   : > { %v2437_v30 = vpop.permute.xlu1 %2436 }
0x153a   : > { %v2439_v20 = vadd.f32 %v2437_v30, %v2363_v41 }
0x153c   : > { %3491 = vtanh.f32 %v2439_v20 }
0x153d   : > { %3493 = vpow2.f32 %v3243_v59  ;;  %v2345_v59 = vsub.f32 1.0, %v2332_v24 }
0x1542   : > { %v3492_v52 = vpop.eup %3491 }
0x1543   : > { %2443 = vrot.lane.b32.xlu0 %v3492_v52, %s5077_s19  ;;  %v3494_v23 = vpop.eup %3493 }
0x1544   : > { %v2400_v42 = vadd.f32 1.0, %v3494_v23 }
0x1546   : > { %3495 = vrcp.f32 %v2400_v42  ;;  %v2427_v12 = vand.u32 2147483648, %v2400_v42  ;;  %vm2421_vm11 = vweird.f32 %v2400_v42  ;;  %v2425_v63 = vand.u32 2147483647, %v2400_v42 }
0x1548   : > { %v2428_v22 = vor.u32 1.1754944e-38, %v2427_v12  ;;  %vm2426_vm14 = vcmp.eq.f32.partialorder %v2425_v63, 8.507059e+37 }
0x154c   : > { %v3496_v44 = vpop.eup %3495 }
0x154d   : > { %v2417_v43 = vmul.f32 %v3496_v44, %v2400_v42  ;;  %vm2422_vm10 = vweird.f32 %v3496_v44  ;;  %v2351_v42 = vmul.f32 %v2332_v24, %v4585_v15 }
0x154e   : > { %vm2423_vm12 = vmor %vm2421_vm11, %vm2422_vm10 }
0x154f   : > { %v2418_v25 = vsub.f32 1.0, %v2417_v43 }
0x1551   : > { %v2419_v1 = vmul.f32 %v3496_v44, %v2418_v25 }
0x1553   : > { %v2420_v34 = vadd.f32 %v3496_v44, %v2419_v1  ;;  %v2548_v1 = vld [vmem:[%s4658_s27] sm:$0xff] }
0x1555   : > { %v2424_v31 = vsel %vm2423_vm12, %v3496_v44, %v2420_v34 }
0x1556   : > { %v2429_v27 = vsel %vm2426_vm14, %v2428_v22, %v2424_v31 }
0x1557   : > { %v2441_v28 = vsub.f32 1.0, %v2429_v27  ;;  %v2447_v41 = vmul.f32 %v2429_v27, %v4568_v17 }
0x15a6   : > { %v2341_v19 = vpop.permute.xlu0 %2340 }
0x15a7   : > { %v2343_v33 = vadd.f32 %v2341_v19, %v2288_v13 }
0x15a9   : > { %3497 = vtanh.f32 %v2343_v33 }
0x15af   : > { %v3498_v26 = vpop.eup %3497 }
0x15b0   : > { %2347 = vrot.lane.b32.xlu2 %v3498_v26, %s5077_s19 }
0x15b5   : > { %v2444_v13 = vpop.permute.xlu0 %2443 }
0x15b6   : > { %v2446_v30 = vmul.f32 %v2444_v13, %v2441_v28 }
0x15b8   : > { %v4629_v52 = vadd.f32 %v2447_v41, %v2446_v30 }
0x15ba   : > { %v4635_v51 = vsel %vm4625_vm3, %v4629_v52, %v4568_v17 }
0x15bb   : > { %3252 = vmatmul.msk.f32.vlgmr.msra.gmra.mxu3 %vm437_vm0, %v4635_v51 }
0x160a   : > { %v2348_v23 = vpop.permute.xlu2 %2347 }
0x160b   : > { %v2350_v44 = vmul.f32 %v2348_v23, %v2345_v59 }
0x160d   : > { %v4640_v43 = vadd.f32 %v2351_v42, %v2350_v44 }
0x160f   : > { %v4646_v25 = vsel %vm4625_vm3, %v4640_v43, %v4585_v15 }
0x1610   : > { %2476 = vrot.lane.b32.xlu1 %v4646_v25, %s5077_s19 }
0x163e   : > { %v2570_v17 = vpop.f32.mrf.mxu3 }
0x163f   : > { %v2571_v19 = vadd.f32 %v4592_v5, %v2570_v17 }
0x1641   : > { %2617 = vrot.lane.b32.xlu1 %v2571_v19, %s5076_s29  ;;  %2574 = vrot.lane.b32.xlu2 %v2571_v19, %s5077_s19  ;;  %v2474_v19 = vld [vmem:[#allocation2 + $0xa0] sm:$0xff] }
0x1682   : > { %v2477_v24 = vpop.permute.xlu1 %2476 }
0x1683   : > { %3246 = vmatmul.msk.f32.vlgmr.msra.gmra.mxu2 %vm437_vm0, %v2477_v24 }
0x169b   : > { %v2575_v15 = vpop.permute.xlu2 %2574 }
0x169c   : > { %v2577_v33 = vadd.f32 %v2575_v15, %v2548_v1 }
0x169e   : > { %v3253_v34 = vmul.f32 -1.442695, %v2577_v33 }
0x16a0   : > { %3499 = vpow2.f32 %v3253_v34 }
0x16a6   : > { %v3500_v12 = vpop.eup %3499 }
0x16a7   : > { %v2585_v63 = vadd.f32 1.0, %v3500_v12 }
0x16a9   : > { %3501 = vrcp.f32 %v2585_v63  ;;  %v2598_v18 = vand.u32 2147483648, %v2585_v63  ;;  %vm2592_vm10 = vweird.f32 %v2585_v63  ;;  %v2596_v41 = vand.u32 2147483647, %v2585_v63 }
0x16ab   : > { %v2599_v23 = vor.u32 1.1754944e-38, %v2598_v18  ;;  %vm2597_vm12 = vcmp.eq.f32.partialorder %v2596_v41, 8.507059e+37 }
0x16af   : > { %v3502_v31 = vpop.eup %3501 }
0x16b0   : > { %v2588_v26 = vmul.f32 %v3502_v31, %v2585_v63  ;;  %vm2593_vm7 = vweird.f32 %v3502_v31 }
0x16b1   : > { %vm2594_vm11 = vmor %vm2592_vm10, %vm2593_vm7 }
0x16b2   : > { %v2589_v22 = vsub.f32 1.0, %v2588_v26 }
0x16b3   : > { %v2618_v44 = vpop.permute.xlu1 %2617 }
0x16b4   : > { %v2590_v27 = vmul.f32 %v3502_v31, %v2589_v22 }
0x16b6   : > { %v2591_v28 = vadd.f32 %v3502_v31, %v2590_v27 }
0x16b8   : > { %v2595_v59 = vsel %vm2594_vm11, %v3502_v31, %v2591_v28 }
0x16b9   : > { %v2600_v42 = vsel %vm2597_vm12, %v2599_v23, %v2595_v59  ;;  %v2549_v23 = vld [vmem:[%s4658_s27 + $0x8] sm:$0xff]  ;;  %s2729_s27 = sshra.s32 %s3260_s20, 3 }
0x16ba   : > { %v2620_v17 = vmul.f32 %v2618_v44, %v2600_v42 }
0x1706   : > { %v2497_v13 = vpop.f32.mrf.mxu2 }
0x1707   : > { %v2498_v30 = vadd.f32 %v4612_v36, %v2497_v13 }
0x1709   : > { %2521 = vrot.lane.b32.xlu0 %v2498_v30, %s5082_s30  ;;  %v2500_v24 = vadd.f32 %v2498_v30, %v2474_v19 }
0x170b   : > { %v3247_v1 = vmul.f32 -1.442695, %v2500_v24  ;;  %v2578_v24 = vadd.f32 %v2575_v15, %v2549_v23 }
0x170d   : > { %3503 = vpow2.f32 %v3247_v1  ;;  %v3254_v1 = vmul.f32 -1.442695, %v2578_v24 }
0x1711   : > { %2622 = vrot.lane.b32.xlu0 %v2620_v17, %s5082_s30 }
0x1713   : > { %v3504_v33 = vpop.eup %3503 }
0x1714   : > { %v2504_v34 = vadd.f32 1.0, %v3504_v33 }
0x1716   : > { %3505 = vrcp.f32 %v2504_v34  ;;  %v2516_v27 = vand.u32 2147483648, %v2504_v34  ;;  %vm2510_vm7 = vweird.f32 %v2504_v34  ;;  %v2514_v28 = vand.u32 2147483647, %v2504_v34 }
0x1718   : > { %v2517_v13 = vor.u32 1.1754944e-38, %v2516_v27  ;;  %vm2515_vm11 = vcmp.eq.f32.partialorder %v2514_v28, 8.507059e+37 }
0x171c   : > { %v3506_v12 = vpop.eup %3505 }
0x171d   : > { %v2506_v63 = vmul.f32 %v3506_v12, %v2504_v34  ;;  %vm2511_vm14 = vweird.f32 %v3506_v12 }
0x171e   : > { %vm2512_vm10 = vmor %vm2510_vm7, %vm2511_vm14 }
0x171f   : > { %v2507_v31 = vsub.f32 1.0, %v2506_v63 }
0x1721   : > { %v2508_v26 = vmul.f32 %v3506_v12, %v2507_v31 }
0x1723   : > { %v2509_v22 = vadd.f32 %v3506_v12, %v2508_v26 }
0x1725   : > { %v2513_v18 = vsel %vm2512_vm10, %v3506_v12, %v2509_v22 }
0x1726   : > { %v2518_v41 = vsel %vm2515_vm11, %v2517_v13, %v2513_v18 }
0x177b   : > { %v2522_v30 = vpop.permute.xlu0 %2521 }
0x177c   : > { %v2524_v59 = vmul.f32 %v2522_v30, %v2518_v41 }
0x177e   : > { %2526 = vrot.lane.b32.xlu2 %v2524_v59, %s5082_s30 }
0x1783   : > { %v2623_v42 = vpop.permute.xlu0 %2622 }
0x1784   : > { %v2625_v44 = vadd.f32 %v2623_v42, %v2549_v23 }
0x1786   : > { %3507 = vtanh.f32 %v2625_v44  ;;  %v2636_v44 = vstv %s2635_s28  ;;  %s3286_s28 = sshll.u32 %s2729_s27, 4 }
0x1787   : > { %3509 = vpow2.f32 %v3254_v1  ;;  %vm4672_vm11 = vcmp.eq.s32.totalorder %v2636_v44, 1  ;;  %s4707_s4 = scalar_lea.vmem [#allocation2], %s3286_s28 }
0x178c   : > { %v3508_v17 = vpop.eup %3507 }
0x178d   : > { %2629 = vrot.lane.b32.xlu2 %v3508_v17, %s5077_s19  ;;  %v3510_v33 = vpop.eup %3509 }
0x178e   : > { %v2586_v34 = vadd.f32 1.0, %v3510_v33 }
0x1790   : > { %3511 = vrcp.f32 %v2586_v34  ;;  %v2613_v18 = vand.u32 2147483648, %v2586_v34  ;;  %vm2607_vm14 = vweird.f32 %v2586_v34  ;;  %v2611_v13 = vand.u32 2147483647, %v2586_v34 }
0x1792   : > { %v2614_v59 = vor.u32 1.1754944e-38, %v2613_v18  ;;  %vm2612_vm10 = vcmp.eq.f32.partialorder %v2611_v13, 8.507059e+37 }
0x1796   : > { %v3512_v12 = vpop.eup %3511 }
0x1797   : > { %v2603_v63 = vmul.f32 %v3512_v12, %v2586_v34  ;;  %vm2608_vm12 = vweird.f32 %v3512_v12 }
0x1798   : > { %vm2609_vm7 = vmor %vm2607_vm14, %vm2608_vm12 }
0x1799   : > { %v2604_v31 = vsub.f32 1.0, %v2603_v63 }
0x179b   : > { %v2605_v22 = vmul.f32 %v3512_v12, %v2604_v31  ;;  %v2537_v31 = vmul.f32 %v2518_v41, %v4646_v25 }
0x179d   : > { %v2606_v28 = vadd.f32 %v3512_v12, %v2605_v22 }
0x179f   : > { %v2610_v15 = vsel %vm2609_vm7, %v3512_v12, %v2606_v28  ;;  %v2531_v12 = vsub.f32 1.0, %v2518_v41 }
0x17a0   : > { %v2615_v23 = vsel %vm2612_vm10, %v2614_v59, %v2610_v15 }
0x17a1   : > { %v2627_v42 = vsub.f32 1.0, %v2615_v23  ;;  %v2633_v17 = vmul.f32 %v2615_v23, %v4635_v51 }
0x17d8   : > { %v2527_v26 = vpop.permute.xlu2 %2526 }
0x17d9   : > { %v2529_v27 = vadd.f32 %v2527_v26, %v2474_v19 }
0x17db   : > { %3513 = vtanh.f32 %v2529_v27 }
0x17e1   : > { %v3514_v30 = vpop.eup %3513 }
0x17e2   : > { %2533 = vrot.lane.b32.xlu1 %v3514_v30, %s5077_s19 }
0x17e7   : > { %v2630_v19 = vpop.permute.xlu2 %2629 }
0x17e8   : > { %v2632_v24 = vmul.f32 %v2630_v19, %v2627_v42 }
0x17ea   : > { %v4676_v33 = vadd.f32 %v2633_v17, %v2632_v24 }
0x17ec   : > { %v4682_v34 = vsel %vm4672_vm11, %v4676_v33, %v4635_v51  ;;  %v2647_v60 = vsel %vm4672_vm11, %v4676_v33, 0.0  ;;  %v964_v33 = vsel %vm4048_vm9, %v4052_v50, 0.0  ;;  %v2852_v50 = vld [vmem:[%s5101_s8] sm:$0xff] }
0x17ed   : > { %3263 = vmatmul.msk.f32.vlgmr.msrb.gmra.mxu3 %vm437_vm0, %v4682_v34 }
0x1854   : > { %v2534_v63 = vpop.permute.xlu1 %2533 }
0x1855   : > { %v2536_v26 = vmul.f32 %v2534_v63, %v2531_v12 }
0x1857   : > { %v4687_v22 = vadd.f32 %v2537_v31, %v2536_v26 }
0x1859   : > { %v4693_v27 = vsel %vm4672_vm11, %v4687_v22, %v4646_v25 }
0x185a   : > { %2662 = vrot.lane.b32.xlu0 %v4693_v27, %s5077_s19 }
0x1870   : > { %v2756_v51 = vpop.f32.mrf.mxu3 }
0x1871   : > { %v2757_v28 = vadd.f32 %v4592_v5, %v2756_v51  ;;  %v2734_v5 = vld [vmem:[%s4707_s4] sm:$0xff] }
0x1873   : > { %2803 = vrot.lane.b32.xlu0 %v2757_v28, %s5076_s29  ;;  %2760 = vrot.lane.b32.xlu1 %v2757_v28, %s5077_s19 }
0x18cc   : > { %v2663_v41 = vpop.permute.xlu0 %2662 }
0x18cd   : > { %3257 = vmatmul.msk.f32.vlgmr.msrb.gmra.mxu2 %vm437_vm0, %v2663_v41 }
0x18e5   : > { %v4705_v25 = vpop.permute.xlu1 %2760  ;;  %v2804_v28 = vpop.permute.xlu0 %2803 }
0x18e6   : > { %v2763_v18 = vadd.f32 %v4705_v25, %v2734_v5  ;;  %v2660_v5 = vld [vmem:[#allocation2 + $0xb0] sm:$0xff] }
0x18e8   : > { %v3264_v13 = vmul.f32 -1.442695, %v2763_v18 }
0x18ea   : > { %3515 = vpow2.f32 %v3264_v13 }
0x18f0   : > { %v3516_v15 = vpop.eup %3515 }
0x18f1   : > { %v2771_v30 = vadd.f32 1.0, %v3516_v15 }
0x18f3   : > { %3517 = vrcp.f32 %v2771_v30  ;;  %v2784_v17 = vand.u32 2147483648, %v2771_v30  ;;  %vm2778_vm14 = vweird.f32 %v2771_v30  ;;  %v2782_v12 = vand.u32 2147483647, %v2771_v30 }
0x18f5   : > { %v2785_v26 = vor.u32 1.1754944e-38, %v2784_v17  ;;  %vm2783_vm10 = vcmp.eq.f32.partialorder %v2782_v12, 8.507059e+37 }
0x18f9   : > { %v3518_v59 = vpop.eup %3517 }
0x18fa   : > { %v2774_v23 = vmul.f32 %v3518_v59, %v2771_v30  ;;  %vm2779_vm12 = vweird.f32 %v3518_v59 }
0x18fb   : > { %vm2780_vm7 = vmor %vm2778_vm14, %vm2779_vm12 }
0x18fc   : > { %v2775_v42 = vsub.f32 1.0, %v2774_v23 }
0x18fe   : > { %v2776_v44 = vmul.f32 %v3518_v59, %v2775_v42 }
0x1900   : > { %v2777_v19 = vadd.f32 %v3518_v59, %v2776_v44 }
0x1902   : > { %v2781_v31 = vsel %vm2780_vm7, %v3518_v59, %v2777_v19 }
0x1903   : > { %v2786_v51 = vsel %vm2783_vm10, %v2785_v26, %v2781_v31 }
0x1904   : > { %v2806_v41 = vmul.f32 %v2804_v28, %v2786_v51  ;;  %v2735_v51 = vld [vmem:[%s4707_s4 + $0x8] sm:$0xff]  ;;  %s2821_s4 = scalar_select %p5040_p7, 1, 0 }
0x1905   : > { %v2764_v10 = vadd.f32 %v4705_v25, %v2735_v51 }
0x1950   : > { %v2683_v24 = vpop.f32.mrf.mxu2 }
0x1951   : > { %v2684_v63 = vadd.f32 %v4612_v36, %v2683_v24 }
0x1953   : > { %2707 = vrot.lane.b32.xlu2 %v2684_v63, %s5082_s30  ;;  %v2686_v18 = vadd.f32 %v2684_v63, %v2660_v5 }
0x1955   : > { %v3258_v13 = vmul.f32 -1.442695, %v2686_v18 }
0x1957   : > { %3519 = vpow2.f32 %v3258_v13  ;;  %v1150_v13 = vsel %vm4105_vm8, %v4109_v6, 0.0  ;;  %v2461_v6 = vsel %vm4625_vm3, %v4629_v52, 0.0 }
0x195b   : > { %2808 = vrot.lane.b32.xlu2 %v2806_v41, %s5082_s30 }
0x195d   : > { %v3520_v15 = vpop.eup %3519 }
0x195e   : > { %v2690_v23 = vadd.f32 1.0, %v3520_v15 }
0x1960   : > { %3521 = vrcp.f32 %v2690_v23  ;;  %v2702_v19 = vand.u32 2147483648, %v2690_v23  ;;  %vm2696_vm14 = vweird.f32 %v2690_v23  ;;  %v2700_v17 = vand.u32 2147483647, %v2690_v23 }
0x1962   : > { %v2703_v12 = vor.u32 1.1754944e-38, %v2702_v19  ;;  %vm2701_vm10 = vcmp.eq.f32.partialorder %v2700_v17, 8.507059e+37  ;;  %v2822_v17 = vstv %s2821_s4 }
0x1963   : > { %vm4758_vm1 = vcmp.eq.s32.totalorder %v2822_v17, 1 }
0x1966   : > { %v3522_v30 = vpop.eup %3521 }
0x1967   : > { %v2692_v36 = vmul.f32 %v3522_v30, %v2690_v23  ;;  %vm2697_vm12 = vweird.f32 %v3522_v30 }
0x1968   : > { %vm2698_vm7 = vmor %vm2696_vm14, %vm2697_vm12 }
0x1969   : > { %v2693_v59 = vsub.f32 1.0, %v2692_v36 }
0x196b   : > { %v2694_v42 = vmul.f32 %v3522_v30, %v2693_v59 }
0x196d   : > { %v2695_v44 = vadd.f32 %v3522_v30, %v2694_v42 }
0x196f   : > { %v2699_v24 = vsel %vm2698_vm7, %v3522_v30, %v2695_v44 }
0x1970   : > { %v4714_v31 = vsel %vm2701_vm10, %v2703_v12, %v2699_v24 }
0x1971   : > { %v2723_v58 = vmul.f32 %v4714_v31, %v4693_v27 }
0x19ad   : > { %v2708_v63 = vpop.permute.xlu2 %2707 }
0x19ae   : > { %v2710_v26 = vmul.f32 %v2708_v63, %v4714_v31 }
0x19b0   : > { %2712 = vrot.lane.b32.xlu1 %v2710_v26, %s5082_s30  ;;  %s3146_s30 = sshll.u32 %s5144_s17, 3 }
0x19b1   : > { %s797_s20 = scalar_lea.vmem %s4018_s21, %s3146_s30  ;;  %s4869_s30 = sand.u32 1, %s3638_s24  }
0x19b2   : > { %s2894_s7 = scalar_lea.sflag [#allocation6], %s4869_s30 }
0x19b5   : > { %v2809_v28 = vpop.permute.xlu2 %2808 }
0x19b6   : > { %v2811_v41 = vadd.f32 %v2809_v28, %v2735_v51 }
0x19b8   : > { %3523 = vtanh.f32 %v2811_v41 }
0x19be   : > { %v3524_v18 = vpop.eup %3523 }
0x19bf   : > { %2815 = vrot.lane.b32.xlu1 %v3524_v18, %s5077_s19  ;;  %v973_v18 = vsel %vm4048_vm9, %v4070_v16, 0.0  ;;  %v2452_v16 = vsel %vm4625_vm3, %v4640_v43, 0.0 }
0x19c7   : > { %794 = vrot.lane.b32.xlu1 %v4005_v53, %s5076_s29  ;;  %v2266_v53 = vsel %vm4558_vm2, %v4579_v3, 0.0 }
0x19cf   : > { %1152 = vrot.lane.b32.xlu1 %v1150_v13, %s5077_s19 }
0x19d7   : > { %1347 = vrot.lane.b32.xlu1 %v1345_v9, %s5076_s29  ;;  %v3265_v9 = vmul.f32 -1.442695, %v2764_v10 }
0x19d9   : > { %3525 = vpow2.f32 %v3265_v9 }
0x19df   : > { %1710 = vrot.lane.b32.xlu1 %v1708_v47, %s5077_s19  ;;  %v3526_v57 = vpop.eup %3525 }
0x19e0   : > { %v2772_v47 = vadd.f32 1.0, %v3526_v57 }
0x19e2   : > { %3527 = vrcp.f32 %v2772_v47  ;;  %v2799_v36 = vand.u32 2147483648, %v2772_v47  ;;  %vm2793_vm14 = vweird.f32 %v2772_v47  ;;  %v2797_v25 = vand.u32 2147483647, %v2772_v47 }
0x19e4   : > { %v2800_v44 = vor.u32 1.1754944e-38, %v2799_v36  ;;  %vm2798_vm10 = vcmp.eq.f32.partialorder %v2797_v25, 8.507059e+37 }
0x19e7   : > { %1905 = vrot.lane.b32.xlu1 %v1903_v29, %s5076_s29 }
0x19e8   : > { %v3528_v39 = vpop.eup %3527 }
0x19e9   : > { %v2789_v29 = vmul.f32 %v3528_v39, %v2772_v47  ;;  %vm2794_vm12 = vweird.f32 %v3528_v39 }
0x19ea   : > { %vm2795_vm7 = vmor %vm2793_vm14, %vm2794_vm12  ;;  %vm798_vm12 = vcmask 523520  }
0x19eb   : > { %v2790_v15 = vsub.f32 1.0, %v2789_v29 }
0x19ed   : > { %v2791_v23 = vmul.f32 %v3528_v39, %v2790_v15 }
0x19ef   : > { %2268 = vrot.lane.b32.xlu1 %v2266_v53, %s5077_s19  ;;  %v2792_v52 = vadd.f32 %v3528_v39, %v2791_v23 }
0x19f1   : > { %v2796_v59 = vsel %vm2795_vm7, %v3528_v39, %v2792_v52 }
0x19f7   : > { %2463 = vrot.lane.b32.xlu1 %v2461_v6, %s5076_s29 }
0x1a22   : > { %v2713_v3 = vpop.permute.xlu1 %2712 }
0x1a23   : > { %v2715_v30 = vadd.f32 %v2713_v3, %v2660_v5  ;;  %v2801_v5 = vsel %vm2798_vm10, %v2800_v44, %v2796_v59 }
0x1a24   : > { %v2813_v19 = vsub.f32 1.0, %v2801_v5  ;;  %v2819_v12 = vmul.f32 %v2801_v5, %v4682_v34 }
0x1a25   : > { %3529 = vtanh.f32 %v2715_v30 }
0x1a2b   : > { %v3530_v42 = vpop.eup %3529 }
0x1a2c   : > { %2719 = vrot.lane.b32.xlu0 %v3530_v42, %s5077_s19 }
0x1a31   : > { %v2816_v24 = vpop.permute.xlu1 %2815 }
0x1a32   : > { %v2818_v63 = vmul.f32 %v2816_v24, %v2813_v19 }
0x1a34   : > { %v2820_v51 = vadd.f32 %v2819_v12, %v2818_v63 }
0x1a36   : > { %v2841_v28 = vsel %vm4758_vm1, %v2820_v51, %v4682_v34  ;;  %v2855_v34 = vld [vmem:[%s5101_s8 + $0x18] sm:$0xff]  ;;  %v2833_v46 = vsel %vm4758_vm1, %v2820_v51, 0.0 }
0x1a37   : > { %2847 = vrot.lane.b32.xlu0 %v2841_v28, %s5076_s29 }
0x1a39   : > { %v795_v41 = vpop.permute.xlu1 %794 }
0x1a3a   : > { %799 = vst.msk [vmem:[%s797_s20] sm:$0xff] %vm798_vm12, %v795_v41  ;;  %s5041_s20 = sshll.u32 %s4869_s30, 3 }
0x1a3b   : > { %s392_s28 = scalar_lea.vmem [#allocation5], %s5041_s20  ;;  %s3572_s20 = scalar_lea.hbm %s5024_s11, 16 }
0x1a3c   : > { %s2914_s4 = sshll.u32 %s392_s28, 4  ;;  %s2915_s4 = int_to_ptr.vmem [resolvable:$true] %s2914_s4 }
0x1a3f   : > { %975 = vrot.lane.b32.xlu0 %v973_v18, %s5076_s29 }
0x1a41   : > { %v1153_v54 = vpop.permute.xlu1 %1152 }
0x1a47   : > { %1338 = vrot.lane.b32.xlu0 %v1336_v0, %s5077_s19  ;;  %v2858_v0 = vld [vmem:[%s5101_s8 + $0x30] sm:$0xff] }
0x1a48   : > { %2876 = vmatpush.msrb.mxu0 %v2858_v0 }
0x1a4a   : > { %2877 = vmatpush.msrb.mxu0 %v2857_v35 }
0x1a4f   : > { %1533 = vrot.lane.b32.xlu0 %v1531_v62, %s5076_s29  ;;  %v2717_v62 = vsub.f32 1.0, %v4714_v31  ;;  %v2854_v31 = vld [vmem:[%s5101_s8 + $0x10] sm:$0xff] }
0x1a57   : > { %1896 = vrot.lane.b32.xlu0 %v1894_v48, %s5077_s19 }
0x1a5f   : > { %2091 = vrot.lane.b32.xlu0 %v2089_v7, %s5076_s29  ;;  %v2856_v7 = vld [vmem:[%s5101_s8 + $0x20] sm:$0xff] }
0x1a60   : > { %2878 = vmatpush.msrb.mxu0 %v2856_v7 }
0x1a62   : > { %2879 = vmatpush.msrb.mxu0 %v2855_v34 }
0x1a64   : > { %2880 = vmatpush.msrb.mxu0 %v2854_v31 }
0x1a66   : > { %2881 = vmatpush.msrb.mxu0 %v2853_v49 }
0x1a67   : > { %2454 = vrot.lane.b32.xlu0 %v2452_v16, %s5077_s19 }
0x1a68   : > { %2882 = vmatpush.msrb.mxu0 %v2852_v50 }
0x1a6f   : > { %2649 = vrot.lane.b32.xlu0 %v2647_v60, %s5076_s29 }
0x1a9e   : > { %v2720_v45 = vpop.permute.xlu0 %2719 }
0x1a9f   : > { %v2722_v48 = vmul.f32 %v2720_v45, %v2717_v62 }
0x1aa1   : > { %v2724_v40 = vadd.f32 %v2723_v58, %v2722_v48 }
0x1aa3   : > { %v2840_v20 = vsel %vm4758_vm1, %v2724_v40, %v4693_v27  ;;  %v2824_v43 = vsel %vm4758_vm1, %v2724_v40, 0.0  ;;  %v1159_v27 = vsel %vm4105_vm8, %v4122_v32, 0.0  ;;  %v2638_v32 = vsel %vm4672_vm11, %v4687_v22, 0.0 }
0x1aa4   : > { %2843 = vrot.lane.b32.xlu2 %v2840_v20, %s5077_s19  ;;  %2826 = vrot.lane.b32.xlu1 %v2824_v43, %s5077_s19  ;;  %vm5102_vm1 = vcmask 523264  }
0x1aa5   : > { %vm5103_vm9 = vmmov %vm5102_vm1 }
0x1aa9   : > { %v2848_v37 = vpop.permute.xlu0 %2847 }
0x1aac   : > { %966 = vrot.lane.b32.xlu2 %v964_v33, %s5077_s19 }
0x1ab4   : > { %1161 = vrot.lane.b32.xlu2 %v1159_v27, %s5076_s29 }
0x1abc   : > { %1524 = vrot.lane.b32.xlu2 %v1522_v56, %s5077_s19  ;;  %v976_v56 = vpop.permute.xlu0 %975 }
0x1ac4   : > { %1719 = vrot.lane.b32.xlu2 %v1717_v14, %s5076_s29 }
0x1acc   : > { %2082 = vrot.lane.b32.xlu2 %v2080_v4, %s5077_s19 }
0x1ad4   : > { %2277 = vrot.lane.b32.xlu2 %v2275_v8, %s5076_s29 }
0x1adc   : > { %2640 = vrot.lane.b32.xlu2 %v2638_v32, %s5077_s19  ;;  %s5042_s19 = sshll.u32 %s3741_s0, 3 }
0x1add   : > { %s2912_s27 = scalar_lea.hbm %s5024_s11, %s5042_s19 }
0x1ade   : > { %s2916_s5 = sshll.u32 %s2912_s27, 4  ;;  %s2917_s5 = int_to_ptr.hbm [resolvable:$true] %s2916_s5 }
0x1adf   : > { %s3566_s8 = sshra.s32 %s2917_s5, 4  ;;  %s3567_s8 = int_to_ptr.hbm [resolvable:$true] %s3566_s8 }
0x1ae0   : > { %s3568_s24 = scalar_lea.hbm %s3567_s8, 8  ;;  %p3573_p11 = scmp.lt.s32.totalorder %s3567_s8, %s5024_s11 }
0x1ae1   : > { %p3569_p12 = scmp.ne.s32.totalorder %s3567_s8, %s3568_s24  ;;  %p3574_p1 = scmp.lt.s32.totalorder %s3572_s20, %s3568_s24 }
0x1ae3   : > { %p3570_p0 = pnand %p3569_p12, %p3758_p5  ;;  %p3575_p9 = por %p3574_p1, %p3573_p11 }
0x1ae4   : > { %2835 = vrot.lane.b32.xlu2 %v2833_v46, %s5076_s29 }
0x1ae5   : > { %p3571_p7 = pneg %p3570_p0 }
0x1ae7   : > { %p3576_p3 = pnand %p3575_p9, %p3571_p7 }
0x1afe   : > { %v2844_v2 = vpop.permute.xlu2 %2843 }
0x1aff   : > { %v2850_v14 = vsel %vm437_vm0, %v2844_v2, %v2848_v37 }
0x1b00   : > { %3268 = vmatmul.msk.f32.vlgmr.msrb.gmra.mxu0 %vm5102_vm1, %v2850_v14  ;;  %2851 = vst.msk [vmem:[%s392_s28] sm:$0xff] %vm5103_vm9, %v2850_v14 }
0x1b01   : > { %3579 = shalt.err (!%p3576_p3)
}
0x1b02   : > { %3288 = dma.vmem_to_hbm [thread:$0]  (%p3758_p5), %s2915_s4, 128, %s2917_s5, %s2894_s7   ;;  %v1339_v38 = vpop.permute.xlu0 %1338  ;;  %v1348_v4 = vpop.permute.xlu1 %1347 }
0x1b03   : > { %s978_s9 = scalar_lea.vmem %s4018_s21, %s3157_s6  ;;  %s5148_s22 = smov (!%p982_p2, %s5124_s22), 2 }
0x1b04   : > { %s5150_s1 = smov (!%p1168_p4, %s5126_s1), 3  ;;  %s3168_s8 = sshll.u32 %s5148_s22, 3 }
0x1b05   : > { %s3179_s5 = sshll.u32 %s5150_s1, 3  ;;  %s1164_s6 = scalar_lea.vmem %s4018_s21, %s3168_s8 }
0x1b06   : > { %v967_v55 = vpop.permute.xlu2 %966  ;;  %s5152_s10 = smov (!%p1354_p8, %s5128_s10), 4  ;;  %s1350_s7 = scalar_lea.vmem %s4018_s21, %s3179_s5 }
0x1b07   : > { %3156 = vst.msk [vmem:[%s4018_s21 + $0x8] sm:$0xff] %vm437_vm0, %v967_v55  ;;  %s3190_s24 = sshll.u32 %s5152_s10, 3  ;;  %s5154_s2 = smov (!%p1540_p10, %s5130_s2), 5 }
0x1b08   : > { %979 = vst.msk [vmem:[%s978_s9] sm:$0xff] %vm798_vm12, %v976_v56  ;;  %s1536_s18 = scalar_lea.vmem %s4018_s21, %s3190_s24  ;;  %s5156_s3 = smov (!%p1726_p13, %s5132_s3), 6 }
0x1b09   : > { %3167 = vst.msk [vmem:[%s4018_s21 + $0x10] sm:$0xff] %vm437_vm0, %v1153_v54  ;;  %s3201_s22 = sshll.u32 %s5154_s2, 3  ;;  %s3212_s10 = sshll.u32 %s5156_s3, 3 }
0x1b0a   : > { %v1534_v21 = vpop.permute.xlu0 %1533  ;;  %v1711_v1 = vpop.permute.xlu1 %1710  ;;  %s1722_s1 = scalar_lea.vmem %s4018_s21, %s3201_s22  ;;  %p5104_p2 = scmp.gt.s32.totalorder %s3975_s16, 7 }
0x1b0b   : > { %s1908_s20 = scalar_lea.vmem %s4018_s21, %s3212_s10  ;;  %p5105_p4 = scmp.gt.s32.totalorder %s3975_s16, 8 }
0x1b0c   : > { %s5158_s25 = smov (!%p5104_p2, %s5134_s25), 7  ;;  %p5106_p8 = scmp.gt.s32.totalorder %s3975_s16, 9 }
0x1b0d   : > { %s3223_s2 = sshll.u32 %s5158_s25, 3  ;;  %s5160_s23 = smov (!%p5105_p4, %s5136_s23), 8 }
0x1b0e   : > { %v1162_v11 = vpop.permute.xlu2 %1161  ;;  %s2094_s3 = scalar_lea.vmem %s4018_s21, %s3223_s2  ;;  %s5162_s26 = smov (!%p5106_p8, %s5138_s26), 9 }
0x1b0f   : > { %1165 = vst.msk [vmem:[%s1164_s6] sm:$0xff] %vm798_vm12, %v1162_v11  ;;  %s3234_s25 = sshll.u32 %s5160_s23, 3  ;;  %s3245_s19 = sshll.u32 %s5162_s26, 3 }
0x1b10   : > { %3178 = vst.msk [vmem:[%s4018_s21 + $0x18] sm:$0xff] %vm437_vm0, %v1339_v38  ;;  %s2280_s27 = scalar_lea.vmem %s4018_s21, %s3234_s25  ;;  %p5107_p10 = scmp.gt.s32.totalorder %s3975_s16, 10 }
0x1b11   : > { %1351 = vst.msk [vmem:[%s1350_s7] sm:$0xff] %vm798_vm12, %v1348_v4  ;;  %s2466_s28 = scalar_lea.vmem %s4018_s21, %s3245_s19  ;;  %p5108_p13 = scmp.gt.s32.totalorder %s3975_s16, 11 }
0x1b12   : > { %v1897_v13 = vpop.permute.xlu0 %1896  ;;  %v1906_v53 = vpop.permute.xlu1 %1905  ;;  %s5164_s15 = smov (!%p5107_p10, %s5140_s15), 10  ;;  %s5110_s6 = sld [smem:[#allocation26_spill]] }
0x1b13   : > { %s3256_s4 = sshll.u32 %s5164_s15, 3  ;;  %s5166_s13 = smov (!%p5108_p13, %s5142_s13), 11 }
0x1b14   : > { %s2652_s23 = scalar_lea.vmem %s4018_s21, %s3256_s4  ;;  %s3267_s26 = sshll.u32 %s5166_s13, 3 }
0x1b15   : > { %s2838_s29 = scalar_lea.vmem %s4018_s21, %s3267_s26  ;;  %s5109_s15 = sshll.u32 %s3741_s0, 3 }
0x1b16   : > { %v1525_v22 = vpop.permute.xlu2 %1524  ;;  %s2926_s16 = scalar_lea.hbm %s5025_s12, %s5109_s15  ;;  %s5111_s7 = sshll.u32 %s4869_s30, 3 }
0x1b17   : > { %3189 = vst.msk [vmem:[%s4018_s21 + $0x20] sm:$0xff] %vm437_vm0, %v1525_v22  ;;  %s399_s24 = scalar_lea.vmem [#allocation7], %s5111_s7  ;;  %s2930_s13 = sshll.u32 %s2926_s16, 4  ;;  %s2931_s13 = int_to_ptr.hbm [resolvable:$true] %s2930_s13 }
0x1b18   : > { %1537 = vst.msk [vmem:[%s1536_s18] sm:$0xff] %vm798_vm12, %v1534_v21  ;;  %v3338_v52 = vld [vmem:[%s5110_s6] ss:$0 sm:$0xff]  ;;  %s2928_s18 = sshll.u32 %s399_s24, 4  ;;  %s2899_s0 = scalar_lea.sflag [#allocation8], %s4869_s30  ;;  %s2929_s18 = int_to_ptr.vmem [resolvable:$true] %s2928_s18 }
0x1b19   : > { %3200 = vst.msk [vmem:[%s4018_s21 + $0x28] sm:$0xff] %vm437_vm0, %v1711_v1 }
0x1b1a   : > { %v2092_v10 = vpop.permute.xlu0 %2091  ;;  %v2269_v9 = vpop.permute.xlu1 %2268 }
0x1b1e   : > { %v1720_v6 = vpop.permute.xlu2 %1719 }
0x1b1f   : > { %1723 = vst.msk [vmem:[%s1722_s1] sm:$0xff] %vm798_vm12, %v1720_v6 }
0x1b20   : > { %3211 = vst.msk [vmem:[%s4018_s21 + $0x30] sm:$0xff] %vm437_vm0, %v1897_v13 }
0x1b21   : > { %1909 = vst.msk [vmem:[%s1908_s20] sm:$0xff] %vm798_vm12, %v1906_v53  ;;  %s3600_s20 = scalar_lea.hbm %s5025_s12, 16 }
0x1b22   : > { %v2455_v47 = vpop.permute.xlu0 %2454  ;;  %v2464_v29 = vpop.permute.xlu1 %2463 }
0x1b26   : > { %v2083_v57 = vpop.permute.xlu2 %2082 }
0x1b27   : > { %3222 = vst.msk [vmem:[%s4018_s21 + $0x38] sm:$0xff] %vm437_vm0, %v2083_v57 }
0x1b28   : > { %2095 = vst.msk [vmem:[%s2094_s3] sm:$0xff] %vm798_vm12, %v2092_v10 }
0x1b29   : > { %3233 = vst.msk [vmem:[%s4018_s21 + $0x40] sm:$0xff] %vm437_vm0, %v2269_v9 }
0x1b2a   : > { %v2650_v3 = vpop.permute.xlu0 %2649  ;;  %v2827_v23 = vpop.permute.xlu1 %2826 }
0x1b2e   : > { %v2278_v39 = vpop.permute.xlu2 %2277 }
0x1b2f   : > { %2281 = vst.msk [vmem:[%s2280_s27] sm:$0xff] %vm798_vm12, %v2278_v39 }
0x1b30   : > { %3244 = vst.msk [vmem:[%s4018_s21 + $0x48] sm:$0xff] %vm437_vm0, %v2455_v47 }
0x1b31   : > { %2467 = vst.msk [vmem:[%s2466_s28] sm:$0xff] %vm798_vm12, %v2464_v29 }
0x1b36   : > { %v2641_v15 = vpop.permute.xlu2 %2640 }
0x1b37   : > { %3255 = vst.msk [vmem:[%s4018_s21 + $0x50] sm:$0xff] %vm437_vm0, %v2641_v15 }
0x1b38   : > { %2653 = vst.msk [vmem:[%s2652_s23] sm:$0xff] %vm798_vm12, %v2650_v3 }
0x1b39   : > { %3266 = vst.msk [vmem:[%s4018_s21 + $0x58] sm:$0xff] %vm437_vm0, %v2827_v23  ;;  %s3594_s21 = sshra.s32 %s2931_s13, 4  ;;  %s3595_s21 = int_to_ptr.hbm [resolvable:$true] %s3594_s21 }
0x1b3a   : > { %s3596_s22 = scalar_lea.hbm %s3595_s21, 8  ;;  %p3601_p11 = scmp.lt.s32.totalorder %s3595_s21, %s5025_s12 }
0x1b3b   : > { %p3597_p3 = scmp.ne.s32.totalorder %s3595_s21, %s3596_s22  ;;  %p3602_p7 = scmp.lt.s32.totalorder %s3600_s20, %s3596_s22 }
0x1b3d   : > { %p3598_p9 = pnand %p3597_p3, %p3758_p5  ;;  %p3603_p12 = por %p3602_p7, %p3601_p11 }
0x1b3e   : > { %v2836_v30 = vpop.permute.xlu2 %2835 }
0x1b3f   : > { %2839 = vst.msk [vmem:[%s2838_s29] sm:$0xff] %vm798_vm12, %v2836_v30  ;;  %p3599_p1 = pneg %p3598_p9 }
0x1b41   : > { %p3604_p0 = pnand %p3603_p12, %p3599_p1 }
0x1b7d   : > { %v2884_v36 = vpop.f32.mrf.mxu0 }
0x1b7e   : > { %v2885_v25 = vadd.f32 %v3338_v52, %v2884_v36 }
0x1b80   : > { %2887 = vst.msk [vmem:[%s399_s24] sm:$0xff] %vm437_vm0, %v2885_v25 }
0x1b81   : > { %3607 = shalt.err (!%p3604_p0)
}
0x1b82   : > { %3289 = dma.vmem_to_hbm [thread:$0]  (%p3758_p5), %s2929_s18, 128, %s2931_s13, %s2899_s0  }
0x1b83 PF: > { %s5112_s30 = sld [smem:[#allocation14_spill]] }
0x1b84   : > { %s5113_s25 = sld [smem:[#allocation11_spill]] }
0x1b89   : > { %p3299_p2 = scmp.ge.s32.totalorder %s5112_s30, 2 }
0x1b8a   : > { %s2950_s27 = sand.u32 1, %s5113_s25  }
0x1b8b   : > { %p3293_p4 = pnand %p3299_p2, %p3762_p6  ;;  %s2951_s28 = scalar_lea.sflag [#allocation6], %s2950_s27 }
0x1b8d   : > { %p3294_p8 = pneg %p3293_p4 }
0x1b8f   : > { %3625 = dma.done.wait (%p3294_p8), %s2951_s28, 128  }
0x1b90   : > { %3627 = vsyncadd (%p3294_p8), %s2951_s28, 4294967168  ;;  %s2961_s4 = scalar_lea.sflag [#allocation8], %s2950_s27 }
0x1b91   : > { %3629 = dma.done.wait (%p3294_p8), %s2961_s4, 128  }
0x1b92   : > { %3631 = vsyncadd (%p3294_p8), %s2961_s4, 4294967168  ;;  %s5115_s26 = sld [smem:[#allocation15_spill]] }
0x1b93   : > { %s5116_s23 = sld [smem:[#allocation12_spill]] }
0x1b94   : > { %s5117_s24 = sld [smem:[#allocation13_spill]] }
0x1b95   : > { %s5118_s25 = sld [smem:[#allocation16_spill]] }
0x1b98   : > { %p27_p5 = scmp.ge.s32.totalorder %s5115_s26, 4  }
0x1b9a   :  { %29 = sbr.rel (!%p27_p5) target bundleno = 17 (0x11), region = 167 }
0x1b9f   :  { %2967 = vsyncpa [#allocation6], 1 }
0x1ba0   :  { %2969 = vsyncpa [#allocation6 + $0x1], 1 }
0x1ba1   :  { %2970 = vsyncpa [#allocation8], 1 }
0x1ba2   :  { %2972 = vsyncpa [#allocation8 + $0x1], 1 }

</bundles_post_ra>
